<compile_context>
chip_gen: v7x
topology: tpu7x:2x2x1
jax: 0.10.0
libtpu: 0.0.40
codegen_flags: <defaults>
</compile_context>

<pallas_src>
import functools
import math

import jax
import jax.numpy as jnp
from jax.experimental import pallas as pl
from jax.experimental.pallas import tpu as pltpu


_LANE = 128
_SUBLANE = 8
_MAX_TC = 128                        # cap on time steps per grid step
_VMEM_BUDGET = 24 * 1024 * 1024      # working-set budget used to derive tc
_VMEM_LIMIT_FLOOR = 16 * 1024 * 1024
_VMEM_LIMIT_CEIL = 32 * 1024 * 1024


def _round_up(n: int, m: int) -> int:
    return ((n + m - 1) // m) * m


def _plan_time_chunk(T: int, Bp: int, Hp: int, num_layers: int):
    """Derive the time chunk (steps per grid iteration) from a VMEM budget."""
    G = 4 * Hp
    f32 = 4
    # bytes that scale with tc:
    #   gates0 block (double-buffered) + y block (double-buffered)
    #   + act scratch + gates scratch
    per_tc = (2 * Bp * G + 2 * Bp * Hp + Bp * Hp + Bp * G) * f32
    # tc-independent residents: weights, bias, h0/c0/hN/cN blocks, state scratch
    fixed = (2 * (max(num_layers - 1, 1) + num_layers) * Hp * G     # wih_rest + whh (x2 bufs)
             + 2 * num_layers * G                                   # bias (x2 bufs)
             + (2 * 2 + 2 * 2 + 2) * num_layers * Bp * Hp           # h0,c0,hN,cN (x2) + h,c scratch
             ) * f32
    tc_vmem = max(1, (_VMEM_BUDGET - fixed) // per_tc)
    tc = max(1, min(_MAX_TC, T, int(tc_vmem)))
    need = fixed + tc * per_tc
    vmem_limit = int(min(max(need + 4 * 1024 * 1024, _VMEM_LIMIT_FLOOR),
                         _VMEM_LIMIT_CEIL))
    return tc, vmem_limit


# ----------------------------------------------------------------------------
# Fused multi-layer LSTM recurrence kernel.
#
# Inputs (per grid step t over time chunks):
#   gates0_ref : (tc, Bp, 4Hp) f32   layer-0 x @ W_ih^T (bias NOT included)
#   wih_ref    : (Lw, Hp, 4Hp) f32   W_ih^T for layers 1..L-1 (dummy if L==1)
#   whh_ref    : (L,  Hp, 4Hp) f32   W_hh^T per layer
#   bias_ref   : (L,  1,  4Hp) f32   b_ih + b_hh per layer
#   h0_ref     : (L,  Bp, Hp)  f32
#   c0_ref     : (L,  Bp, Hp)  f32
# Outputs:
#   y_ref      : (tc, Bp, Hp)  f32   final layer activations for this chunk
#   hN_ref     : (L,  Bp, Hp)  f32
#   cN_ref     : (L,  Bp, Hp)  f32
# Scratch (persist across grid steps):
#   h_sc, c_sc : (L,  Bp, Hp)  f32   running state per layer
#   act_sc     : (tc, Bp, Hp)  f32   previous layer's chunk activations
#   gates_sc   : (tc, Bp, 4Hp) f32   current layer's chunk gate pre-activations
# ----------------------------------------------------------------------------
def _lstm_fused_kernel(gates0_ref, wih_ref, whh_ref, bias_ref, h0_ref, c0_ref,
                       y_ref, hN_ref, cN_ref,
                       h_sc, c_sc, act_sc, gates_sc,
                       *, hp, tc, num_layers, t_actual, t_padded):
    @pl.when(pl.program_id(0) == 0)
    def _():
        h_sc[...] = h0_ref[...]
        c_sc[...] = c0_ref[...]

    chunk_start = pl.program_id(0) * tc
    mask_time = (t_padded != t_actual)      # static: only last chunk may pad
    bp = h0_ref.shape[1]
    unroll = int(min(tc, 8))

    for layer in range(num_layers):         # static python loop (trace-time)
        if layer == 0:
            gate_src = gates0_ref           # precomputed by the XLA einsum
        else:
            # Chunk-level input projection: one MXU matmul with M = tc*Bp.
            act2d = act_sc[...].reshape(tc * bp, hp)
            proj = jnp.dot(act2d, wih_ref[layer - 1],
                           preferred_element_type=jnp.float32)
            gates_sc[...] = proj.reshape(gates_sc.shape)
            gate_src = gates_sc

        bias = bias_ref[layer]              # (1, 4Hp) -> broadcast over batch
        whh = whh_ref[layer]                # (Hp, 4Hp)
        last_layer = (layer == num_layers - 1)

        def step(j, carry, gate_src=gate_src, bias=bias, whh=whh,
                 last_layer=last_layer, layer=layer):
            h_prev = h_sc[layer]
            c_prev = c_sc[layer]
            gates = gate_src[j] + bias + jnp.dot(
                h_prev, whh, preferred_element_type=jnp.float32)
            i_g = jax.nn.sigmoid(gates[:, 0 * hp:1 * hp])
            f_g = jax.nn.sigmoid(gates[:, 1 * hp:2 * hp])
            g_g = jnp.tanh(gates[:, 2 * hp:3 * hp])
            o_g = jax.nn.sigmoid(gates[:, 3 * hp:4 * hp])
            c_new = f_g * c_prev + i_g * g_g
            h_new = o_g * jnp.tanh(c_new)
            if mask_time:
                valid = (chunk_start + j) < t_actual
                c_new = jnp.where(valid, c_new, c_prev)
                h_new = jnp.where(valid, h_new, h_prev)
            h_sc[layer] = h_new
            c_sc[layer] = c_new
            if last_layer:
                y_ref[j] = h_new            # lane-dense (Bp, Hp) store
            else:
                act_sc[j] = h_new           # stays in VMEM for the next layer
            return carry

        jax.lax.fori_loop(0, tc, step, 0, unroll=unroll)

    # Cheap unconditional writes; constant-index output block flushes at end.
    hN_ref[...] = h_sc[...]
    cN_ref[...] = c_sc[...]


def lstm_fused_pallas(gates0, wih_rest, whh_all, bias_all, h0, c0, *,
                      hp, tc, num_layers, t_actual, vmem_limit):
    Tp, Bp, G = gates0.shape
    assert G == 4 * hp and Tp % tc == 0
    L = num_layers
    Lw = wih_rest.shape[0]
    kernel = functools.partial(_lstm_fused_kernel, hp=hp, tc=tc,
                               num_layers=num_layers, t_actual=t_actual,
                               t_padded=Tp)

    y, h_n, c_n = pl.pallas_call(
        kernel,
        out_shape=(jax.ShapeDtypeStruct((Tp, Bp, hp), jnp.float32),
                   jax.ShapeDtypeStruct((L, Bp, hp), jnp.float32),
                   jax.ShapeDtypeStruct((L, Bp, hp), jnp.float32)),
        grid_spec=pltpu.PrefetchScalarGridSpec(
            num_scalar_prefetch=0,
            grid=(Tp // tc,),
            in_specs=[
                pl.BlockSpec((tc, Bp, G), lambda t: (t, 0, 0)),   # gates0 chunk
                pl.BlockSpec((Lw, hp, G), lambda t: (0, 0, 0)),   # W_ih^T (layers>=1)
                pl.BlockSpec((L, hp, G), lambda t: (0, 0, 0)),    # W_hh^T
                pl.BlockSpec((L, 1, G), lambda t: (0, 0, 0)),     # bias
                pl.BlockSpec((L, Bp, hp), lambda t: (0, 0, 0)),   # h0
                pl.BlockSpec((L, Bp, hp), lambda t: (0, 0, 0)),   # c0
            ],
            out_specs=[
                pl.BlockSpec((tc, Bp, hp), lambda t: (t, 0, 0)),  # y chunk
                pl.BlockSpec((L, Bp, hp), lambda t: (0, 0, 0)),   # h_N
                pl.BlockSpec((L, Bp, hp), lambda t: (0, 0, 0)),   # c_N
            ],
            scratch_shapes=[
                pltpu.VMEM((L, Bp, hp), jnp.float32),             # h state
                pltpu.VMEM((L, Bp, hp), jnp.float32),             # c state
                pltpu.VMEM((tc, Bp, hp), jnp.float32),            # chunk activations
                pltpu.VMEM((tc, Bp, G), jnp.float32),             # chunk gates (layers>=1)
            ],
        ),
        compiler_params=pltpu.CompilerParams(
            # TODO(synk): add a 'parallel' batch grid dim for v7x megacore when Bp >= 16.
            dimension_semantics=("arbitrary",),       # sequential recurrence
            vmem_limit_bytes=vmem_limit),
    )(gates0, wih_rest, whh_all, bias_all, h0, c0)
    return y, h_n, c_n


# ----------------------------------------------------------------------------
# CPCAR module (JAX/Pallas port of the PyTorch nn.Module)
# ----------------------------------------------------------------------------
class CPCAR:
    def __init__(self, dim_encoded: int, dim_output: int, keep_hidden: bool,
                 num_layers: int, key):
        self.dim_encoded = dim_encoded
        self.dim_output = dim_output
        self.keep_hidden = keep_hidden
        self.num_layers = num_layers
        self.hidden = None
        self.hp = _round_up(dim_output, _LANE)    # lane-padded hidden size

        H, Hp = dim_output, self.hp
        k = 1.0 / math.sqrt(float(dim_output))

        # Raw PyTorch-layout parameters (kept for the reference check).
        self.raw = []
        wih_rest, whh_all, bias_all = [], [], []
        self.wih0 = None
        for layer in range(num_layers):
            d_in = dim_encoded if layer == 0 else dim_output
            key, k1, k2, k3, k4 = jax.random.split(key, 5)
            w_ih = jax.random.uniform(k1, (4 * H, d_in), jnp.float32, -k, k)
            w_hh = jax.random.uniform(k2, (4 * H, H), jnp.float32, -k, k)
            b_ih = jax.random.uniform(k3, (4 * H,), jnp.float32, -k, k)
            b_hh = jax.random.uniform(k4, (4 * H,), jnp.float32, -k, k)
            self.raw.append((w_ih, w_hh, b_ih, b_hh))

            # Padded, transposed gate-block layout [i|f|g|o], each block Hp
            # wide; padded rows/columns are zero so padded lanes stay zero
            # and never pollute real lanes.
            d_in_p = dim_encoded if layer == 0 else Hp
            wih_p = jnp.zeros((d_in_p, 4 * Hp), jnp.float32)
            whh_p = jnp.zeros((Hp, 4 * Hp), jnp.float32)
            b_p = jnp.zeros((4 * Hp,), jnp.float32)
            for g in range(4):
                wih_p = wih_p.at[:d_in, g * Hp:g * Hp + H].set(
                    w_ih[g * H:(g + 1) * H, :].T)
                whh_p = whh_p.at[:H, g * Hp:g * Hp + H].set(
                    w_hh[g * H:(g + 1) * H, :].T)
                b_p = b_p.at[g * Hp:g * Hp + H].set(
                    b_ih[g * H:(g + 1) * H] + b_hh[g * H:(g + 1) * H])

            if layer == 0:
                self.wih0 = wih_p
            else:
                wih_rest.append(wih_p)
            whh_all.append(whh_p)
            bias_all.append(b_p.reshape(1, 4 * Hp))

        if wih_rest:
            self.wih_rest = jnp.stack(wih_rest)
        else:
            self.wih_rest = jnp.zeros((1, Hp, 4 * Hp), jnp.float32)  # dummy (unused)
        self.whh_all = jnp.stack(whh_all)            # (L, Hp, 4Hp)
        self.bias_all = jnp.stack(bias_all)          # (L, 1,  4Hp)

    def get_output_dim(self):
        return self.dim_output

    def __call__(self, x):
        """x :: (B, T, Feat_i) -> (B, T, Feat_o)  (batch_first)."""
        B, T, _ = x.shape
        H, Hp = self.dim_output, self.hp
        Bp = _round_up(B, _SUBLANE)
        tc, vmem_limit = _plan_time_chunk(T, Bp, Hp, self.num_layers)
        Tp = _round_up(T, tc)

        x_p = x if Bp == B else jnp.pad(x, ((0, Bp - B), (0, 0), (0, 0)))

        if self.hidden is None:
            h0 = jnp.zeros((self.num_layers, Bp, Hp), jnp.float32)
            c0 = jnp.zeros((self.num_layers, Bp, Hp), jnp.float32)
        else:
            h0, c0 = self.hidden
            if h0.shape[1] != Bp:
                raise ValueError(
                    "keep_hidden: batch size changed between calls "
                    f"(cached Bp={h0.shape[1]}, new Bp={Bp})")

        # Layer-0 input projection for all T at once (big MXU-friendly matmul,
        # M = T*Bp); the einsum absorbs the batch_first -> time-major layout
        # change.  f32 operands (bf16 x bf16 dots are not portable).  Bias is
        # added inside the kernel.
        gates0 = jnp.einsum('btd,dg->tbg', x_p, self.wih0,
                            preferred_element_type=jnp.float32)
        if Tp != T:
            gates0 = jnp.pad(gates0, ((0, Tp - T), (0, 0), (0, 0)))

        y, h_n, c_n = lstm_fused_pallas(
            gates0, self.wih_rest, self.whh_all, self.bias_all, h0, c0,
            hp=Hp, tc=tc, num_layers=self.num_layers, t_actual=T,
            vmem_limit=vmem_limit)

        out = jnp.transpose(y, (1, 0, 2))[:B, :T, :H]   # back to (B, T, H)

        if self.keep_hidden:
            # detach() parity: no gradient flows through the cached state.
            self.hidden = (jax.lax.stop_gradient(h_n),
                           jax.lax.stop_gradient(c_n))
        return out


# ----------------------------------------------------------------------------
# Pure-JAX f32 reference implementing PyTorch nn.LSTM math (unpadded).
# ----------------------------------------------------------------------------
def _lstm_ref(x, raw_params, num_layers, H):
    B, T, _ = x.shape
    y = x
    h_fin, c_fin = [], []
    for layer in range(num_layers):
        w_ih, w_hh, b_ih, b_hh = raw_params[layer]
        h = jnp.zeros((B, H), jnp.float32)
        c = jnp.zeros((B, H), jnp.float32)
        outs = []
        for t in range(T):
            xt = y[:, t, :]
            g = xt @ w_ih.T + b_ih + h @ w_hh.T + b_hh
            i = jax.nn.sigmoid(g[:, 0 * H:1 * H])
            f = jax.nn.sigmoid(g[:, 1 * H:2 * H])
            gg = jnp.tanh(g[:, 2 * H:3 * H])
            o = jax.nn.sigmoid(g[:, 3 * H:4 * H])
            c = f * c + i * gg
            h = o * jnp.tanh(c)
            outs.append(h)
        y = jnp.stack(outs, axis=1)
        h_fin.append(h)
        c_fin.append(c)
    return y, jnp.stack(h_fin), jnp.stack(c_fin)


if __name__ == "__main__":
    B, T = 2, 8
    dim_encoded, dim_output, num_layers = 16, 32, 2

    key = jax.random.PRNGKey(0)
    key, k_param, k_x = jax.random.split(key, 3)

    model = CPCAR(dim_encoded, dim_output, keep_hidden=True,
                  num_layers=num_layers, key=k_param)

    x = jax.random.normal(k_x, (B, T, dim_encoded), jnp.float32)

    out = jax.block_until_ready(model(x))
    assert out.shape == (B, T, dim_output)
    assert model.hidden is not None
    assert model.hidden[0].shape[0] == num_layers

    y_ref, h_ref, c_ref = _lstm_ref(x, model.raw, num_layers, dim_output)
    assert jnp.allclose(out, y_ref, atol=1e-4, rtol=1e-4), "y mismatch vs reference"
    assert jnp.allclose(model.hidden[0][:, :B, :dim_output], h_ref,
                        atol=1e-4, rtol=1e-4), "h_N mismatch vs reference"
    assert jnp.allclose(model.hidden[1][:, :B, :dim_output], c_ref,
                        atol=1e-4, rtol=1e-4), "c_N mismatch vs reference"

    print("KERNEL_OK")
</pallas_src>

<mosaic_0001>
module attributes {stable_mosaic.version = 11 : i64} {
  func.func @_lstm_fused_kernel(%arg0: i32, %arg1: memref<8x8x512xf32, #tpu.memory_space<vmem>>, %arg2: memref<1x128x512xf32, #tpu.memory_space<vmem>>, %arg3: memref<2x128x512xf32, #tpu.memory_space<vmem>>, %arg4: memref<2x1x512xf32, #tpu.memory_space<vmem>>, %arg5: memref<2x8x128xf32, #tpu.memory_space<vmem>>, %arg6: memref<2x8x128xf32, #tpu.memory_space<vmem>>, %arg7: memref<8x8x128xf32, #tpu.memory_space<vmem>>, %arg8: memref<2x8x128xf32, #tpu.memory_space<vmem>>, %arg9: memref<2x8x128xf32, #tpu.memory_space<vmem>>, %arg10: memref<2x8x128xf32, #tpu.memory_space<vmem>>, %arg11: memref<2x8x128xf32, #tpu.memory_space<vmem>>, %arg12: memref<8x8x128xf32, #tpu.memory_space<vmem>>, %arg13: memref<8x8x512xf32, #tpu.memory_space<vmem>>) attributes {dimension_semantics = [#tpu.dimension_semantics<arbitrary>], iteration_bounds = array<i64: 1>, scalar_prefetch = 0 : i64, scratch_operands = 4 : i64, tpu.core_type = #tpu.core_type<tc>, window_params = [{transform_indices = @transform_0, window_bounds = array<i64: 8, 8, 512>}, {pipeline_mode = #tpu.pipeline_mode<synchronous>, transform_indices = @transform_1, window_bounds = array<i64: 1, 128, 512>}, {pipeline_mode = #tpu.pipeline_mode<synchronous>, transform_indices = @transform_2, window_bounds = array<i64: 2, 128, 512>}, {pipeline_mode = #tpu.pipeline_mode<synchronous>, transform_indices = @transform_3, window_bounds = array<i64: 2, 1, 512>}, {pipeline_mode = #tpu.pipeline_mode<synchronous>, transform_indices = @transform_4, window_bounds = array<i64: 2, 8, 128>}, {pipeline_mode = #tpu.pipeline_mode<synchronous>, transform_indices = @transform_5, window_bounds = array<i64: 2, 8, 128>}, {transform_indices = @transform_6, window_bounds = array<i64: 8, 8, 128>}, {pipeline_mode = #tpu.pipeline_mode<synchronous>, transform_indices = @transform_7, window_bounds = array<i64: 2, 8, 128>}, {pipeline_mode = #tpu.pipeline_mode<synchronous>, transform_indices = @transform_8, window_bounds = array<i64: 2, 8, 128>}]} {
    %c0_i32 = arith.constant 0 : i32
    %0 = arith.cmpi eq, %arg0, %c0_i32 : i32
    %1 = arith.extui %0 : i1 to i32
    %c0_i32_0 = arith.constant 0 : i32
    %2 = arith.cmpi ne, %1, %c0_i32_0 : i32
    scf.if %2 {
      %c0_362 = arith.constant 0 : index
      %c0_363 = arith.constant 0 : index
      %c0_364 = arith.constant 0 : index
      %758 = vector.load %arg5[%c0_362, %c0_363, %c0_364] : memref<2x8x128xf32, #tpu.memory_space<vmem>>, vector<2x8x128xf32>
      %c0_365 = arith.constant 0 : index
      %c0_366 = arith.constant 0 : index
      %c0_367 = arith.constant 0 : index
      %759 = vector.load %arg10[%c0_365, %c0_366, %c0_367] : memref<2x8x128xf32, #tpu.memory_space<vmem>>, vector<2x8x128xf32>
      tpu.vector_store %arg10[%c0_365, %c0_366, %c0_367], %758 {strides = array<i32>} : memref<2x8x128xf32, #tpu.memory_space<vmem>>, vector<2x8x128xf32>,
      %c0_368 = arith.constant 0 : index
      %c0_369 = arith.constant 0 : index
      %c0_370 = arith.constant 0 : index
      %760 = vector.load %arg6[%c0_368, %c0_369, %c0_370] : memref<2x8x128xf32, #tpu.memory_space<vmem>>, vector<2x8x128xf32>
      %c0_371 = arith.constant 0 : index
      %c0_372 = arith.constant 0 : index
      %c0_373 = arith.constant 0 : index
      %761 = vector.load %arg11[%c0_371, %c0_372, %c0_373] : memref<2x8x128xf32, #tpu.memory_space<vmem>>, vector<2x8x128xf32>
      tpu.vector_store %arg11[%c0_371, %c0_372, %c0_373], %760 {strides = array<i32>} : memref<2x8x128xf32, #tpu.memory_space<vmem>>, vector<2x8x128xf32>,
    } else {
    }
    %c0 = arith.constant 0 : index
    %c0_1 = arith.constant 0 : index
    %c0_2 = arith.constant 0 : index
    %3 = vector.load %arg4[%c0, %c0_1, %c0_2] : memref<2x1x512xf32, #tpu.memory_space<vmem>>, vector<1x1x512xf32>
    %4 = vector.shape_cast %3 : vector<1x1x512xf32> to vector<1x512xf32>
    %c0_3 = arith.constant 0 : index
    %c0_4 = arith.constant 0 : index
    %c0_5 = arith.constant 0 : index
    %5 = vector.load %arg3[%c0_3, %c0_4, %c0_5] : memref<2x128x512xf32, #tpu.memory_space<vmem>>, vector<1x128x512xf32>
    %6 = vector.shape_cast %5 : vector<1x128x512xf32> to vector<128x512xf32>
    %c0_i32_6 = arith.constant 0 : i32
    %c0_7 = arith.constant 0 : index
    %c0_8 = arith.constant 0 : index
    %c0_9 = arith.constant 0 : index
    %7 = vector.load %arg10[%c0_7, %c0_8, %c0_9] : memref<2x8x128xf32, #tpu.memory_space<vmem>>, vector<1x8x128xf32>
    %8 = vector.shape_cast %7 : vector<1x8x128xf32> to vector<8x128xf32>
    %c0_10 = arith.constant 0 : index
    %c0_11 = arith.constant 0 : index
    %c0_12 = arith.constant 0 : index
    %9 = vector.load %arg11[%c0_10, %c0_11, %c0_12] : memref<2x8x128xf32, #tpu.memory_space<vmem>>, vector<1x8x128xf32>
    %10 = vector.shape_cast %9 : vector<1x8x128xf32> to vector<8x128xf32>
    %11 = arith.index_cast %c0_i32_6 : i32 to index
    %c0_13 = arith.constant 0 : index
    %c0_14 = arith.constant 0 : index
    %12 = vector.load %arg1[%11, %c0_13, %c0_14] : memref<8x8x512xf32, #tpu.memory_space<vmem>>, vector<1x8x512xf32>
    %13 = vector.shape_cast %12 : vector<1x8x512xf32> to vector<8x512xf32>
    %14 = vector.broadcast %4 : vector<1x512xf32> to vector<8x512xf32>
    %15 = arith.addf %13, %14 : vector<8x512xf32>
    %cst = arith.constant dense<0.000000e+00> : vector<8x512xf32>
    %16 = tpu.matmul %8, %6, %cst {dimension_numbers = #tpu.dot_dimension_numbers<[1], [0], [0], [1], [0, 0, 1, 1], [], []>} : vector<8x128xf32>, vector<128x512xf32>, vector<8x512xf32> -> vector<8x512xf32>
    %17 = arith.addf %15, %16 : vector<8x512xf32>
    %18 = vector.extract_strided_slice %17 {offsets = [0, 0], sizes = [8, 128], strides = [1, 1]} : vector<8x512xf32> to vector<8x128xf32>
    %19 = arith.negf %18 : vector<8x128xf32>
    %20 = math.exp %19 : vector<8x128xf32>
    %cst_15 = arith.constant 1.000000e+00 : f32
    %21 = vector.broadcast %cst_15 : f32 to vector<8x128xf32>
    %22 = arith.addf %21, %20 : vector<8x128xf32>
    %23 = arith.divf %21, %22 : vector<8x128xf32>
    %24 = vector.extract_strided_slice %17 {offsets = [0, 128], sizes = [8, 128], strides = [1, 1]} : vector<8x512xf32> to vector<8x128xf32>
    %25 = arith.negf %24 : vector<8x128xf32>
    %26 = math.exp %25 : vector<8x128xf32>
    %cst_16 = arith.constant 1.000000e+00 : f32
    %27 = vector.broadcast %cst_16 : f32 to vector<8x128xf32>
    %28 = arith.addf %27, %26 : vector<8x128xf32>
    %29 = arith.divf %27, %28 : vector<8x128xf32>
    %30 = vector.extract_strided_slice %17 {offsets = [0, 256], sizes = [8, 128], strides = [1, 1]} : vector<8x512xf32> to vector<8x128xf32>
    %31 = math.tanh %30 : vector<8x128xf32>
    %32 = vector.extract_strided_slice %17 {offsets = [0, 384], sizes = [8, 128], strides = [1, 1]} : vector<8x512xf32> to vector<8x128xf32>
    %33 = arith.negf %32 : vector<8x128xf32>
    %34 = math.exp %33 : vector<8x128xf32>
    %cst_17 = arith.constant 1.000000e+00 : f32
    %35 = vector.broadcast %cst_17 : f32 to vector<8x128xf32>
    %36 = arith.addf %35, %34 : vector<8x128xf32>
    %37 = arith.divf %35, %36 : vector<8x128xf32>
    %38 = arith.mulf %29, %10 : vector<8x128xf32>
    %39 = arith.mulf %23, %31 : vector<8x128xf32>
    %40 = arith.addf %38, %39 : vector<8x128xf32>
    %41 = math.tanh %40 : vector<8x128xf32>
    %42 = arith.mulf %37, %41 : vector<8x128xf32>
    %c0_18 = arith.constant 0 : index
    %c0_19 = arith.constant 0 : index
    %c0_20 = arith.constant 0 : index
    %43 = vector.load %arg10[%c0_18, %c0_19, %c0_20] : memref<2x8x128xf32, #tpu.memory_space<vmem>>, vector<1x8x128xf32>
    %44 = vector.shape_cast %43 : vector<1x8x128xf32> to vector<8x128xf32>
    %45 = vector.shape_cast %42 : vector<8x128xf32> to vector<1x8x128xf32>
    tpu.vector_store %arg10[%c0_18, %c0_19, %c0_20], %45 {strides = array<i32>} : memref<2x8x128xf32, #tpu.memory_space<vmem>>, vector<1x8x128xf32>,
    %c0_21 = arith.constant 0 : index
    %c0_22 = arith.constant 0 : index
    %c0_23 = arith.constant 0 : index
    %46 = vector.load %arg11[%c0_21, %c0_22, %c0_23] : memref<2x8x128xf32, #tpu.memory_space<vmem>>, vector<1x8x128xf32>
    %47 = vector.shape_cast %46 : vector<1x8x128xf32> to vector<8x128xf32>
    %48 = vector.shape_cast %40 : vector<8x128xf32> to vector<1x8x128xf32>
    tpu.vector_store %arg11[%c0_21, %c0_22, %c0_23], %48 {strides = array<i32>} : memref<2x8x128xf32, #tpu.memory_space<vmem>>, vector<1x8x128xf32>,
    %49 = arith.index_cast %c0_i32_6 : i32 to index
    %c0_24 = arith.constant 0 : index
    %c0_25 = arith.constant 0 : index
    %50 = vector.load %arg12[%49, %c0_24, %c0_25] : memref<8x8x128xf32, #tpu.memory_space<vmem>>, vector<1x8x128xf32>
    %51 = vector.shape_cast %50 : vector<1x8x128xf32> to vector<8x128xf32>
    %52 = vector.shape_cast %42 : vector<8x128xf32> to vector<1x8x128xf32>
    tpu.vector_store %arg12[%49, %c0_24, %c0_25], %52 {strides = array<i32>} : memref<8x8x128xf32, #tpu.memory_space<vmem>>, vector<1x8x128xf32>,
    %c1_i32 = arith.constant 1 : i32
    %c0_26 = arith.constant 0 : index
    %c0_27 = arith.constant 0 : index
    %c0_28 = arith.constant 0 : index
    %53 = vector.load %arg10[%c0_26, %c0_27, %c0_28] : memref<2x8x128xf32, #tpu.memory_space<vmem>>, vector<1x8x128xf32>
    %54 = vector.shape_cast %53 : vector<1x8x128xf32> to vector<8x128xf32>
    %c0_29 = arith.constant 0 : index
    %c0_30 = arith.constant 0 : index
    %c0_31 = arith.constant 0 : index
    %55 = vector.load %arg11[%c0_29, %c0_30, %c0_31] : memref<2x8x128xf32, #tpu.memory_space<vmem>>, vector<1x8x128xf32>
    %56 = vector.shape_cast %55 : vector<1x8x128xf32> to vector<8x128xf32>
    %57 = arith.index_cast %c1_i32 : i32 to index
    %c0_32 = arith.constant 0 : index
    %c0_33 = arith.constant 0 : index
    %58 = vector.load %arg1[%57, %c0_32, %c0_33] : memref<8x8x512xf32, #tpu.memory_space<vmem>>, vector<1x8x512xf32>
    %59 = vector.shape_cast %58 : vector<1x8x512xf32> to vector<8x512xf32>
    %60 = vector.broadcast %4 : vector<1x512xf32> to vector<8x512xf32>
    %61 = arith.addf %59, %60 : vector<8x512xf32>
    %cst_34 = arith.constant dense<0.000000e+00> : vector<8x512xf32>
    %62 = tpu.matmul %54, %6, %cst_34 {dimension_numbers = #tpu.dot_dimension_numbers<[1], [0], [0], [1], [0, 0, 1, 1], [], []>} : vector<8x128xf32>, vector<128x512xf32>, vector<8x512xf32> -> vector<8x512xf32>
    %63 = arith.addf %61, %62 : vector<8x512xf32>
    %64 = vector.extract_strided_slice %63 {offsets = [0, 0], sizes = [8, 128], strides = [1, 1]} : vector<8x512xf32> to vector<8x128xf32>
    %65 = arith.negf %64 : vector<8x128xf32>
    %66 = math.exp %65 : vector<8x128xf32>
    %cst_35 = arith.constant 1.000000e+00 : f32
    %67 = vector.broadcast %cst_35 : f32 to vector<8x128xf32>
    %68 = arith.addf %67, %66 : vector<8x128xf32>
    %69 = arith.divf %67, %68 : vector<8x128xf32>
    %70 = vector.extract_strided_slice %63 {offsets = [0, 128], sizes = [8, 128], strides = [1, 1]} : vector<8x512xf32> to vector<8x128xf32>
    %71 = arith.negf %70 : vector<8x128xf32>
    %72 = math.exp %71 : vector<8x128xf32>
    %cst_36 = arith.constant 1.000000e+00 : f32
    %73 = vector.broadcast %cst_36 : f32 to vector<8x128xf32>
    %74 = arith.addf %73, %72 : vector<8x128xf32>
    %75 = arith.divf %73, %74 : vector<8x128xf32>
    %76 = vector.extract_strided_slice %63 {offsets = [0, 256], sizes = [8, 128], strides = [1, 1]} : vector<8x512xf32> to vector<8x128xf32>
    %77 = math.tanh %76 : vector<8x128xf32>
    %78 = vector.extract_strided_slice %63 {offsets = [0, 384], sizes = [8, 128], strides = [1, 1]} : vector<8x512xf32> to vector<8x128xf32>
    %79 = arith.negf %78 : vector<8x128xf32>
    %80 = math.exp %79 : vector<8x128xf32>
    %cst_37 = arith.constant 1.000000e+00 : f32
    %81 = vector.broadcast %cst_37 : f32 to vector<8x128xf32>
    %82 = arith.addf %81, %80 : vector<8x128xf32>
    %83 = arith.divf %81, %82 : vector<8x128xf32>
    %84 = arith.mulf %75, %56 : vector<8x128xf32>
    %85 = arith.mulf %69, %77 : vector<8x128xf32>
    %86 = arith.addf %84, %85 : vector<8x128xf32>
    %87 = math.tanh %86 : vector<8x128xf32>
    %88 = arith.mulf %83, %87 : vector<8x128xf32>
    %c0_38 = arith.constant 0 : index
    %c0_39 = arith.constant 0 : index
    %c0_40 = arith.constant 0 : index
    %89 = vector.load %arg10[%c0_38, %c0_39, %c0_40] : memref<2x8x128xf32, #tpu.memory_space<vmem>>, vector<1x8x128xf32>
    %90 = vector.shape_cast %89 : vector<1x8x128xf32> to vector<8x128xf32>
    %91 = vector.shape_cast %88 : vector<8x128xf32> to vector<1x8x128xf32>
    tpu.vector_store %arg10[%c0_38, %c0_39, %c0_40], %91 {strides = array<i32>} : memref<2x8x128xf32, #tpu.memory_space<vmem>>, vector<1x8x128xf32>,
    %c0_41 = arith.constant 0 : index
    %c0_42 = arith.constant 0 : index
    %c0_43 = arith.constant 0 : index
    %92 = vector.load %arg11[%c0_41, %c0_42, %c0_43] : memref<2x8x128xf32, #tpu.memory_space<vmem>>, vector<1x8x128xf32>
    %93 = vector.shape_cast %92 : vector<1x8x128xf32> to vector<8x128xf32>
    %94 = vector.shape_cast %86 : vector<8x128xf32> to vector<1x8x128xf32>
    tpu.vector_store %arg11[%c0_41, %c0_42, %c0_43], %94 {strides = array<i32>} : memref<2x8x128xf32, #tpu.memory_space<vmem>>, vector<1x8x128xf32>,
    %95 = arith.index_cast %c1_i32 : i32 to index
    %c0_44 = arith.constant 0 : index
    %c0_45 = arith.constant 0 : index
    %96 = vector.load %arg12[%95, %c0_44, %c0_45] : memref<8x8x128xf32, #tpu.memory_space<vmem>>, vector<1x8x128xf32>
    %97 = vector.shape_cast %96 : vector<1x8x128xf32> to vector<8x128xf32>
    %98 = vector.shape_cast %88 : vector<8x128xf32> to vector<1x8x128xf32>
    tpu.vector_store %arg12[%95, %c0_44, %c0_45], %98 {strides = array<i32>} : memref<8x8x128xf32, #tpu.memory_space<vmem>>, vector<1x8x128xf32>,
    %c2_i32 = arith.constant 2 : i32
    %c0_46 = arith.constant 0 : index
    %c0_47 = arith.constant 0 : index
    %c0_48 = arith.constant 0 : index
    %99 = vector.load %arg10[%c0_46, %c0_47, %c0_48] : memref<2x8x128xf32, #tpu.memory_space<vmem>>, vector<1x8x128xf32>
    %100 = vector.shape_cast %99 : vector<1x8x128xf32> to vector<8x128xf32>
    %c0_49 = arith.constant 0 : index
    %c0_50 = arith.constant 0 : index
    %c0_51 = arith.constant 0 : index
    %101 = vector.load %arg11[%c0_49, %c0_50, %c0_51] : memref<2x8x128xf32, #tpu.memory_space<vmem>>, vector<1x8x128xf32>
    %102 = vector.shape_cast %101 : vector<1x8x128xf32> to vector<8x128xf32>
    %103 = arith.index_cast %c2_i32 : i32 to index
    %c0_52 = arith.constant 0 : index
    %c0_53 = arith.constant 0 : index
    %104 = vector.load %arg1[%103, %c0_52, %c0_53] : memref<8x8x512xf32, #tpu.memory_space<vmem>>, vector<1x8x512xf32>
    %105 = vector.shape_cast %104 : vector<1x8x512xf32> to vector<8x512xf32>
    %106 = vector.broadcast %4 : vector<1x512xf32> to vector<8x512xf32>
    %107 = arith.addf %105, %106 : vector<8x512xf32>
    %cst_54 = arith.constant dense<0.000000e+00> : vector<8x512xf32>
    %108 = tpu.matmul %100, %6, %cst_54 {dimension_numbers = #tpu.dot_dimension_numbers<[1], [0], [0], [1], [0, 0, 1, 1], [], []>} : vector<8x128xf32>, vector<128x512xf32>, vector<8x512xf32> -> vector<8x512xf32>
    %109 = arith.addf %107, %108 : vector<8x512xf32>
    %110 = vector.extract_strided_slice %109 {offsets = [0, 0], sizes = [8, 128], strides = [1, 1]} : vector<8x512xf32> to vector<8x128xf32>
    %111 = arith.negf %110 : vector<8x128xf32>
    %112 = math.exp %111 : vector<8x128xf32>
    %cst_55 = arith.constant 1.000000e+00 : f32
    %113 = vector.broadcast %cst_55 : f32 to vector<8x128xf32>
    %114 = arith.addf %113, %112 : vector<8x128xf32>
    %115 = arith.divf %113, %114 : vector<8x128xf32>
    %116 = vector.extract_strided_slice %109 {offsets = [0, 128], sizes = [8, 128], strides = [1, 1]} : vector<8x512xf32> to vector<8x128xf32>
    %117 = arith.negf %116 : vector<8x128xf32>
    %118 = math.exp %117 : vector<8x128xf32>
    %cst_56 = arith.constant 1.000000e+00 : f32
    %119 = vector.broadcast %cst_56 : f32 to vector<8x128xf32>
    %120 = arith.addf %119, %118 : vector<8x128xf32>
    %121 = arith.divf %119, %120 : vector<8x128xf32>
    %122 = vector.extract_strided_slice %109 {offsets = [0, 256], sizes = [8, 128], strides = [1, 1]} : vector<8x512xf32> to vector<8x128xf32>
    %123 = math.tanh %122 : vector<8x128xf32>
    %124 = vector.extract_strided_slice %109 {offsets = [0, 384], sizes = [8, 128], strides = [1, 1]} : vector<8x512xf32> to vector<8x128xf32>
    %125 = arith.negf %124 : vector<8x128xf32>
    %126 = math.exp %125 : vector<8x128xf32>
    %cst_57 = arith.constant 1.000000e+00 : f32
    %127 = vector.broadcast %cst_57 : f32 to vector<8x128xf32>
    %128 = arith.addf %127, %126 : vector<8x128xf32>
    %129 = arith.divf %127, %128 : vector<8x128xf32>
    %130 = arith.mulf %121, %102 : vector<8x128xf32>
    %131 = arith.mulf %115, %123 : vector<8x128xf32>
    %132 = arith.addf %130, %131 : vector<8x128xf32>
    %133 = math.tanh %132 : vector<8x128xf32>
    %134 = arith.mulf %129, %133 : vector<8x128xf32>
    %c0_58 = arith.constant 0 : index
    %c0_59 = arith.constant 0 : index
    %c0_60 = arith.constant 0 : index
    %135 = vector.load %arg10[%c0_58, %c0_59, %c0_60] : memref<2x8x128xf32, #tpu.memory_space<vmem>>, vector<1x8x128xf32>
    %136 = vector.shape_cast %135 : vector<1x8x128xf32> to vector<8x128xf32>
    %137 = vector.shape_cast %134 : vector<8x128xf32> to vector<1x8x128xf32>
    tpu.vector_store %arg10[%c0_58, %c0_59, %c0_60], %137 {strides = array<i32>} : memref<2x8x128xf32, #tpu.memory_space<vmem>>, vector<1x8x128xf32>,
    %c0_61 = arith.constant 0 : index
    %c0_62 = arith.constant 0 : index
    %c0_63 = arith.constant 0 : index
    %138 = vector.load %arg11[%c0_61, %c0_62, %c0_63] : memref<2x8x128xf32, #tpu.memory_space<vmem>>, vector<1x8x128xf32>
    %139 = vector.shape_cast %138 : vector<1x8x128xf32> to vector<8x128xf32>
    %140 = vector.shape_cast %132 : vector<8x128xf32> to vector<1x8x128xf32>
    tpu.vector_store %arg11[%c0_61, %c0_62, %c0_63], %140 {strides = array<i32>} : memref<2x8x128xf32, #tpu.memory_space<vmem>>, vector<1x8x128xf32>,
    %141 = arith.index_cast %c2_i32 : i32 to index
    %c0_64 = arith.constant 0 : index
    %c0_65 = arith.constant 0 : index
    %142 = vector.load %arg12[%141, %c0_64, %c0_65] : memref<8x8x128xf32, #tpu.memory_space<vmem>>, vector<1x8x128xf32>
    %143 = vector.shape_cast %142 : vector<1x8x128xf32> to vector<8x128xf32>
    %144 = vector.shape_cast %134 : vector<8x128xf32> to vector<1x8x128xf32>
    tpu.vector_store %arg12[%141, %c0_64, %c0_65], %144 {strides = array<i32>} : memref<8x8x128xf32, #tpu.memory_space<vmem>>, vector<1x8x128xf32>,
    %c3_i32 = arith.constant 3 : i32
    %c0_66 = arith.constant 0 : index
    %c0_67 = arith.constant 0 : index
    %c0_68 = arith.constant 0 : index
    %145 = vector.load %arg10[%c0_66, %c0_67, %c0_68] : memref<2x8x128xf32, #tpu.memory_space<vmem>>, vector<1x8x128xf32>
    %146 = vector.shape_cast %145 : vector<1x8x128xf32> to vector<8x128xf32>
    %c0_69 = arith.constant 0 : index
    %c0_70 = arith.constant 0 : index
    %c0_71 = arith.constant 0 : index
    %147 = vector.load %arg11[%c0_69, %c0_70, %c0_71] : memref<2x8x128xf32, #tpu.memory_space<vmem>>, vector<1x8x128xf32>
    %148 = vector.shape_cast %147 : vector<1x8x128xf32> to vector<8x128xf32>
    %149 = arith.index_cast %c3_i32 : i32 to index
    %c0_72 = arith.constant 0 : index
    %c0_73 = arith.constant 0 : index
    %150 = vector.load %arg1[%149, %c0_72, %c0_73] : memref<8x8x512xf32, #tpu.memory_space<vmem>>, vector<1x8x512xf32>
    %151 = vector.shape_cast %150 : vector<1x8x512xf32> to vector<8x512xf32>
    %152 = vector.broadcast %4 : vector<1x512xf32> to vector<8x512xf32>
    %153 = arith.addf %151, %152 : vector<8x512xf32>
    %cst_74 = arith.constant dense<0.000000e+00> : vector<8x512xf32>
    %154 = tpu.matmul %146, %6, %cst_74 {dimension_numbers = #tpu.dot_dimension_numbers<[1], [0], [0], [1], [0, 0, 1, 1], [], []>} : vector<8x128xf32>, vector<128x512xf32>, vector<8x512xf32> -> vector<8x512xf32>
    %155 = arith.addf %153, %154 : vector<8x512xf32>
    %156 = vector.extract_strided_slice %155 {offsets = [0, 0], sizes = [8, 128], strides = [1, 1]} : vector<8x512xf32> to vector<8x128xf32>
    %157 = arith.negf %156 : vector<8x128xf32>
    %158 = math.exp %157 : vector<8x128xf32>
    %cst_75 = arith.constant 1.000000e+00 : f32
    %159 = vector.broadcast %cst_75 : f32 to vector<8x128xf32>
    %160 = arith.addf %159, %158 : vector<8x128xf32>
    %161 = arith.divf %159, %160 : vector<8x128xf32>
    %162 = vector.extract_strided_slice %155 {offsets = [0, 128], sizes = [8, 128], strides = [1, 1]} : vector<8x512xf32> to vector<8x128xf32>
    %163 = arith.negf %162 : vector<8x128xf32>
    %164 = math.exp %163 : vector<8x128xf32>
    %cst_76 = arith.constant 1.000000e+00 : f32
    %165 = vector.broadcast %cst_76 : f32 to vector<8x128xf32>
    %166 = arith.addf %165, %164 : vector<8x128xf32>
    %167 = arith.divf %165, %166 : vector<8x128xf32>
    %168 = vector.extract_strided_slice %155 {offsets = [0, 256], sizes = [8, 128], strides = [1, 1]} : vector<8x512xf32> to vector<8x128xf32>
    %169 = math.tanh %168 : vector<8x128xf32>
    %170 = vector.extract_strided_slice %155 {offsets = [0, 384], sizes = [8, 128], strides = [1, 1]} : vector<8x512xf32> to vector<8x128xf32>
    %171 = arith.negf %170 : vector<8x128xf32>
    %172 = math.exp %171 : vector<8x128xf32>
    %cst_77 = arith.constant 1.000000e+00 : f32
    %173 = vector.broadcast %cst_77 : f32 to vector<8x128xf32>
    %174 = arith.addf %173, %172 : vector<8x128xf32>
    %175 = arith.divf %173, %174 : vector<8x128xf32>
    %176 = arith.mulf %167, %148 : vector<8x128xf32>
    %177 = arith.mulf %161, %169 : vector<8x128xf32>
    %178 = arith.addf %176, %177 : vector<8x128xf32>
    %179 = math.tanh %178 : vector<8x128xf32>
    %180 = arith.mulf %175, %179 : vector<8x128xf32>
    %c0_78 = arith.constant 0 : index
    %c0_79 = arith.constant 0 : index
    %c0_80 = arith.constant 0 : index
    %181 = vector.load %arg10[%c0_78, %c0_79, %c0_80] : memref<2x8x128xf32, #tpu.memory_space<vmem>>, vector<1x8x128xf32>
    %182 = vector.shape_cast %181 : vector<1x8x128xf32> to vector<8x128xf32>
    %183 = vector.shape_cast %180 : vector<8x128xf32> to vector<1x8x128xf32>
    tpu.vector_store %arg10[%c0_78, %c0_79, %c0_80], %183 {strides = array<i32>} : memref<2x8x128xf32, #tpu.memory_space<vmem>>, vector<1x8x128xf32>,
    %c0_81 = arith.constant 0 : index
    %c0_82 = arith.constant 0 : index
    %c0_83 = arith.constant 0 : index
    %184 = vector.load %arg11[%c0_81, %c0_82, %c0_83] : memref<2x8x128xf32, #tpu.memory_space<vmem>>, vector<1x8x128xf32>
    %185 = vector.shape_cast %184 : vector<1x8x128xf32> to vector<8x128xf32>
    %186 = vector.shape_cast %178 : vector<8x128xf32> to vector<1x8x128xf32>
    tpu.vector_store %arg11[%c0_81, %c0_82, %c0_83], %186 {strides = array<i32>} : memref<2x8x128xf32, #tpu.memory_space<vmem>>, vector<1x8x128xf32>,
    %187 = arith.index_cast %c3_i32 : i32 to index
    %c0_84 = arith.constant 0 : index
    %c0_85 = arith.constant 0 : index
    %188 = vector.load %arg12[%187, %c0_84, %c0_85] : memref<8x8x128xf32, #tpu.memory_space<vmem>>, vector<1x8x128xf32>
    %189 = vector.shape_cast %188 : vector<1x8x128xf32> to vector<8x128xf32>
    %190 = vector.shape_cast %180 : vector<8x128xf32> to vector<1x8x128xf32>
    tpu.vector_store %arg12[%187, %c0_84, %c0_85], %190 {strides = array<i32>} : memref<8x8x128xf32, #tpu.memory_space<vmem>>, vector<1x8x128xf32>,
    %c4_i32 = arith.constant 4 : i32
    %c0_86 = arith.constant 0 : index
    %c0_87 = arith.constant 0 : index
    %c0_88 = arith.constant 0 : index
    %191 = vector.load %arg10[%c0_86, %c0_87, %c0_88] : memref<2x8x128xf32, #tpu.memory_space<vmem>>, vector<1x8x128xf32>
    %192 = vector.shape_cast %191 : vector<1x8x128xf32> to vector<8x128xf32>
    %c0_89 = arith.constant 0 : index
    %c0_90 = arith.constant 0 : index
    %c0_91 = arith.constant 0 : index
    %193 = vector.load %arg11[%c0_89, %c0_90, %c0_91] : memref<2x8x128xf32, #tpu.memory_space<vmem>>, vector<1x8x128xf32>
    %194 = vector.shape_cast %193 : vector<1x8x128xf32> to vector<8x128xf32>
    %195 = arith.index_cast %c4_i32 : i32 to index
    %c0_92 = arith.constant 0 : index
    %c0_93 = arith.constant 0 : index
    %196 = vector.load %arg1[%195, %c0_92, %c0_93] : memref<8x8x512xf32, #tpu.memory_space<vmem>>, vector<1x8x512xf32>
    %197 = vector.shape_cast %196 : vector<1x8x512xf32> to vector<8x512xf32>
    %198 = vector.broadcast %4 : vector<1x512xf32> to vector<8x512xf32>
    %199 = arith.addf %197, %198 : vector<8x512xf32>
    %cst_94 = arith.constant dense<0.000000e+00> : vector<8x512xf32>
    %200 = tpu.matmul %192, %6, %cst_94 {dimension_numbers = #tpu.dot_dimension_numbers<[1], [0], [0], [1], [0, 0, 1, 1], [], []>} : vector<8x128xf32>, vector<128x512xf32>, vector<8x512xf32> -> vector<8x512xf32>
    %201 = arith.addf %199, %200 : vector<8x512xf32>
    %202 = vector.extract_strided_slice %201 {offsets = [0, 0], sizes = [8, 128], strides = [1, 1]} : vector<8x512xf32> to vector<8x128xf32>
    %203 = arith.negf %202 : vector<8x128xf32>
    %204 = math.exp %203 : vector<8x128xf32>
    %cst_95 = arith.constant 1.000000e+00 : f32
    %205 = vector.broadcast %cst_95 : f32 to vector<8x128xf32>
    %206 = arith.addf %205, %204 : vector<8x128xf32>
    %207 = arith.divf %205, %206 : vector<8x128xf32>
    %208 = vector.extract_strided_slice %201 {offsets = [0, 128], sizes = [8, 128], strides = [1, 1]} : vector<8x512xf32> to vector<8x128xf32>
    %209 = arith.negf %208 : vector<8x128xf32>
    %210 = math.exp %209 : vector<8x128xf32>
    %cst_96 = arith.constant 1.000000e+00 : f32
    %211 = vector.broadcast %cst_96 : f32 to vector<8x128xf32>
    %212 = arith.addf %211, %210 : vector<8x128xf32>
    %213 = arith.divf %211, %212 : vector<8x128xf32>
    %214 = vector.extract_strided_slice %201 {offsets = [0, 256], sizes = [8, 128], strides = [1, 1]} : vector<8x512xf32> to vector<8x128xf32>
    %215 = math.tanh %214 : vector<8x128xf32>
    %216 = vector.extract_strided_slice %201 {offsets = [0, 384], sizes = [8, 128], strides = [1, 1]} : vector<8x512xf32> to vector<8x128xf32>
    %217 = arith.negf %216 : vector<8x128xf32>
    %218 = math.exp %217 : vector<8x128xf32>
    %cst_97 = arith.constant 1.000000e+00 : f32
    %219 = vector.broadcast %cst_97 : f32 to vector<8x128xf32>
    %220 = arith.addf %219, %218 : vector<8x128xf32>
    %221 = arith.divf %219, %220 : vector<8x128xf32>
    %222 = arith.mulf %213, %194 : vector<8x128xf32>
    %223 = arith.mulf %207, %215 : vector<8x128xf32>
    %224 = arith.addf %222, %223 : vector<8x128xf32>
    %225 = math.tanh %224 : vector<8x128xf32>
    %226 = arith.mulf %221, %225 : vector<8x128xf32>
    %c0_98 = arith.constant 0 : index
    %c0_99 = arith.constant 0 : index
    %c0_100 = arith.constant 0 : index
    %227 = vector.load %arg10[%c0_98, %c0_99, %c0_100] : memref<2x8x128xf32, #tpu.memory_space<vmem>>, vector<1x8x128xf32>
    %228 = vector.shape_cast %227 : vector<1x8x128xf32> to vector<8x128xf32>
    %229 = vector.shape_cast %226 : vector<8x128xf32> to vector<1x8x128xf32>
    tpu.vector_store %arg10[%c0_98, %c0_99, %c0_100], %229 {strides = array<i32>} : memref<2x8x128xf32, #tpu.memory_space<vmem>>, vector<1x8x128xf32>,
    %c0_101 = arith.constant 0 : index
    %c0_102 = arith.constant 0 : index
    %c0_103 = arith.constant 0 : index
    %230 = vector.load %arg11[%c0_101, %c0_102, %c0_103] : memref<2x8x128xf32, #tpu.memory_space<vmem>>, vector<1x8x128xf32>
    %231 = vector.shape_cast %230 : vector<1x8x128xf32> to vector<8x128xf32>
    %232 = vector.shape_cast %224 : vector<8x128xf32> to vector<1x8x128xf32>
    tpu.vector_store %arg11[%c0_101, %c0_102, %c0_103], %232 {strides = array<i32>} : memref<2x8x128xf32, #tpu.memory_space<vmem>>, vector<1x8x128xf32>,
    %233 = arith.index_cast %c4_i32 : i32 to index
    %c0_104 = arith.constant 0 : index
    %c0_105 = arith.constant 0 : index
    %234 = vector.load %arg12[%233, %c0_104, %c0_105] : memref<8x8x128xf32, #tpu.memory_space<vmem>>, vector<1x8x128xf32>
    %235 = vector.shape_cast %234 : vector<1x8x128xf32> to vector<8x128xf32>
    %236 = vector.shape_cast %226 : vector<8x128xf32> to vector<1x8x128xf32>
    tpu.vector_store %arg12[%233, %c0_104, %c0_105], %236 {strides = array<i32>} : memref<8x8x128xf32, #tpu.memory_space<vmem>>, vector<1x8x128xf32>,
    %c5_i32 = arith.constant 5 : i32
    %c0_106 = arith.constant 0 : index
    %c0_107 = arith.constant 0 : index
    %c0_108 = arith.constant 0 : index
    %237 = vector.load %arg10[%c0_106, %c0_107, %c0_108] : memref<2x8x128xf32, #tpu.memory_space<vmem>>, vector<1x8x128xf32>
    %238 = vector.shape_cast %237 : vector<1x8x128xf32> to vector<8x128xf32>
    %c0_109 = arith.constant 0 : index
    %c0_110 = arith.constant 0 : index
    %c0_111 = arith.constant 0 : index
    %239 = vector.load %arg11[%c0_109, %c0_110, %c0_111] : memref<2x8x128xf32, #tpu.memory_space<vmem>>, vector<1x8x128xf32>
    %240 = vector.shape_cast %239 : vector<1x8x128xf32> to vector<8x128xf32>
    %241 = arith.index_cast %c5_i32 : i32 to index
    %c0_112 = arith.constant 0 : index
    %c0_113 = arith.constant 0 : index
    %242 = vector.load %arg1[%241, %c0_112, %c0_113] : memref<8x8x512xf32, #tpu.memory_space<vmem>>, vector<1x8x512xf32>
    %243 = vector.shape_cast %242 : vector<1x8x512xf32> to vector<8x512xf32>
    %244 = vector.broadcast %4 : vector<1x512xf32> to vector<8x512xf32>
    %245 = arith.addf %243, %244 : vector<8x512xf32>
    %cst_114 = arith.constant dense<0.000000e+00> : vector<8x512xf32>
    %246 = tpu.matmul %238, %6, %cst_114 {dimension_numbers = #tpu.dot_dimension_numbers<[1], [0], [0], [1], [0, 0, 1, 1], [], []>} : vector<8x128xf32>, vector<128x512xf32>, vector<8x512xf32> -> vector<8x512xf32>
    %247 = arith.addf %245, %246 : vector<8x512xf32>
    %248 = vector.extract_strided_slice %247 {offsets = [0, 0], sizes = [8, 128], strides = [1, 1]} : vector<8x512xf32> to vector<8x128xf32>
    %249 = arith.negf %248 : vector<8x128xf32>
    %250 = math.exp %249 : vector<8x128xf32>
    %cst_115 = arith.constant 1.000000e+00 : f32
    %251 = vector.broadcast %cst_115 : f32 to vector<8x128xf32>
    %252 = arith.addf %251, %250 : vector<8x128xf32>
    %253 = arith.divf %251, %252 : vector<8x128xf32>
    %254 = vector.extract_strided_slice %247 {offsets = [0, 128], sizes = [8, 128], strides = [1, 1]} : vector<8x512xf32> to vector<8x128xf32>
    %255 = arith.negf %254 : vector<8x128xf32>
    %256 = math.exp %255 : vector<8x128xf32>
    %cst_116 = arith.constant 1.000000e+00 : f32
    %257 = vector.broadcast %cst_116 : f32 to vector<8x128xf32>
    %258 = arith.addf %257, %256 : vector<8x128xf32>
    %259 = arith.divf %257, %258 : vector<8x128xf32>
    %260 = vector.extract_strided_slice %247 {offsets = [0, 256], sizes = [8, 128], strides = [1, 1]} : vector<8x512xf32> to vector<8x128xf32>
    %261 = math.tanh %260 : vector<8x128xf32>
    %262 = vector.extract_strided_slice %247 {offsets = [0, 384], sizes = [8, 128], strides = [1, 1]} : vector<8x512xf32> to vector<8x128xf32>
    %263 = arith.negf %262 : vector<8x128xf32>
    %264 = math.exp %263 : vector<8x128xf32>
    %cst_117 = arith.constant 1.000000e+00 : f32
    %265 = vector.broadcast %cst_117 : f32 to vector<8x128xf32>
    %266 = arith.addf %265, %264 : vector<8x128xf32>
    %267 = arith.divf %265, %266 : vector<8x128xf32>
    %268 = arith.mulf %259, %240 : vector<8x128xf32>
    %269 = arith.mulf %253, %261 : vector<8x128xf32>
    %270 = arith.addf %268, %269 : vector<8x128xf32>
    %271 = math.tanh %270 : vector<8x128xf32>
    %272 = arith.mulf %267, %271 : vector<8x128xf32>
    %c0_118 = arith.constant 0 : index
    %c0_119 = arith.constant 0 : index
    %c0_120 = arith.constant 0 : index
    %273 = vector.load %arg10[%c0_118, %c0_119, %c0_120] : memref<2x8x128xf32, #tpu.memory_space<vmem>>, vector<1x8x128xf32>
    %274 = vector.shape_cast %273 : vector<1x8x128xf32> to vector<8x128xf32>
    %275 = vector.shape_cast %272 : vector<8x128xf32> to vector<1x8x128xf32>
    tpu.vector_store %arg10[%c0_118, %c0_119, %c0_120], %275 {strides = array<i32>} : memref<2x8x128xf32, #tpu.memory_space<vmem>>, vector<1x8x128xf32>,
    %c0_121 = arith.constant 0 : index
    %c0_122 = arith.constant 0 : index
    %c0_123 = arith.constant 0 : index
    %276 = vector.load %arg11[%c0_121, %c0_122, %c0_123] : memref<2x8x128xf32, #tpu.memory_space<vmem>>, vector<1x8x128xf32>
    %277 = vector.shape_cast %276 : vector<1x8x128xf32> to vector<8x128xf32>
    %278 = vector.shape_cast %270 : vector<8x128xf32> to vector<1x8x128xf32>
    tpu.vector_store %arg11[%c0_121, %c0_122, %c0_123], %278 {strides = array<i32>} : memref<2x8x128xf32, #tpu.memory_space<vmem>>, vector<1x8x128xf32>,
    %279 = arith.index_cast %c5_i32 : i32 to index
    %c0_124 = arith.constant 0 : index
    %c0_125 = arith.constant 0 : index
    %280 = vector.load %arg12[%279, %c0_124, %c0_125] : memref<8x8x128xf32, #tpu.memory_space<vmem>>, vector<1x8x128xf32>
    %281 = vector.shape_cast %280 : vector<1x8x128xf32> to vector<8x128xf32>
    %282 = vector.shape_cast %272 : vector<8x128xf32> to vector<1x8x128xf32>
    tpu.vector_store %arg12[%279, %c0_124, %c0_125], %282 {strides = array<i32>} : memref<8x8x128xf32, #tpu.memory_space<vmem>>, vector<1x8x128xf32>,
    %c6_i32 = arith.constant 6 : i32
    %c0_126 = arith.constant 0 : index
    %c0_127 = arith.constant 0 : index
    %c0_128 = arith.constant 0 : index
    %283 = vector.load %arg10[%c0_126, %c0_127, %c0_128] : memref<2x8x128xf32, #tpu.memory_space<vmem>>, vector<1x8x128xf32>
    %284 = vector.shape_cast %283 : vector<1x8x128xf32> to vector<8x128xf32>
    %c0_129 = arith.constant 0 : index
    %c0_130 = arith.constant 0 : index
    %c0_131 = arith.constant 0 : index
    %285 = vector.load %arg11[%c0_129, %c0_130, %c0_131] : memref<2x8x128xf32, #tpu.memory_space<vmem>>, vector<1x8x128xf32>
    %286 = vector.shape_cast %285 : vector<1x8x128xf32> to vector<8x128xf32>
    %287 = arith.index_cast %c6_i32 : i32 to index
    %c0_132 = arith.constant 0 : index
    %c0_133 = arith.constant 0 : index
    %288 = vector.load %arg1[%287, %c0_132, %c0_133] : memref<8x8x512xf32, #tpu.memory_space<vmem>>, vector<1x8x512xf32>
    %289 = vector.shape_cast %288 : vector<1x8x512xf32> to vector<8x512xf32>
    %290 = vector.broadcast %4 : vector<1x512xf32> to vector<8x512xf32>
    %291 = arith.addf %289, %290 : vector<8x512xf32>
    %cst_134 = arith.constant dense<0.000000e+00> : vector<8x512xf32>
    %292 = tpu.matmul %284, %6, %cst_134 {dimension_numbers = #tpu.dot_dimension_numbers<[1], [0], [0], [1], [0, 0, 1, 1], [], []>} : vector<8x128xf32>, vector<128x512xf32>, vector<8x512xf32> -> vector<8x512xf32>
    %293 = arith.addf %291, %292 : vector<8x512xf32>
    %294 = vector.extract_strided_slice %293 {offsets = [0, 0], sizes = [8, 128], strides = [1, 1]} : vector<8x512xf32> to vector<8x128xf32>
    %295 = arith.negf %294 : vector<8x128xf32>
    %296 = math.exp %295 : vector<8x128xf32>
    %cst_135 = arith.constant 1.000000e+00 : f32
    %297 = vector.broadcast %cst_135 : f32 to vector<8x128xf32>
    %298 = arith.addf %297, %296 : vector<8x128xf32>
    %299 = arith.divf %297, %298 : vector<8x128xf32>
    %300 = vector.extract_strided_slice %293 {offsets = [0, 128], sizes = [8, 128], strides = [1, 1]} : vector<8x512xf32> to vector<8x128xf32>
    %301 = arith.negf %300 : vector<8x128xf32>
    %302 = math.exp %301 : vector<8x128xf32>
    %cst_136 = arith.constant 1.000000e+00 : f32
    %303 = vector.broadcast %cst_136 : f32 to vector<8x128xf32>
    %304 = arith.addf %303, %302 : vector<8x128xf32>
    %305 = arith.divf %303, %304 : vector<8x128xf32>
    %306 = vector.extract_strided_slice %293 {offsets = [0, 256], sizes = [8, 128], strides = [1, 1]} : vector<8x512xf32> to vector<8x128xf32>
    %307 = math.tanh %306 : vector<8x128xf32>
    %308 = vector.extract_strided_slice %293 {offsets = [0, 384], sizes = [8, 128], strides = [1, 1]} : vector<8x512xf32> to vector<8x128xf32>
    %309 = arith.negf %308 : vector<8x128xf32>
    %310 = math.exp %309 : vector<8x128xf32>
    %cst_137 = arith.constant 1.000000e+00 : f32
    %311 = vector.broadcast %cst_137 : f32 to vector<8x128xf32>
    %312 = arith.addf %311, %310 : vector<8x128xf32>
    %313 = arith.divf %311, %312 : vector<8x128xf32>
    %314 = arith.mulf %305, %286 : vector<8x128xf32>
    %315 = arith.mulf %299, %307 : vector<8x128xf32>
    %316 = arith.addf %314, %315 : vector<8x128xf32>
    %317 = math.tanh %316 : vector<8x128xf32>
    %318 = arith.mulf %313, %317 : vector<8x128xf32>
    %c0_138 = arith.constant 0 : index
    %c0_139 = arith.constant 0 : index
    %c0_140 = arith.constant 0 : index
    %319 = vector.load %arg10[%c0_138, %c0_139, %c0_140] : memref<2x8x128xf32, #tpu.memory_space<vmem>>, vector<1x8x128xf32>
    %320 = vector.shape_cast %319 : vector<1x8x128xf32> to vector<8x128xf32>
    %321 = vector.shape_cast %318 : vector<8x128xf32> to vector<1x8x128xf32>
    tpu.vector_store %arg10[%c0_138, %c0_139, %c0_140], %321 {strides = array<i32>} : memref<2x8x128xf32, #tpu.memory_space<vmem>>, vector<1x8x128xf32>,
    %c0_141 = arith.constant 0 : index
    %c0_142 = arith.constant 0 : index
    %c0_143 = arith.constant 0 : index
    %322 = vector.load %arg11[%c0_141, %c0_142, %c0_143] : memref<2x8x128xf32, #tpu.memory_space<vmem>>, vector<1x8x128xf32>
    %323 = vector.shape_cast %322 : vector<1x8x128xf32> to vector<8x128xf32>
    %324 = vector.shape_cast %316 : vector<8x128xf32> to vector<1x8x128xf32>
    tpu.vector_store %arg11[%c0_141, %c0_142, %c0_143], %324 {strides = array<i32>} : memref<2x8x128xf32, #tpu.memory_space<vmem>>, vector<1x8x128xf32>,
    %325 = arith.index_cast %c6_i32 : i32 to index
    %c0_144 = arith.constant 0 : index
    %c0_145 = arith.constant 0 : index
    %326 = vector.load %arg12[%325, %c0_144, %c0_145] : memref<8x8x128xf32, #tpu.memory_space<vmem>>, vector<1x8x128xf32>
    %327 = vector.shape_cast %326 : vector<1x8x128xf32> to vector<8x128xf32>
    %328 = vector.shape_cast %318 : vector<8x128xf32> to vector<1x8x128xf32>
    tpu.vector_store %arg12[%325, %c0_144, %c0_145], %328 {strides = array<i32>} : memref<8x8x128xf32, #tpu.memory_space<vmem>>, vector<1x8x128xf32>,
    %c7_i32 = arith.constant 7 : i32
    %c0_146 = arith.constant 0 : index
    %c0_147 = arith.constant 0 : index
    %c0_148 = arith.constant 0 : index
    %329 = vector.load %arg10[%c0_146, %c0_147, %c0_148] : memref<2x8x128xf32, #tpu.memory_space<vmem>>, vector<1x8x128xf32>
    %330 = vector.shape_cast %329 : vector<1x8x128xf32> to vector<8x128xf32>
    %c0_149 = arith.constant 0 : index
    %c0_150 = arith.constant 0 : index
    %c0_151 = arith.constant 0 : index
    %331 = vector.load %arg11[%c0_149, %c0_150, %c0_151] : memref<2x8x128xf32, #tpu.memory_space<vmem>>, vector<1x8x128xf32>
    %332 = vector.shape_cast %331 : vector<1x8x128xf32> to vector<8x128xf32>
    %333 = arith.index_cast %c7_i32 : i32 to index
    %c0_152 = arith.constant 0 : index
    %c0_153 = arith.constant 0 : index
    %334 = vector.load %arg1[%333, %c0_152, %c0_153] : memref<8x8x512xf32, #tpu.memory_space<vmem>>, vector<1x8x512xf32>
    %335 = vector.shape_cast %334 : vector<1x8x512xf32> to vector<8x512xf32>
    %336 = vector.broadcast %4 : vector<1x512xf32> to vector<8x512xf32>
    %337 = arith.addf %335, %336 : vector<8x512xf32>
    %cst_154 = arith.constant dense<0.000000e+00> : vector<8x512xf32>
    %338 = tpu.matmul %330, %6, %cst_154 {dimension_numbers = #tpu.dot_dimension_numbers<[1], [0], [0], [1], [0, 0, 1, 1], [], []>} : vector<8x128xf32>, vector<128x512xf32>, vector<8x512xf32> -> vector<8x512xf32>
    %339 = arith.addf %337, %338 : vector<8x512xf32>
    %340 = vector.extract_strided_slice %339 {offsets = [0, 0], sizes = [8, 128], strides = [1, 1]} : vector<8x512xf32> to vector<8x128xf32>
    %341 = arith.negf %340 : vector<8x128xf32>
    %342 = math.exp %341 : vector<8x128xf32>
    %cst_155 = arith.constant 1.000000e+00 : f32
    %343 = vector.broadcast %cst_155 : f32 to vector<8x128xf32>
    %344 = arith.addf %343, %342 : vector<8x128xf32>
    %345 = arith.divf %343, %344 : vector<8x128xf32>
    %346 = vector.extract_strided_slice %339 {offsets = [0, 128], sizes = [8, 128], strides = [1, 1]} : vector<8x512xf32> to vector<8x128xf32>
    %347 = arith.negf %346 : vector<8x128xf32>
    %348 = math.exp %347 : vector<8x128xf32>
    %cst_156 = arith.constant 1.000000e+00 : f32
    %349 = vector.broadcast %cst_156 : f32 to vector<8x128xf32>
    %350 = arith.addf %349, %348 : vector<8x128xf32>
    %351 = arith.divf %349, %350 : vector<8x128xf32>
    %352 = vector.extract_strided_slice %339 {offsets = [0, 256], sizes = [8, 128], strides = [1, 1]} : vector<8x512xf32> to vector<8x128xf32>
    %353 = math.tanh %352 : vector<8x128xf32>
    %354 = vector.extract_strided_slice %339 {offsets = [0, 384], sizes = [8, 128], strides = [1, 1]} : vector<8x512xf32> to vector<8x128xf32>
    %355 = arith.negf %354 : vector<8x128xf32>
    %356 = math.exp %355 : vector<8x128xf32>
    %cst_157 = arith.constant 1.000000e+00 : f32
    %357 = vector.broadcast %cst_157 : f32 to vector<8x128xf32>
    %358 = arith.addf %357, %356 : vector<8x128xf32>
    %359 = arith.divf %357, %358 : vector<8x128xf32>
    %360 = arith.mulf %351, %332 : vector<8x128xf32>
    %361 = arith.mulf %345, %353 : vector<8x128xf32>
    %362 = arith.addf %360, %361 : vector<8x128xf32>
    %363 = math.tanh %362 : vector<8x128xf32>
    %364 = arith.mulf %359, %363 : vector<8x128xf32>
    %c0_158 = arith.constant 0 : index
    %c0_159 = arith.constant 0 : index
    %c0_160 = arith.constant 0 : index
    %365 = vector.load %arg10[%c0_158, %c0_159, %c0_160] : memref<2x8x128xf32, #tpu.memory_space<vmem>>, vector<1x8x128xf32>
    %366 = vector.shape_cast %365 : vector<1x8x128xf32> to vector<8x128xf32>
    %367 = vector.shape_cast %364 : vector<8x128xf32> to vector<1x8x128xf32>
    tpu.vector_store %arg10[%c0_158, %c0_159, %c0_160], %367 {strides = array<i32>} : memref<2x8x128xf32, #tpu.memory_space<vmem>>, vector<1x8x128xf32>,
    %c0_161 = arith.constant 0 : index
    %c0_162 = arith.constant 0 : index
    %c0_163 = arith.constant 0 : index
    %368 = vector.load %arg11[%c0_161, %c0_162, %c0_163] : memref<2x8x128xf32, #tpu.memory_space<vmem>>, vector<1x8x128xf32>
    %369 = vector.shape_cast %368 : vector<1x8x128xf32> to vector<8x128xf32>
    %370 = vector.shape_cast %362 : vector<8x128xf32> to vector<1x8x128xf32>
    tpu.vector_store %arg11[%c0_161, %c0_162, %c0_163], %370 {strides = array<i32>} : memref<2x8x128xf32, #tpu.memory_space<vmem>>, vector<1x8x128xf32>,
    %371 = arith.index_cast %c7_i32 : i32 to index
    %c0_164 = arith.constant 0 : index
    %c0_165 = arith.constant 0 : index
    %372 = vector.load %arg12[%371, %c0_164, %c0_165] : memref<8x8x128xf32, #tpu.memory_space<vmem>>, vector<1x8x128xf32>
    %373 = vector.shape_cast %372 : vector<1x8x128xf32> to vector<8x128xf32>
    %374 = vector.shape_cast %364 : vector<8x128xf32> to vector<1x8x128xf32>
    tpu.vector_store %arg12[%371, %c0_164, %c0_165], %374 {strides = array<i32>} : memref<8x8x128xf32, #tpu.memory_space<vmem>>, vector<1x8x128xf32>,
    %c8_i32 = arith.constant 8 : i32
    %c0_166 = arith.constant 0 : index
    %c0_167 = arith.constant 0 : index
    %c0_168 = arith.constant 0 : index
    %375 = vector.load %arg12[%c0_166, %c0_167, %c0_168] : memref<8x8x128xf32, #tpu.memory_space<vmem>>, vector<8x8x128xf32>
    %376 = vector.shape_cast %375 : vector<8x8x128xf32> to vector<64x128xf32>
    %c0_169 = arith.constant 0 : index
    %c0_170 = arith.constant 0 : index
    %c0_171 = arith.constant 0 : index
    %377 = vector.load %arg2[%c0_169, %c0_170, %c0_171] : memref<1x128x512xf32, #tpu.memory_space<vmem>>, vector<1x128x512xf32>
    %378 = vector.shape_cast %377 : vector<1x128x512xf32> to vector<128x512xf32>
    %cst_172 = arith.constant dense<0.000000e+00> : vector<64x512xf32>
    %379 = tpu.matmul %376, %378, %cst_172 {dimension_numbers = #tpu.dot_dimension_numbers<[1], [0], [0], [1], [0, 0, 1, 1], [], []>} : vector<64x128xf32>, vector<128x512xf32>, vector<64x512xf32> -> vector<64x512xf32>
    %380 = vector.shape_cast %379 : vector<64x512xf32> to vector<8x8x512xf32>
    %c0_173 = arith.constant 0 : index
    %c0_174 = arith.constant 0 : index
    %c0_175 = arith.constant 0 : index
    %381 = vector.load %arg13[%c0_173, %c0_174, %c0_175] : memref<8x8x512xf32, #tpu.memory_space<vmem>>, vector<8x8x512xf32>
    tpu.vector_store %arg13[%c0_173, %c0_174, %c0_175], %380 {strides = array<i32>} : memref<8x8x512xf32, #tpu.memory_space<vmem>>, vector<8x8x512xf32>,
    %c1 = arith.constant 1 : index
    %c0_176 = arith.constant 0 : index
    %c0_177 = arith.constant 0 : index
    %382 = vector.load %arg4[%c1, %c0_176, %c0_177] : memref<2x1x512xf32, #tpu.memory_space<vmem>>, vector<1x1x512xf32>
    %383 = vector.shape_cast %382 : vector<1x1x512xf32> to vector<1x512xf32>
    %c1_178 = arith.constant 1 : index
    %c0_179 = arith.constant 0 : index
    %c0_180 = arith.constant 0 : index
    %384 = vector.load %arg3[%c1_178, %c0_179, %c0_180] : memref<2x128x512xf32, #tpu.memory_space<vmem>>, vector<1x128x512xf32>
    %385 = vector.shape_cast %384 : vector<1x128x512xf32> to vector<128x512xf32>
    %c0_i32_181 = arith.constant 0 : i32
    %c1_182 = arith.constant 1 : index
    %c0_183 = arith.constant 0 : index
    %c0_184 = arith.constant 0 : index
    %386 = vector.load %arg10[%c1_182, %c0_183, %c0_184] : memref<2x8x128xf32, #tpu.memory_space<vmem>>, vector<1x8x128xf32>
    %387 = vector.shape_cast %386 : vector<1x8x128xf32> to vector<8x128xf32>
    %c1_185 = arith.constant 1 : index
    %c0_186 = arith.constant 0 : index
    %c0_187 = arith.constant 0 : index
    %388 = vector.load %arg11[%c1_185, %c0_186, %c0_187] : memref<2x8x128xf32, #tpu.memory_space<vmem>>, vector<1x8x128xf32>
    %389 = vector.shape_cast %388 : vector<1x8x128xf32> to vector<8x128xf32>
    %390 = arith.index_cast %c0_i32_181 : i32 to index
    %c0_188 = arith.constant 0 : index
    %c0_189 = arith.constant 0 : index
    %391 = vector.load %arg13[%390, %c0_188, %c0_189] : memref<8x8x512xf32, #tpu.memory_space<vmem>>, vector<1x8x512xf32>
    %392 = vector.shape_cast %391 : vector<1x8x512xf32> to vector<8x512xf32>
    %393 = vector.broadcast %383 : vector<1x512xf32> to vector<8x512xf32>
    %394 = arith.addf %392, %393 : vector<8x512xf32>
    %cst_190 = arith.constant dense<0.000000e+00> : vector<8x512xf32>
    %395 = tpu.matmul %387, %385, %cst_190 {dimension_numbers = #tpu.dot_dimension_numbers<[1], [0], [0], [1], [0, 0, 1, 1], [], []>} : vector<8x128xf32>, vector<128x512xf32>, vector<8x512xf32> -> vector<8x512xf32>
    %396 = arith.addf %394, %395 : vector<8x512xf32>
    %397 = vector.extract_strided_slice %396 {offsets = [0, 0], sizes = [8, 128], strides = [1, 1]} : vector<8x512xf32> to vector<8x128xf32>
    %398 = arith.negf %397 : vector<8x128xf32>
    %399 = math.exp %398 : vector<8x128xf32>
    %cst_191 = arith.constant 1.000000e+00 : f32
    %400 = vector.broadcast %cst_191 : f32 to vector<8x128xf32>
    %401 = arith.addf %400, %399 : vector<8x128xf32>
    %402 = arith.divf %400, %401 : vector<8x128xf32>
    %403 = vector.extract_strided_slice %396 {offsets = [0, 128], sizes = [8, 128], strides = [1, 1]} : vector<8x512xf32> to vector<8x128xf32>
    %404 = arith.negf %403 : vector<8x128xf32>
    %405 = math.exp %404 : vector<8x128xf32>
    %cst_192 = arith.constant 1.000000e+00 : f32
    %406 = vector.broadcast %cst_192 : f32 to vector<8x128xf32>
    %407 = arith.addf %406, %405 : vector<8x128xf32>
    %408 = arith.divf %406, %407 : vector<8x128xf32>
    %409 = vector.extract_strided_slice %396 {offsets = [0, 256], sizes = [8, 128], strides = [1, 1]} : vector<8x512xf32> to vector<8x128xf32>
    %410 = math.tanh %409 : vector<8x128xf32>
    %411 = vector.extract_strided_slice %396 {offsets = [0, 384], sizes = [8, 128], strides = [1, 1]} : vector<8x512xf32> to vector<8x128xf32>
    %412 = arith.negf %411 : vector<8x128xf32>
    %413 = math.exp %412 : vector<8x128xf32>
    %cst_193 = arith.constant 1.000000e+00 : f32
    %414 = vector.broadcast %cst_193 : f32 to vector<8x128xf32>
    %415 = arith.addf %414, %413 : vector<8x128xf32>
    %416 = arith.divf %414, %415 : vector<8x128xf32>
    %417 = arith.mulf %408, %389 : vector<8x128xf32>
    %418 = arith.mulf %402, %410 : vector<8x128xf32>
    %419 = arith.addf %417, %418 : vector<8x128xf32>
    %420 = math.tanh %419 : vector<8x128xf32>
    %421 = arith.mulf %416, %420 : vector<8x128xf32>
    %c1_194 = arith.constant 1 : index
    %c0_195 = arith.constant 0 : index
    %c0_196 = arith.constant 0 : index
    %422 = vector.load %arg10[%c1_194, %c0_195, %c0_196] : memref<2x8x128xf32, #tpu.memory_space<vmem>>, vector<1x8x128xf32>
    %423 = vector.shape_cast %422 : vector<1x8x128xf32> to vector<8x128xf32>
    %424 = vector.shape_cast %421 : vector<8x128xf32> to vector<1x8x128xf32>
    tpu.vector_store %arg10[%c1_194, %c0_195, %c0_196], %424 {strides = array<i32>} : memref<2x8x128xf32, #tpu.memory_space<vmem>>, vector<1x8x128xf32>,
    %c1_197 = arith.constant 1 : index
    %c0_198 = arith.constant 0 : index
    %c0_199 = arith.constant 0 : index
    %425 = vector.load %arg11[%c1_197, %c0_198, %c0_199] : memref<2x8x128xf32, #tpu.memory_space<vmem>>, vector<1x8x128xf32>
    %426 = vector.shape_cast %425 : vector<1x8x128xf32> to vector<8x128xf32>
    %427 = vector.shape_cast %419 : vector<8x128xf32> to vector<1x8x128xf32>
    tpu.vector_store %arg11[%c1_197, %c0_198, %c0_199], %427 {strides = array<i32>} : memref<2x8x128xf32, #tpu.memory_space<vmem>>, vector<1x8x128xf32>,
    %428 = arith.index_cast %c0_i32_181 : i32 to index
    %c0_200 = arith.constant 0 : index
    %c0_201 = arith.constant 0 : index
    %429 = vector.load %arg7[%428, %c0_200, %c0_201] : memref<8x8x128xf32, #tpu.memory_space<vmem>>, vector<1x8x128xf32>
    %430 = vector.shape_cast %429 : vector<1x8x128xf32> to vector<8x128xf32>
    %431 = vector.shape_cast %421 : vector<8x128xf32> to vector<1x8x128xf32>
    tpu.vector_store %arg7[%428, %c0_200, %c0_201], %431 {strides = array<i32>} : memref<8x8x128xf32, #tpu.memory_space<vmem>>, vector<1x8x128xf32>,
    %c1_i32_202 = arith.constant 1 : i32
    %c1_203 = arith.constant 1 : index
    %c0_204 = arith.constant 0 : index
    %c0_205 = arith.constant 0 : index
    %432 = vector.load %arg10[%c1_203, %c0_204, %c0_205] : memref<2x8x128xf32, #tpu.memory_space<vmem>>, vector<1x8x128xf32>
    %433 = vector.shape_cast %432 : vector<1x8x128xf32> to vector<8x128xf32>
    %c1_206 = arith.constant 1 : index
    %c0_207 = arith.constant 0 : index
    %c0_208 = arith.constant 0 : index
    %434 = vector.load %arg11[%c1_206, %c0_207, %c0_208] : memref<2x8x128xf32, #tpu.memory_space<vmem>>, vector<1x8x128xf32>
    %435 = vector.shape_cast %434 : vector<1x8x128xf32> to vector<8x128xf32>
    %436 = arith.index_cast %c1_i32_202 : i32 to index
    %c0_209 = arith.constant 0 : index
    %c0_210 = arith.constant 0 : index
    %437 = vector.load %arg13[%436, %c0_209, %c0_210] : memref<8x8x512xf32, #tpu.memory_space<vmem>>, vector<1x8x512xf32>
    %438 = vector.shape_cast %437 : vector<1x8x512xf32> to vector<8x512xf32>
    %439 = vector.broadcast %383 : vector<1x512xf32> to vector<8x512xf32>
    %440 = arith.addf %438, %439 : vector<8x512xf32>
    %cst_211 = arith.constant dense<0.000000e+00> : vector<8x512xf32>
    %441 = tpu.matmul %433, %385, %cst_211 {dimension_numbers = #tpu.dot_dimension_numbers<[1], [0], [0], [1], [0, 0, 1, 1], [], []>} : vector<8x128xf32>, vector<128x512xf32>, vector<8x512xf32> -> vector<8x512xf32>
    %442 = arith.addf %440, %441 : vector<8x512xf32>
    %443 = vector.extract_strided_slice %442 {offsets = [0, 0], sizes = [8, 128], strides = [1, 1]} : vector<8x512xf32> to vector<8x128xf32>
    %444 = arith.negf %443 : vector<8x128xf32>
    %445 = math.exp %444 : vector<8x128xf32>
    %cst_212 = arith.constant 1.000000e+00 : f32
    %446 = vector.broadcast %cst_212 : f32 to vector<8x128xf32>
    %447 = arith.addf %446, %445 : vector<8x128xf32>
    %448 = arith.divf %446, %447 : vector<8x128xf32>
    %449 = vector.extract_strided_slice %442 {offsets = [0, 128], sizes = [8, 128], strides = [1, 1]} : vector<8x512xf32> to vector<8x128xf32>
    %450 = arith.negf %449 : vector<8x128xf32>
    %451 = math.exp %450 : vector<8x128xf32>
    %cst_213 = arith.constant 1.000000e+00 : f32
    %452 = vector.broadcast %cst_213 : f32 to vector<8x128xf32>
    %453 = arith.addf %452, %451 : vector<8x128xf32>
    %454 = arith.divf %452, %453 : vector<8x128xf32>
    %455 = vector.extract_strided_slice %442 {offsets = [0, 256], sizes = [8, 128], strides = [1, 1]} : vector<8x512xf32> to vector<8x128xf32>
    %456 = math.tanh %455 : vector<8x128xf32>
    %457 = vector.extract_strided_slice %442 {offsets = [0, 384], sizes = [8, 128], strides = [1, 1]} : vector<8x512xf32> to vector<8x128xf32>
    %458 = arith.negf %457 : vector<8x128xf32>
    %459 = math.exp %458 : vector<8x128xf32>
    %cst_214 = arith.constant 1.000000e+00 : f32
    %460 = vector.broadcast %cst_214 : f32 to vector<8x128xf32>
    %461 = arith.addf %460, %459 : vector<8x128xf32>
    %462 = arith.divf %460, %461 : vector<8x128xf32>
    %463 = arith.mulf %454, %435 : vector<8x128xf32>
    %464 = arith.mulf %448, %456 : vector<8x128xf32>
    %465 = arith.addf %463, %464 : vector<8x128xf32>
    %466 = math.tanh %465 : vector<8x128xf32>
    %467 = arith.mulf %462, %466 : vector<8x128xf32>
    %c1_215 = arith.constant 1 : index
    %c0_216 = arith.constant 0 : index
    %c0_217 = arith.constant 0 : index
    %468 = vector.load %arg10[%c1_215, %c0_216, %c0_217] : memref<2x8x128xf32, #tpu.memory_space<vmem>>, vector<1x8x128xf32>
    %469 = vector.shape_cast %468 : vector<1x8x128xf32> to vector<8x128xf32>
    %470 = vector.shape_cast %467 : vector<8x128xf32> to vector<1x8x128xf32>
    tpu.vector_store %arg10[%c1_215, %c0_216, %c0_217], %470 {strides = array<i32>} : memref<2x8x128xf32, #tpu.memory_space<vmem>>, vector<1x8x128xf32>,
    %c1_218 = arith.constant 1 : index
    %c0_219 = arith.constant 0 : index
    %c0_220 = arith.constant 0 : index
    %471 = vector.load %arg11[%c1_218, %c0_219, %c0_220] : memref<2x8x128xf32, #tpu.memory_space<vmem>>, vector<1x8x128xf32>
    %472 = vector.shape_cast %471 : vector<1x8x128xf32> to vector<8x128xf32>
    %473 = vector.shape_cast %465 : vector<8x128xf32> to vector<1x8x128xf32>
    tpu.vector_store %arg11[%c1_218, %c0_219, %c0_220], %473 {strides = array<i32>} : memref<2x8x128xf32, #tpu.memory_space<vmem>>, vector<1x8x128xf32>,
    %474 = arith.index_cast %c1_i32_202 : i32 to index
    %c0_221 = arith.constant 0 : index
    %c0_222 = arith.constant 0 : index
    %475 = vector.load %arg7[%474, %c0_221, %c0_222] : memref<8x8x128xf32, #tpu.memory_space<vmem>>, vector<1x8x128xf32>
    %476 = vector.shape_cast %475 : vector<1x8x128xf32> to vector<8x128xf32>
    %477 = vector.shape_cast %467 : vector<8x128xf32> to vector<1x8x128xf32>
    tpu.vector_store %arg7[%474, %c0_221, %c0_222], %477 {strides = array<i32>} : memref<8x8x128xf32, #tpu.memory_space<vmem>>, vector<1x8x128xf32>,
    %c2_i32_223 = arith.constant 2 : i32
    %c1_224 = arith.constant 1 : index
    %c0_225 = arith.constant 0 : index
    %c0_226 = arith.constant 0 : index
    %478 = vector.load %arg10[%c1_224, %c0_225, %c0_226] : memref<2x8x128xf32, #tpu.memory_space<vmem>>, vector<1x8x128xf32>
    %479 = vector.shape_cast %478 : vector<1x8x128xf32> to vector<8x128xf32>
    %c1_227 = arith.constant 1 : index
    %c0_228 = arith.constant 0 : index
    %c0_229 = arith.constant 0 : index
    %480 = vector.load %arg11[%c1_227, %c0_228, %c0_229] : memref<2x8x128xf32, #tpu.memory_space<vmem>>, vector<1x8x128xf32>
    %481 = vector.shape_cast %480 : vector<1x8x128xf32> to vector<8x128xf32>
    %482 = arith.index_cast %c2_i32_223 : i32 to index
    %c0_230 = arith.constant 0 : index
    %c0_231 = arith.constant 0 : index
    %483 = vector.load %arg13[%482, %c0_230, %c0_231] : memref<8x8x512xf32, #tpu.memory_space<vmem>>, vector<1x8x512xf32>
    %484 = vector.shape_cast %483 : vector<1x8x512xf32> to vector<8x512xf32>
    %485 = vector.broadcast %383 : vector<1x512xf32> to vector<8x512xf32>
    %486 = arith.addf %484, %485 : vector<8x512xf32>
    %cst_232 = arith.constant dense<0.000000e+00> : vector<8x512xf32>
    %487 = tpu.matmul %479, %385, %cst_232 {dimension_numbers = #tpu.dot_dimension_numbers<[1], [0], [0], [1], [0, 0, 1, 1], [], []>} : vector<8x128xf32>, vector<128x512xf32>, vector<8x512xf32> -> vector<8x512xf32>
    %488 = arith.addf %486, %487 : vector<8x512xf32>
    %489 = vector.extract_strided_slice %488 {offsets = [0, 0], sizes = [8, 128], strides = [1, 1]} : vector<8x512xf32> to vector<8x128xf32>
    %490 = arith.negf %489 : vector<8x128xf32>
    %491 = math.exp %490 : vector<8x128xf32>
    %cst_233 = arith.constant 1.000000e+00 : f32
    %492 = vector.broadcast %cst_233 : f32 to vector<8x128xf32>
    %493 = arith.addf %492, %491 : vector<8x128xf32>
    %494 = arith.divf %492, %493 : vector<8x128xf32>
    %495 = vector.extract_strided_slice %488 {offsets = [0, 128], sizes = [8, 128], strides = [1, 1]} : vector<8x512xf32> to vector<8x128xf32>
    %496 = arith.negf %495 : vector<8x128xf32>
    %497 = math.exp %496 : vector<8x128xf32>
    %cst_234 = arith.constant 1.000000e+00 : f32
    %498 = vector.broadcast %cst_234 : f32 to vector<8x128xf32>
    %499 = arith.addf %498, %497 : vector<8x128xf32>
    %500 = arith.divf %498, %499 : vector<8x128xf32>
    %501 = vector.extract_strided_slice %488 {offsets = [0, 256], sizes = [8, 128], strides = [1, 1]} : vector<8x512xf32> to vector<8x128xf32>
    %502 = math.tanh %501 : vector<8x128xf32>
    %503 = vector.extract_strided_slice %488 {offsets = [0, 384], sizes = [8, 128], strides = [1, 1]} : vector<8x512xf32> to vector<8x128xf32>
    %504 = arith.negf %503 : vector<8x128xf32>
    %505 = math.exp %504 : vector<8x128xf32>
    %cst_235 = arith.constant 1.000000e+00 : f32
    %506 = vector.broadcast %cst_235 : f32 to vector<8x128xf32>
    %507 = arith.addf %506, %505 : vector<8x128xf32>
    %508 = arith.divf %506, %507 : vector<8x128xf32>
    %509 = arith.mulf %500, %481 : vector<8x128xf32>
    %510 = arith.mulf %494, %502 : vector<8x128xf32>
    %511 = arith.addf %509, %510 : vector<8x128xf32>
    %512 = math.tanh %511 : vector<8x128xf32>
    %513 = arith.mulf %508, %512 : vector<8x128xf32>
    %c1_236 = arith.constant 1 : index
    %c0_237 = arith.constant 0 : index
    %c0_238 = arith.constant 0 : index
    %514 = vector.load %arg10[%c1_236, %c0_237, %c0_238] : memref<2x8x128xf32, #tpu.memory_space<vmem>>, vector<1x8x128xf32>
    %515 = vector.shape_cast %514 : vector<1x8x128xf32> to vector<8x128xf32>
    %516 = vector.shape_cast %513 : vector<8x128xf32> to vector<1x8x128xf32>
    tpu.vector_store %arg10[%c1_236, %c0_237, %c0_238], %516 {strides = array<i32>} : memref<2x8x128xf32, #tpu.memory_space<vmem>>, vector<1x8x128xf32>,
    %c1_239 = arith.constant 1 : index
    %c0_240 = arith.constant 0 : index
    %c0_241 = arith.constant 0 : index
    %517 = vector.load %arg11[%c1_239, %c0_240, %c0_241] : memref<2x8x128xf32, #tpu.memory_space<vmem>>, vector<1x8x128xf32>
    %518 = vector.shape_cast %517 : vector<1x8x128xf32> to vector<8x128xf32>
    %519 = vector.shape_cast %511 : vector<8x128xf32> to vector<1x8x128xf32>
    tpu.vector_store %arg11[%c1_239, %c0_240, %c0_241], %519 {strides = array<i32>} : memref<2x8x128xf32, #tpu.memory_space<vmem>>, vector<1x8x128xf32>,
    %520 = arith.index_cast %c2_i32_223 : i32 to index
    %c0_242 = arith.constant 0 : index
    %c0_243 = arith.constant 0 : index
    %521 = vector.load %arg7[%520, %c0_242, %c0_243] : memref<8x8x128xf32, #tpu.memory_space<vmem>>, vector<1x8x128xf32>
    %522 = vector.shape_cast %521 : vector<1x8x128xf32> to vector<8x128xf32>
    %523 = vector.shape_cast %513 : vector<8x128xf32> to vector<1x8x128xf32>
    tpu.vector_store %arg7[%520, %c0_242, %c0_243], %523 {strides = array<i32>} : memref<8x8x128xf32, #tpu.memory_space<vmem>>, vector<1x8x128xf32>,
    %c3_i32_244 = arith.constant 3 : i32
    %c1_245 = arith.constant 1 : index
    %c0_246 = arith.constant 0 : index
    %c0_247 = arith.constant 0 : index
    %524 = vector.load %arg10[%c1_245, %c0_246, %c0_247] : memref<2x8x128xf32, #tpu.memory_space<vmem>>, vector<1x8x128xf32>
    %525 = vector.shape_cast %524 : vector<1x8x128xf32> to vector<8x128xf32>
    %c1_248 = arith.constant 1 : index
    %c0_249 = arith.constant 0 : index
    %c0_250 = arith.constant 0 : index
    %526 = vector.load %arg11[%c1_248, %c0_249, %c0_250] : memref<2x8x128xf32, #tpu.memory_space<vmem>>, vector<1x8x128xf32>
    %527 = vector.shape_cast %526 : vector<1x8x128xf32> to vector<8x128xf32>
    %528 = arith.index_cast %c3_i32_244 : i32 to index
    %c0_251 = arith.constant 0 : index
    %c0_252 = arith.constant 0 : index
    %529 = vector.load %arg13[%528, %c0_251, %c0_252] : memref<8x8x512xf32, #tpu.memory_space<vmem>>, vector<1x8x512xf32>
    %530 = vector.shape_cast %529 : vector<1x8x512xf32> to vector<8x512xf32>
    %531 = vector.broadcast %383 : vector<1x512xf32> to vector<8x512xf32>
    %532 = arith.addf %530, %531 : vector<8x512xf32>
    %cst_253 = arith.constant dense<0.000000e+00> : vector<8x512xf32>
    %533 = tpu.matmul %525, %385, %cst_253 {dimension_numbers = #tpu.dot_dimension_numbers<[1], [0], [0], [1], [0, 0, 1, 1], [], []>} : vector<8x128xf32>, vector<128x512xf32>, vector<8x512xf32> -> vector<8x512xf32>
    %534 = arith.addf %532, %533 : vector<8x512xf32>
    %535 = vector.extract_strided_slice %534 {offsets = [0, 0], sizes = [8, 128], strides = [1, 1]} : vector<8x512xf32> to vector<8x128xf32>
    %536 = arith.negf %535 : vector<8x128xf32>
    %537 = math.exp %536 : vector<8x128xf32>
    %cst_254 = arith.constant 1.000000e+00 : f32
    %538 = vector.broadcast %cst_254 : f32 to vector<8x128xf32>
    %539 = arith.addf %538, %537 : vector<8x128xf32>
    %540 = arith.divf %538, %539 : vector<8x128xf32>
    %541 = vector.extract_strided_slice %534 {offsets = [0, 128], sizes = [8, 128], strides = [1, 1]} : vector<8x512xf32> to vector<8x128xf32>
    %542 = arith.negf %541 : vector<8x128xf32>
    %543 = math.exp %542 : vector<8x128xf32>
    %cst_255 = arith.constant 1.000000e+00 : f32
    %544 = vector.broadcast %cst_255 : f32 to vector<8x128xf32>
    %545 = arith.addf %544, %543 : vector<8x128xf32>
    %546 = arith.divf %544, %545 : vector<8x128xf32>
    %547 = vector.extract_strided_slice %534 {offsets = [0, 256], sizes = [8, 128], strides = [1, 1]} : vector<8x512xf32> to vector<8x128xf32>
    %548 = math.tanh %547 : vector<8x128xf32>
    %549 = vector.extract_strided_slice %534 {offsets = [0, 384], sizes = [8, 128], strides = [1, 1]} : vector<8x512xf32> to vector<8x128xf32>
    %550 = arith.negf %549 : vector<8x128xf32>
    %551 = math.exp %550 : vector<8x128xf32>
    %cst_256 = arith.constant 1.000000e+00 : f32
    %552 = vector.broadcast %cst_256 : f32 to vector<8x128xf32>
    %553 = arith.addf %552, %551 : vector<8x128xf32>
    %554 = arith.divf %552, %553 : vector<8x128xf32>
    %555 = arith.mulf %546, %527 : vector<8x128xf32>
    %556 = arith.mulf %540, %548 : vector<8x128xf32>
    %557 = arith.addf %555, %556 : vector<8x128xf32>
    %558 = math.tanh %557 : vector<8x128xf32>
    %559 = arith.mulf %554, %558 : vector<8x128xf32>
    %c1_257 = arith.constant 1 : index
    %c0_258 = arith.constant 0 : index
    %c0_259 = arith.constant 0 : index
    %560 = vector.load %arg10[%c1_257, %c0_258, %c0_259] : memref<2x8x128xf32, #tpu.memory_space<vmem>>, vector<1x8x128xf32>
    %561 = vector.shape_cast %560 : vector<1x8x128xf32> to vector<8x128xf32>
    %562 = vector.shape_cast %559 : vector<8x128xf32> to vector<1x8x128xf32>
    tpu.vector_store %arg10[%c1_257, %c0_258, %c0_259], %562 {strides = array<i32>} : memref<2x8x128xf32, #tpu.memory_space<vmem>>, vector<1x8x128xf32>,
    %c1_260 = arith.constant 1 : index
    %c0_261 = arith.constant 0 : index
    %c0_262 = arith.constant 0 : index
    %563 = vector.load %arg11[%c1_260, %c0_261, %c0_262] : memref<2x8x128xf32, #tpu.memory_space<vmem>>, vector<1x8x128xf32>
    %564 = vector.shape_cast %563 : vector<1x8x128xf32> to vector<8x128xf32>
    %565 = vector.shape_cast %557 : vector<8x128xf32> to vector<1x8x128xf32>
    tpu.vector_store %arg11[%c1_260, %c0_261, %c0_262], %565 {strides = array<i32>} : memref<2x8x128xf32, #tpu.memory_space<vmem>>, vector<1x8x128xf32>,
    %566 = arith.index_cast %c3_i32_244 : i32 to index
    %c0_263 = arith.constant 0 : index
    %c0_264 = arith.constant 0 : index
    %567 = vector.load %arg7[%566, %c0_263, %c0_264] : memref<8x8x128xf32, #tpu.memory_space<vmem>>, vector<1x8x128xf32>
    %568 = vector.shape_cast %567 : vector<1x8x128xf32> to vector<8x128xf32>
    %569 = vector.shape_cast %559 : vector<8x128xf32> to vector<1x8x128xf32>
    tpu.vector_store %arg7[%566, %c0_263, %c0_264], %569 {strides = array<i32>} : memref<8x8x128xf32, #tpu.memory_space<vmem>>, vector<1x8x128xf32>,
    %c4_i32_265 = arith.constant 4 : i32
    %c1_266 = arith.constant 1 : index
    %c0_267 = arith.constant 0 : index
    %c0_268 = arith.constant 0 : index
    %570 = vector.load %arg10[%c1_266, %c0_267, %c0_268] : memref<2x8x128xf32, #tpu.memory_space<vmem>>, vector<1x8x128xf32>
    %571 = vector.shape_cast %570 : vector<1x8x128xf32> to vector<8x128xf32>
    %c1_269 = arith.constant 1 : index
    %c0_270 = arith.constant 0 : index
    %c0_271 = arith.constant 0 : index
    %572 = vector.load %arg11[%c1_269, %c0_270, %c0_271] : memref<2x8x128xf32, #tpu.memory_space<vmem>>, vector<1x8x128xf32>
    %573 = vector.shape_cast %572 : vector<1x8x128xf32> to vector<8x128xf32>
    %574 = arith.index_cast %c4_i32_265 : i32 to index
    %c0_272 = arith.constant 0 : index
    %c0_273 = arith.constant 0 : index
    %575 = vector.load %arg13[%574, %c0_272, %c0_273] : memref<8x8x512xf32, #tpu.memory_space<vmem>>, vector<1x8x512xf32>
    %576 = vector.shape_cast %575 : vector<1x8x512xf32> to vector<8x512xf32>
    %577 = vector.broadcast %383 : vector<1x512xf32> to vector<8x512xf32>
    %578 = arith.addf %576, %577 : vector<8x512xf32>
    %cst_274 = arith.constant dense<0.000000e+00> : vector<8x512xf32>
    %579 = tpu.matmul %571, %385, %cst_274 {dimension_numbers = #tpu.dot_dimension_numbers<[1], [0], [0], [1], [0, 0, 1, 1], [], []>} : vector<8x128xf32>, vector<128x512xf32>, vector<8x512xf32> -> vector<8x512xf32>
    %580 = arith.addf %578, %579 : vector<8x512xf32>
    %581 = vector.extract_strided_slice %580 {offsets = [0, 0], sizes = [8, 128], strides = [1, 1]} : vector<8x512xf32> to vector<8x128xf32>
    %582 = arith.negf %581 : vector<8x128xf32>
    %583 = math.exp %582 : vector<8x128xf32>
    %cst_275 = arith.constant 1.000000e+00 : f32
    %584 = vector.broadcast %cst_275 : f32 to vector<8x128xf32>
    %585 = arith.addf %584, %583 : vector<8x128xf32>
    %586 = arith.divf %584, %585 : vector<8x128xf32>
    %587 = vector.extract_strided_slice %580 {offsets = [0, 128], sizes = [8, 128], strides = [1, 1]} : vector<8x512xf32> to vector<8x128xf32>
    %588 = arith.negf %587 : vector<8x128xf32>
    %589 = math.exp %588 : vector<8x128xf32>
    %cst_276 = arith.constant 1.000000e+00 : f32
    %590 = vector.broadcast %cst_276 : f32 to vector<8x128xf32>
    %591 = arith.addf %590, %589 : vector<8x128xf32>
    %592 = arith.divf %590, %591 : vector<8x128xf32>
    %593 = vector.extract_strided_slice %580 {offsets = [0, 256], sizes = [8, 128], strides = [1, 1]} : vector<8x512xf32> to vector<8x128xf32>
    %594 = math.tanh %593 : vector<8x128xf32>
    %595 = vector.extract_strided_slice %580 {offsets = [0, 384], sizes = [8, 128], strides = [1, 1]} : vector<8x512xf32> to vector<8x128xf32>
    %596 = arith.negf %595 : vector<8x128xf32>
    %597 = math.exp %596 : vector<8x128xf32>
    %cst_277 = arith.constant 1.000000e+00 : f32
    %598 = vector.broadcast %cst_277 : f32 to vector<8x128xf32>
    %599 = arith.addf %598, %597 : vector<8x128xf32>
    %600 = arith.divf %598, %599 : vector<8x128xf32>
    %601 = arith.mulf %592, %573 : vector<8x128xf32>
    %602 = arith.mulf %586, %594 : vector<8x128xf32>
    %603 = arith.addf %601, %602 : vector<8x128xf32>
    %604 = math.tanh %603 : vector<8x128xf32>
    %605 = arith.mulf %600, %604 : vector<8x128xf32>
    %c1_278 = arith.constant 1 : index
    %c0_279 = arith.constant 0 : index
    %c0_280 = arith.constant 0 : index
    %606 = vector.load %arg10[%c1_278, %c0_279, %c0_280] : memref<2x8x128xf32, #tpu.memory_space<vmem>>, vector<1x8x128xf32>
    %607 = vector.shape_cast %606 : vector<1x8x128xf32> to vector<8x128xf32>
    %608 = vector.shape_cast %605 : vector<8x128xf32> to vector<1x8x128xf32>
    tpu.vector_store %arg10[%c1_278, %c0_279, %c0_280], %608 {strides = array<i32>} : memref<2x8x128xf32, #tpu.memory_space<vmem>>, vector<1x8x128xf32>,
    %c1_281 = arith.constant 1 : index
    %c0_282 = arith.constant 0 : index
    %c0_283 = arith.constant 0 : index
    %609 = vector.load %arg11[%c1_281, %c0_282, %c0_283] : memref<2x8x128xf32, #tpu.memory_space<vmem>>, vector<1x8x128xf32>
    %610 = vector.shape_cast %609 : vector<1x8x128xf32> to vector<8x128xf32>
    %611 = vector.shape_cast %603 : vector<8x128xf32> to vector<1x8x128xf32>
    tpu.vector_store %arg11[%c1_281, %c0_282, %c0_283], %611 {strides = array<i32>} : memref<2x8x128xf32, #tpu.memory_space<vmem>>, vector<1x8x128xf32>,
    %612 = arith.index_cast %c4_i32_265 : i32 to index
    %c0_284 = arith.constant 0 : index
    %c0_285 = arith.constant 0 : index
    %613 = vector.load %arg7[%612, %c0_284, %c0_285] : memref<8x8x128xf32, #tpu.memory_space<vmem>>, vector<1x8x128xf32>
    %614 = vector.shape_cast %613 : vector<1x8x128xf32> to vector<8x128xf32>
    %615 = vector.shape_cast %605 : vector<8x128xf32> to vector<1x8x128xf32>
    tpu.vector_store %arg7[%612, %c0_284, %c0_285], %615 {strides = array<i32>} : memref<8x8x128xf32, #tpu.memory_space<vmem>>, vector<1x8x128xf32>,
    %c5_i32_286 = arith.constant 5 : i32
    %c1_287 = arith.constant 1 : index
    %c0_288 = arith.constant 0 : index
    %c0_289 = arith.constant 0 : index
    %616 = vector.load %arg10[%c1_287, %c0_288, %c0_289] : memref<2x8x128xf32, #tpu.memory_space<vmem>>, vector<1x8x128xf32>
    %617 = vector.shape_cast %616 : vector<1x8x128xf32> to vector<8x128xf32>
    %c1_290 = arith.constant 1 : index
    %c0_291 = arith.constant 0 : index
    %c0_292 = arith.constant 0 : index
    %618 = vector.load %arg11[%c1_290, %c0_291, %c0_292] : memref<2x8x128xf32, #tpu.memory_space<vmem>>, vector<1x8x128xf32>
    %619 = vector.shape_cast %618 : vector<1x8x128xf32> to vector<8x128xf32>
    %620 = arith.index_cast %c5_i32_286 : i32 to index
    %c0_293 = arith.constant 0 : index
    %c0_294 = arith.constant 0 : index
    %621 = vector.load %arg13[%620, %c0_293, %c0_294] : memref<8x8x512xf32, #tpu.memory_space<vmem>>, vector<1x8x512xf32>
    %622 = vector.shape_cast %621 : vector<1x8x512xf32> to vector<8x512xf32>
    %623 = vector.broadcast %383 : vector<1x512xf32> to vector<8x512xf32>
    %624 = arith.addf %622, %623 : vector<8x512xf32>
    %cst_295 = arith.constant dense<0.000000e+00> : vector<8x512xf32>
    %625 = tpu.matmul %617, %385, %cst_295 {dimension_numbers = #tpu.dot_dimension_numbers<[1], [0], [0], [1], [0, 0, 1, 1], [], []>} : vector<8x128xf32>, vector<128x512xf32>, vector<8x512xf32> -> vector<8x512xf32>
    %626 = arith.addf %624, %625 : vector<8x512xf32>
    %627 = vector.extract_strided_slice %626 {offsets = [0, 0], sizes = [8, 128], strides = [1, 1]} : vector<8x512xf32> to vector<8x128xf32>
    %628 = arith.negf %627 : vector<8x128xf32>
    %629 = math.exp %628 : vector<8x128xf32>
    %cst_296 = arith.constant 1.000000e+00 : f32
    %630 = vector.broadcast %cst_296 : f32 to vector<8x128xf32>
    %631 = arith.addf %630, %629 : vector<8x128xf32>
    %632 = arith.divf %630, %631 : vector<8x128xf32>
    %633 = vector.extract_strided_slice %626 {offsets = [0, 128], sizes = [8, 128], strides = [1, 1]} : vector<8x512xf32> to vector<8x128xf32>
    %634 = arith.negf %633 : vector<8x128xf32>
    %635 = math.exp %634 : vector<8x128xf32>
    %cst_297 = arith.constant 1.000000e+00 : f32
    %636 = vector.broadcast %cst_297 : f32 to vector<8x128xf32>
    %637 = arith.addf %636, %635 : vector<8x128xf32>
    %638 = arith.divf %636, %637 : vector<8x128xf32>
    %639 = vector.extract_strided_slice %626 {offsets = [0, 256], sizes = [8, 128], strides = [1, 1]} : vector<8x512xf32> to vector<8x128xf32>
    %640 = math.tanh %639 : vector<8x128xf32>
    %641 = vector.extract_strided_slice %626 {offsets = [0, 384], sizes = [8, 128], strides = [1, 1]} : vector<8x512xf32> to vector<8x128xf32>
    %642 = arith.negf %641 : vector<8x128xf32>
    %643 = math.exp %642 : vector<8x128xf32>
    %cst_298 = arith.constant 1.000000e+00 : f32
    %644 = vector.broadcast %cst_298 : f32 to vector<8x128xf32>
    %645 = arith.addf %644, %643 : vector<8x128xf32>
    %646 = arith.divf %644, %645 : vector<8x128xf32>
    %647 = arith.mulf %638, %619 : vector<8x128xf32>
    %648 = arith.mulf %632, %640 : vector<8x128xf32>
    %649 = arith.addf %647, %648 : vector<8x128xf32>
    %650 = math.tanh %649 : vector<8x128xf32>
    %651 = arith.mulf %646, %650 : vector<8x128xf32>
    %c1_299 = arith.constant 1 : index
    %c0_300 = arith.constant 0 : index
    %c0_301 = arith.constant 0 : index
    %652 = vector.load %arg10[%c1_299, %c0_300, %c0_301] : memref<2x8x128xf32, #tpu.memory_space<vmem>>, vector<1x8x128xf32>
    %653 = vector.shape_cast %652 : vector<1x8x128xf32> to vector<8x128xf32>
    %654 = vector.shape_cast %651 : vector<8x128xf32> to vector<1x8x128xf32>
    tpu.vector_store %arg10[%c1_299, %c0_300, %c0_301], %654 {strides = array<i32>} : memref<2x8x128xf32, #tpu.memory_space<vmem>>, vector<1x8x128xf32>,
    %c1_302 = arith.constant 1 : index
    %c0_303 = arith.constant 0 : index
    %c0_304 = arith.constant 0 : index
    %655 = vector.load %arg11[%c1_302, %c0_303, %c0_304] : memref<2x8x128xf32, #tpu.memory_space<vmem>>, vector<1x8x128xf32>
    %656 = vector.shape_cast %655 : vector<1x8x128xf32> to vector<8x128xf32>
    %657 = vector.shape_cast %649 : vector<8x128xf32> to vector<1x8x128xf32>
    tpu.vector_store %arg11[%c1_302, %c0_303, %c0_304], %657 {strides = array<i32>} : memref<2x8x128xf32, #tpu.memory_space<vmem>>, vector<1x8x128xf32>,
    %658 = arith.index_cast %c5_i32_286 : i32 to index
    %c0_305 = arith.constant 0 : index
    %c0_306 = arith.constant 0 : index
    %659 = vector.load %arg7[%658, %c0_305, %c0_306] : memref<8x8x128xf32, #tpu.memory_space<vmem>>, vector<1x8x128xf32>
    %660 = vector.shape_cast %659 : vector<1x8x128xf32> to vector<8x128xf32>
    %661 = vector.shape_cast %651 : vector<8x128xf32> to vector<1x8x128xf32>
    tpu.vector_store %arg7[%658, %c0_305, %c0_306], %661 {strides = array<i32>} : memref<8x8x128xf32, #tpu.memory_space<vmem>>, vector<1x8x128xf32>,
    %c6_i32_307 = arith.constant 6 : i32
    %c1_308 = arith.constant 1 : index
    %c0_309 = arith.constant 0 : index
    %c0_310 = arith.constant 0 : index
    %662 = vector.load %arg10[%c1_308, %c0_309, %c0_310] : memref<2x8x128xf32, #tpu.memory_space<vmem>>, vector<1x8x128xf32>
    %663 = vector.shape_cast %662 : vector<1x8x128xf32> to vector<8x128xf32>
    %c1_311 = arith.constant 1 : index
    %c0_312 = arith.constant 0 : index
    %c0_313 = arith.constant 0 : index
    %664 = vector.load %arg11[%c1_311, %c0_312, %c0_313] : memref<2x8x128xf32, #tpu.memory_space<vmem>>, vector<1x8x128xf32>
    %665 = vector.shape_cast %664 : vector<1x8x128xf32> to vector<8x128xf32>
    %666 = arith.index_cast %c6_i32_307 : i32 to index
    %c0_314 = arith.constant 0 : index
    %c0_315 = arith.constant 0 : index
    %667 = vector.load %arg13[%666, %c0_314, %c0_315] : memref<8x8x512xf32, #tpu.memory_space<vmem>>, vector<1x8x512xf32>
    %668 = vector.shape_cast %667 : vector<1x8x512xf32> to vector<8x512xf32>
    %669 = vector.broadcast %383 : vector<1x512xf32> to vector<8x512xf32>
    %670 = arith.addf %668, %669 : vector<8x512xf32>
    %cst_316 = arith.constant dense<0.000000e+00> : vector<8x512xf32>
    %671 = tpu.matmul %663, %385, %cst_316 {dimension_numbers = #tpu.dot_dimension_numbers<[1], [0], [0], [1], [0, 0, 1, 1], [], []>} : vector<8x128xf32>, vector<128x512xf32>, vector<8x512xf32> -> vector<8x512xf32>
    %672 = arith.addf %670, %671 : vector<8x512xf32>
    %673 = vector.extract_strided_slice %672 {offsets = [0, 0], sizes = [8, 128], strides = [1, 1]} : vector<8x512xf32> to vector<8x128xf32>
    %674 = arith.negf %673 : vector<8x128xf32>
    %675 = math.exp %674 : vector<8x128xf32>
    %cst_317 = arith.constant 1.000000e+00 : f32
    %676 = vector.broadcast %cst_317 : f32 to vector<8x128xf32>
    %677 = arith.addf %676, %675 : vector<8x128xf32>
    %678 = arith.divf %676, %677 : vector<8x128xf32>
    %679 = vector.extract_strided_slice %672 {offsets = [0, 128], sizes = [8, 128], strides = [1, 1]} : vector<8x512xf32> to vector<8x128xf32>
    %680 = arith.negf %679 : vector<8x128xf32>
    %681 = math.exp %680 : vector<8x128xf32>
    %cst_318 = arith.constant 1.000000e+00 : f32
    %682 = vector.broadcast %cst_318 : f32 to vector<8x128xf32>
    %683 = arith.addf %682, %681 : vector<8x128xf32>
    %684 = arith.divf %682, %683 : vector<8x128xf32>
    %685 = vector.extract_strided_slice %672 {offsets = [0, 256], sizes = [8, 128], strides = [1, 1]} : vector<8x512xf32> to vector<8x128xf32>
    %686 = math.tanh %685 : vector<8x128xf32>
    %687 = vector.extract_strided_slice %672 {offsets = [0, 384], sizes = [8, 128], strides = [1, 1]} : vector<8x512xf32> to vector<8x128xf32>
    %688 = arith.negf %687 : vector<8x128xf32>
    %689 = math.exp %688 : vector<8x128xf32>
    %cst_319 = arith.constant 1.000000e+00 : f32
    %690 = vector.broadcast %cst_319 : f32 to vector<8x128xf32>
    %691 = arith.addf %690, %689 : vector<8x128xf32>
    %692 = arith.divf %690, %691 : vector<8x128xf32>
    %693 = arith.mulf %684, %665 : vector<8x128xf32>
    %694 = arith.mulf %678, %686 : vector<8x128xf32>
    %695 = arith.addf %693, %694 : vector<8x128xf32>
    %696 = math.tanh %695 : vector<8x128xf32>
    %697 = arith.mulf %692, %696 : vector<8x128xf32>
    %c1_320 = arith.constant 1 : index
    %c0_321 = arith.constant 0 : index
    %c0_322 = arith.constant 0 : index
    %698 = vector.load %arg10[%c1_320, %c0_321, %c0_322] : memref<2x8x128xf32, #tpu.memory_space<vmem>>, vector<1x8x128xf32>
    %699 = vector.shape_cast %698 : vector<1x8x128xf32> to vector<8x128xf32>
    %700 = vector.shape_cast %697 : vector<8x128xf32> to vector<1x8x128xf32>
    tpu.vector_store %arg10[%c1_320, %c0_321, %c0_322], %700 {strides = array<i32>} : memref<2x8x128xf32, #tpu.memory_space<vmem>>, vector<1x8x128xf32>,
    %c1_323 = arith.constant 1 : index
    %c0_324 = arith.constant 0 : index
    %c0_325 = arith.constant 0 : index
    %701 = vector.load %arg11[%c1_323, %c0_324, %c0_325] : memref<2x8x128xf32, #tpu.memory_space<vmem>>, vector<1x8x128xf32>
    %702 = vector.shape_cast %701 : vector<1x8x128xf32> to vector<8x128xf32>
    %703 = vector.shape_cast %695 : vector<8x128xf32> to vector<1x8x128xf32>
    tpu.vector_store %arg11[%c1_323, %c0_324, %c0_325], %703 {strides = array<i32>} : memref<2x8x128xf32, #tpu.memory_space<vmem>>, vector<1x8x128xf32>,
    %704 = arith.index_cast %c6_i32_307 : i32 to index
    %c0_326 = arith.constant 0 : index
    %c0_327 = arith.constant 0 : index
    %705 = vector.load %arg7[%704, %c0_326, %c0_327] : memref<8x8x128xf32, #tpu.memory_space<vmem>>, vector<1x8x128xf32>
    %706 = vector.shape_cast %705 : vector<1x8x128xf32> to vector<8x128xf32>
    %707 = vector.shape_cast %697 : vector<8x128xf32> to vector<1x8x128xf32>
    tpu.vector_store %arg7[%704, %c0_326, %c0_327], %707 {strides = array<i32>} : memref<8x8x128xf32, #tpu.memory_space<vmem>>, vector<1x8x128xf32>,
    %c7_i32_328 = arith.constant 7 : i32
    %c1_329 = arith.constant 1 : index
    %c0_330 = arith.constant 0 : index
    %c0_331 = arith.constant 0 : index
    %708 = vector.load %arg10[%c1_329, %c0_330, %c0_331] : memref<2x8x128xf32, #tpu.memory_space<vmem>>, vector<1x8x128xf32>
    %709 = vector.shape_cast %708 : vector<1x8x128xf32> to vector<8x128xf32>
    %c1_332 = arith.constant 1 : index
    %c0_333 = arith.constant 0 : index
    %c0_334 = arith.constant 0 : index
    %710 = vector.load %arg11[%c1_332, %c0_333, %c0_334] : memref<2x8x128xf32, #tpu.memory_space<vmem>>, vector<1x8x128xf32>
    %711 = vector.shape_cast %710 : vector<1x8x128xf32> to vector<8x128xf32>
    %712 = arith.index_cast %c7_i32_328 : i32 to index
    %c0_335 = arith.constant 0 : index
    %c0_336 = arith.constant 0 : index
    %713 = vector.load %arg13[%712, %c0_335, %c0_336] : memref<8x8x512xf32, #tpu.memory_space<vmem>>, vector<1x8x512xf32>
    %714 = vector.shape_cast %713 : vector<1x8x512xf32> to vector<8x512xf32>
    %715 = vector.broadcast %383 : vector<1x512xf32> to vector<8x512xf32>
    %716 = arith.addf %714, %715 : vector<8x512xf32>
    %cst_337 = arith.constant dense<0.000000e+00> : vector<8x512xf32>
    %717 = tpu.matmul %709, %385, %cst_337 {dimension_numbers = #tpu.dot_dimension_numbers<[1], [0], [0], [1], [0, 0, 1, 1], [], []>} : vector<8x128xf32>, vector<128x512xf32>, vector<8x512xf32> -> vector<8x512xf32>
    %718 = arith.addf %716, %717 : vector<8x512xf32>
    %719 = vector.extract_strided_slice %718 {offsets = [0, 0], sizes = [8, 128], strides = [1, 1]} : vector<8x512xf32> to vector<8x128xf32>
    %720 = arith.negf %719 : vector<8x128xf32>
    %721 = math.exp %720 : vector<8x128xf32>
    %cst_338 = arith.constant 1.000000e+00 : f32
    %722 = vector.broadcast %cst_338 : f32 to vector<8x128xf32>
    %723 = arith.addf %722, %721 : vector<8x128xf32>
    %724 = arith.divf %722, %723 : vector<8x128xf32>
    %725 = vector.extract_strided_slice %718 {offsets = [0, 128], sizes = [8, 128], strides = [1, 1]} : vector<8x512xf32> to vector<8x128xf32>
    %726 = arith.negf %725 : vector<8x128xf32>
    %727 = math.exp %726 : vector<8x128xf32>
    %cst_339 = arith.constant 1.000000e+00 : f32
    %728 = vector.broadcast %cst_339 : f32 to vector<8x128xf32>
    %729 = arith.addf %728, %727 : vector<8x128xf32>
    %730 = arith.divf %728, %729 : vector<8x128xf32>
    %731 = vector.extract_strided_slice %718 {offsets = [0, 256], sizes = [8, 128], strides = [1, 1]} : vector<8x512xf32> to vector<8x128xf32>
    %732 = math.tanh %731 : vector<8x128xf32>
    %733 = vector.extract_strided_slice %718 {offsets = [0, 384], sizes = [8, 128], strides = [1, 1]} : vector<8x512xf32> to vector<8x128xf32>
    %734 = arith.negf %733 : vector<8x128xf32>
    %735 = math.exp %734 : vector<8x128xf32>
    %cst_340 = arith.constant 1.000000e+00 : f32
    %736 = vector.broadcast %cst_340 : f32 to vector<8x128xf32>
    %737 = arith.addf %736, %735 : vector<8x128xf32>
    %738 = arith.divf %736, %737 : vector<8x128xf32>
    %739 = arith.mulf %730, %711 : vector<8x128xf32>
    %740 = arith.mulf %724, %732 : vector<8x128xf32>
    %741 = arith.addf %739, %740 : vector<8x128xf32>
    %742 = math.tanh %741 : vector<8x128xf32>
    %743 = arith.mulf %738, %742 : vector<8x128xf32>
    %c1_341 = arith.constant 1 : index
    %c0_342 = arith.constant 0 : index
    %c0_343 = arith.constant 0 : index
    %744 = vector.load %arg10[%c1_341, %c0_342, %c0_343] : memref<2x8x128xf32, #tpu.memory_space<vmem>>, vector<1x8x128xf32>
    %745 = vector.shape_cast %744 : vector<1x8x128xf32> to vector<8x128xf32>
    %746 = vector.shape_cast %743 : vector<8x128xf32> to vector<1x8x128xf32>
    tpu.vector_store %arg10[%c1_341, %c0_342, %c0_343], %746 {strides = array<i32>} : memref<2x8x128xf32, #tpu.memory_space<vmem>>, vector<1x8x128xf32>,
    %c1_344 = arith.constant 1 : index
    %c0_345 = arith.constant 0 : index
    %c0_346 = arith.constant 0 : index
    %747 = vector.load %arg11[%c1_344, %c0_345, %c0_346] : memref<2x8x128xf32, #tpu.memory_space<vmem>>, vector<1x8x128xf32>
    %748 = vector.shape_cast %747 : vector<1x8x128xf32> to vector<8x128xf32>
    %749 = vector.shape_cast %741 : vector<8x128xf32> to vector<1x8x128xf32>
    tpu.vector_store %arg11[%c1_344, %c0_345, %c0_346], %749 {strides = array<i32>} : memref<2x8x128xf32, #tpu.memory_space<vmem>>, vector<1x8x128xf32>,
    %750 = arith.index_cast %c7_i32_328 : i32 to index
    %c0_347 = arith.constant 0 : index
    %c0_348 = arith.constant 0 : index
    %751 = vector.load %arg7[%750, %c0_347, %c0_348] : memref<8x8x128xf32, #tpu.memory_space<vmem>>, vector<1x8x128xf32>
    %752 = vector.shape_cast %751 : vector<1x8x128xf32> to vector<8x128xf32>
    %753 = vector.shape_cast %743 : vector<8x128xf32> to vector<1x8x128xf32>
    tpu.vector_store %arg7[%750, %c0_347, %c0_348], %753 {strides = array<i32>} : memref<8x8x128xf32, #tpu.memory_space<vmem>>, vector<1x8x128xf32>,
    %c8_i32_349 = arith.constant 8 : i32
    %c0_350 = arith.constant 0 : index
    %c0_351 = arith.constant 0 : index
    %c0_352 = arith.constant 0 : index
    %754 = vector.load %arg10[%c0_350, %c0_351, %c0_352] : memref<2x8x128xf32, #tpu.memory_space<vmem>>, vector<2x8x128xf32>
    %c0_353 = arith.constant 0 : index
    %c0_354 = arith.constant 0 : index
    %c0_355 = arith.constant 0 : index
    %755 = vector.load %arg8[%c0_353, %c0_354, %c0_355] : memref<2x8x128xf32, #tpu.memory_space<vmem>>, vector<2x8x128xf32>
    tpu.vector_store %arg8[%c0_353, %c0_354, %c0_355], %754 {strides = array<i32>} : memref<2x8x128xf32, #tpu.memory_space<vmem>>, vector<2x8x128xf32>,
    %c0_356 = arith.constant 0 : index
    %c0_357 = arith.constant 0 : index
    %c0_358 = arith.constant 0 : index
    %756 = vector.load %arg11[%c0_356, %c0_357, %c0_358] : memref<2x8x128xf32, #tpu.memory_space<vmem>>, vector<2x8x128xf32>
    %c0_359 = arith.constant 0 : index
    %c0_360 = arith.constant 0 : index
    %c0_361 = arith.constant 0 : index
    %757 = vector.load %arg9[%c0_359, %c0_360, %c0_361] : memref<2x8x128xf32, #tpu.memory_space<vmem>>, vector<2x8x128xf32>
    tpu.vector_store %arg9[%c0_359, %c0_360, %c0_361], %756 {strides = array<i32>} : memref<2x8x128xf32, #tpu.memory_space<vmem>>, vector<2x8x128xf32>,
    return
  }
  func.func @transform_0(%arg0: i32) -> (i32, i32, i32) {
    %c0_i32 = arith.constant 0 : i32
    %c0_i32_0 = arith.constant 0 : i32
    %c0_i32_1 = arith.constant 0 : i32
    return %arg0, %c0_i32, %c0_i32_0 : i32, i32, i32
  }
  func.func @transform_1(%arg0: i32) -> (i32, i32, i32) {
    %c0_i32 = arith.constant 0 : i32
    %c0_i32_0 = arith.constant 0 : i32
    %c0_i32_1 = arith.constant 0 : i32
    %c0_i32_2 = arith.constant 0 : i32
    return %c0_i32, %c0_i32_0, %c0_i32_1 : i32, i32, i32
  }
  func.func @transform_2(%arg0: i32) -> (i32, i32, i32) {
    %c0_i32 = arith.constant 0 : i32
    %c0_i32_0 = arith.constant 0 : i32
    %c0_i32_1 = arith.constant 0 : i32
    %c0_i32_2 = arith.constant 0 : i32
    return %c0_i32, %c0_i32_0, %c0_i32_1 : i32, i32, i32
  }
  func.func @transform_3(%arg0: i32) -> (i32, i32, i32) {
    %c0_i32 = arith.constant 0 : i32
    %c0_i32_0 = arith.constant 0 : i32
    %c0_i32_1 = arith.constant 0 : i32
    %c0_i32_2 = arith.constant 0 : i32
    return %c0_i32, %c0_i32_0, %c0_i32_1 : i32, i32, i32
  }
  func.func @transform_4(%arg0: i32) -> (i32, i32, i32) {
    %c0_i32 = arith.constant 0 : i32
    %c0_i32_0 = arith.constant 0 : i32
    %c0_i32_1 = arith.constant 0 : i32
    %c0_i32_2 = arith.constant 0 : i32
    return %c0_i32, %c0_i32_0, %c0_i32_1 : i32, i32, i32
  }
  func.func @transform_5(%arg0: i32) -> (i32, i32, i32) {
    %c0_i32 = arith.constant 0 : i32
    %c0_i32_0 = arith.constant 0 : i32
    %c0_i32_1 = arith.constant 0 : i32
    %c0_i32_2 = arith.constant 0 : i32
    return %c0_i32, %c0_i32_0, %c0_i32_1 : i32, i32, i32
  }
  func.func @transform_6(%arg0: i32) -> (i32, i32, i32) {
    %c0_i32 = arith.constant 0 : i32
    %c0_i32_0 = arith.constant 0 : i32
    %c0_i32_1 = arith.constant 0 : i32
    return %arg0, %c0_i32, %c0_i32_0 : i32, i32, i32
  }
  func.func @transform_7(%arg0: i32) -> (i32, i32, i32) {
    %c0_i32 = arith.constant 0 : i32
    %c0_i32_0 = arith.constant 0 : i32
    %c0_i32_1 = arith.constant 0 : i32
    %c0_i32_2 = arith.constant 0 : i32
    return %c0_i32, %c0_i32_0, %c0_i32_1 : i32, i32, i32
  }
  func.func @transform_8(%arg0: i32) -> (i32, i32, i32) {
    %c0_i32 = arith.constant 0 : i32
    %c0_i32_0 = arith.constant 0 : i32
    %c0_i32_1 = arith.constant 0 : i32
    %c0_i32_2 = arith.constant 0 : i32
    return %c0_i32, %c0_i32_0, %c0_i32_1 : i32, i32, i32
  }
}

</mosaic_0001>

<bundles_post_ra>
// kernel: tpu_custom_call.1
= control target key start
LH: loop header
LB: loop body
LE: loop exit
PB: predicated region body
PF: predicated region fallthrough
CT: control target
= control target key end

     0   :  { %14 = vsyncpa [#allocation7], 0  ;;  %s6380_s0 = inlined_call_operand.hbm [shape: f32[8,8,512], index: 0, kind: input, shape index: {}]   ;;  %s6381_s1 = inlined_call_operand.hbm [shape: f32[1,128,512], index: 1, kind: input, shape index: {}]   ;;  %s6382_s2 = inlined_call_operand.hbm [shape: f32[2,128,512], index: 2, kind: input, shape index: {}]   ;;  %s6383_s3 = inlined_call_operand.hbm [shape: f32[2,1,512], index: 3, kind: input, shape index: {}]   ;;  %s6384_s4 = inlined_call_operand.hbm [shape: f32[2,8,128], index: 4, kind: input, shape index: {}]   ;;  %s6385_s5 = inlined_call_operand.vmem [shape: f32[2,8,128], index: 5, kind: input, shape index: {}]   ;;  %s6386_s6 = inlined_call_operand.hbm [shape: f32[8,8,128], index: 6, kind: output, shape index: {0}]   ;;  %s6387_s7 = inlined_call_operand.hbm [shape: f32[2,8,128], index: 7, kind: output, shape index: {1}]   ;;  %s6388_s8 = inlined_call_operand.hbm [shape: f32[2,8,128], index: 8, kind: output, shape index: {2}]  }
   0x1   :  { %15 = vsyncpa [#allocation10], 0 }
   0x2   :  { %16 = vsyncpa [#allocation13], 0 }
   0x3   :  { %17 = vsyncpa [#allocation8], 0 }
   0x4   :  { %18 = vsyncpa [#allocation17], 0  ;;  %s5285_s27 = smov [#allocation9]   ;;  %s5286_s29 = smov [#allocation12]  }
   0x5   :  { %s36_s28 = sshll.u32 %s5285_s27, 4  ;;  %s60_s30 = sshll.u32 %s5286_s29, 4  ;;  %s37_s28 = int_to_ptr.vmem [resolvable:$true] %s36_s28  ;;  %s5345_s30 = int_to_ptr.vmem [resolvable:$true] %s60_s30 }
   0x6   :  { %s5099_s11 = scalar_lea.hbm %s6381_s1, 8192 }
   0x7   :  { %p5100_p0 = scmp.ne.s32.totalorder %s6381_s1, %s5099_s11  ;;  %p5103_p1 = scmp.lt.u32.totalorder %s5099_s11, %s6381_s1 }
   0x9   :  { %p5105_p2 = pnand %p5103_p1, %p5100_p0 }
   0xb   :  { %5108 = shalt.err (!%p5105_p2)
}
   0xc   :  { %s5109_s16 = scalar_lea.vmem %s37_s28, 8192  ;;  %p5114_p4 = scmp.lt.s32.totalorder %s37_s28, %s37_s28 }
   0xd   :  { %p5110_p3 = scmp.ne.s32.totalorder %s37_s28, %s5109_s16  ;;  %p5115_p5 = scmp.lt.s32.totalorder %s5109_s16, %s5109_s16 }
   0xf   :  { %p5116_p6 = por %p5115_p5, %p5114_p4 }
  0x11   :  { %p5117_p7 = pnand %p5116_p6, %p5110_p3 }
  0x13   :  { %5120 = shalt.err (!%p5117_p7)
}
  0x14   :  { %s5287_s17 = smov 512   ;;  %s5288_s18 = smov 32  }
  0x15   :  { %42 = dma.hbm_to_vmem [thread:$0]  %s6381_s1, 8192, %s37_s28, [#allocation10], %s5287_s17, %s5287_s17, %s5288_s18  }
  0x16   :  { %s5121_s23 = scalar_lea.hbm %s6383_s3, 128 }
  0x17   :  { %p5122_p8 = scmp.ne.s32.totalorder %s6383_s3, %s5121_s23  ;;  %p5125_p9 = scmp.lt.u32.totalorder %s5121_s23, %s6383_s3 }
  0x19   :  { %p5127_p10 = pnand %p5125_p9, %p5122_p8 }
  0x1b   :  { %5130 = shalt.err (!%p5127_p10)
}
  0x1c   :  { %s5131_s29 = scalar_lea.vmem %s5345_s30, 128  ;;  %p5136_p12 = scmp.lt.s32.totalorder %s5345_s30, %s5345_s30 }
  0x1d   :  { %p5132_p11 = scmp.ne.s32.totalorder %s5345_s30, %s5131_s29  ;;  %p5137_p13 = scmp.lt.s32.totalorder %s5131_s29, %s5131_s29 }
  0x1f   :  { %p5138_p0 = por %p5137_p13, %p5136_p12 }
  0x21   :  { %p5139_p1 = pnand %p5138_p0, %p5132_p11 }
  0x23   :  { %5142 = shalt.err (!%p5139_p1)
}
  0x24   :  { %s5289_s1 = smov 64   ;;  %s5290_s28 = smov 4  }
  0x25   :  { %66 = dma.hbm_to_vmem [thread:$0]  %s6383_s3, 128, %s5345_s30, [#allocation13], %s5289_s1, %s5289_s1, %s5290_s28  }
  0x26   :  { %s5291_s11 = smov [#allocation6]   ;;  %s5292_s13 = smov [#allocation11]  }
  0x27   :  { %s24_s12 = sshll.u32 %s5291_s11, 4  ;;  %s48_s14 = sshll.u32 %s5292_s13, 4  ;;  %s25_s12 = int_to_ptr.vmem [resolvable:$true] %s24_s12  ;;  %s5379_s14 = int_to_ptr.vmem [resolvable:$true] %s48_s14 }
  0x28   :  { %s5143_s19 = scalar_lea.hbm %s6380_s0, 4096 }
  0x29   :  { %p5144_p2 = scmp.ne.s32.totalorder %s6380_s0, %s5143_s19  ;;  %p5147_p3 = scmp.lt.u32.totalorder %s5143_s19, %s6380_s0 }
  0x2b   :  { %p5149_p4 = pnand %p5147_p3, %p5144_p2 }
  0x2d   :  { %5152 = shalt.err (!%p5149_p4)
}
  0x2e   :  { %s5153_s3 = scalar_lea.vmem %s25_s12, 4096  ;;  %p5158_p6 = scmp.lt.s32.totalorder %s25_s12, %s25_s12 }
  0x2f   :  { %p5154_p5 = scmp.ne.s32.totalorder %s25_s12, %s5153_s3  ;;  %p5159_p7 = scmp.lt.s32.totalorder %s5153_s3, %s5153_s3 }
  0x31   :  { %p5160_p8 = por %p5159_p7, %p5158_p6 }
  0x33   :  { %p5161_p9 = pnand %p5160_p8, %p5154_p5 }
  0x35   :  { %5164 = shalt.err (!%p5161_p9)
}
  0x36   :  { %30 = dma.hbm_to_vmem [thread:$0]  %s6380_s0, 4096, %s25_s12, [#allocation7], %s5287_s17, %s5287_s17, %s5288_s18  }
  0x37   :  { %s5165_s27 = scalar_lea.hbm %s6382_s2, 16384 }
  0x38   :  { %p5166_p10 = scmp.ne.s32.totalorder %s6382_s2, %s5165_s27  ;;  %p5169_p11 = scmp.lt.u32.totalorder %s5165_s27, %s6382_s2 }
  0x3a   :  { %p5171_p12 = pnand %p5169_p11, %p5166_p10 }
  0x3c   :  { %5174 = shalt.err (!%p5171_p12)
}
  0x3d   :  { %s5175_s10 = scalar_lea.vmem %s5379_s14, 16384  ;;  %p5180_p0 = scmp.lt.s32.totalorder %s5379_s14, %s5379_s14 }
  0x3e   :  { %p5176_p13 = scmp.ne.s32.totalorder %s5379_s14, %s5175_s10  ;;  %p5181_p1 = scmp.lt.s32.totalorder %s5175_s10, %s5175_s10 }
  0x40   :  { %p5182_p2 = por %p5181_p1, %p5180_p0 }
  0x42   :  { %p5183_p3 = pnand %p5182_p2, %p5176_p13 }
  0x44   :  { %5186 = shalt.err (!%p5183_p3)
}
  0x45   :  { %54 = dma.hbm_to_vmem [thread:$0]  %s6382_s2, 16384, %s5379_s14, [#allocation10], %s5287_s17, %s5287_s17, %s5288_s18  }
  0x46   :  { %s5293_s12 = smov [#allocation14]   ;;  %s5187_s19 = scalar_lea.hbm %s6384_s4, 256 }
  0x47   :  { %s72_s13 = sshll.u32 %s5293_s12, 4  ;;  %p5188_p4 = scmp.ne.s32.totalorder %s6384_s4, %s5187_s19  ;;  %s73_s13 = int_to_ptr.vmem [resolvable:$true] %s72_s13 }
  0x48   :  { %p5191_p5 = scmp.lt.u32.totalorder %s5187_s19, %s6384_s4 }
  0x4a   :  { %p5193_p6 = pnand %p5191_p5, %p5188_p4 }
  0x4c   :  { %5196 = shalt.err (!%p5193_p6)
}
  0x4d   :  { %s5197_s3 = scalar_lea.vmem %s73_s13, 256  ;;  %p5202_p8 = scmp.lt.s32.totalorder %s73_s13, %s73_s13 }
  0x4e   :  { %p5198_p7 = scmp.ne.s32.totalorder %s73_s13, %s5197_s3  ;;  %p5203_p9 = scmp.lt.s32.totalorder %s5197_s3, %s5197_s3 }
  0x50   :  { %p5204_p10 = por %p5203_p9, %p5202_p8 }
  0x52   :  { %p5205_p11 = pnand %p5204_p10, %p5198_p7 }
  0x54   :  { %5208 = shalt.err (!%p5205_p11)
}
  0x55   :  { %s5294_s2 = smov 128   ;;  %s5295_s17 = smov 8  }
  0x56   :  { %78 = dma.hbm_to_vmem [thread:$0]  %s6384_s4, 256, %s73_s13, [#allocation13], %s5294_s2, %s5294_s2, %s5295_s17  }
  0x57   :  { %5275 = dma.done.wait [#allocation7], 4096  }
  0x58   :  { %5276 = vsyncadd [#allocation7], 4294963200 }
  0x59   :  { %5277 = dma.done.wait [#allocation10], 24576  }
  0x5a   :  { %5278 = vsyncadd [#allocation10], 4294942720 }
  0x5b   :  { %5279 = dma.done.wait [#allocation13], 384  }
  0x5c   :  { %5280 = vsyncadd [#allocation13], 4294966912  ;;  %v5296_v0 = vmov 0.0   ;;  %v110_v1 = vld [vmem:[#allocation11 + $0x8] sm:$0xff]  ;;  %v109_v3 = vld [vmem:[#allocation11] sm:$0xff]  ;;  %s5298_s27 = smov [#allocation15]  }
  0x5d   :  { %268 = vmatprep.mubr.f32.mxu0 %v5296_v0  ;;  %339 = vmatprep.mubr.f32.mxu1 %v5296_v0  ;;  %v114_v2 = vld [vmem:[#allocation11 + $0x28] sm:$0xff]  ;;  %v113_v5 = vld [vmem:[#allocation11 + $0x20] sm:$0xff]  ;;  %v112_v19 = vld [vmem:[#allocation11 + $0x18] sm:$0xff]  ;;  %s3583_s29 = sshll.u32 %s5298_s27, 4  ;;  %s5299_s1 = smov [#allocation18]   ;;  %s6321_s29 = int_to_ptr.vmem [resolvable:$true] %s3583_s29 }
  0x5e   :  { %v5433_v4 = vpack.c.bf16 %v114_v2, %v110_v1  ;;  %v118_v6 = vld [vmem:[#allocation11 + $0x48] sm:$0xff]  ;;  %v5435_v8 = vpack.c.bf16 %v113_v5, %v109_v3  ;;  %v117_v10 = vld [vmem:[#allocation11 + $0x40] sm:$0xff]  ;;  %v116_v20 = vld [vmem:[#allocation11 + $0x38] sm:$0xff]  ;;  %s3607_s28 = sshll.u32 %s5299_s1, 4  ;;  %s6323_s28 = int_to_ptr.vmem [resolvable:$true] %s3607_s28 }
  0x5f   :  { %v122_v7 = vld [vmem:[#allocation11 + $0x68] sm:$0xff]  ;;  %v121_v11 = vld [vmem:[#allocation11 + $0x60] sm:$0xff]  ;;  %v5446_v22 = vpack.c.bf16 %v116_v20, %v112_v19  ;;  %v111_v23 = vld [vmem:[#allocation11 + $0x10] sm:$0xff] }
  0x60   :  { %v5437_v9 = vpack.c.bf16 %v122_v7, %v118_v6  ;;  %v126_v12 = vld [vmem:[#allocation11 + $0x88] sm:$0xff]  ;;  %3677 = vmatprep.subr.bf16.mxu0 %v5433_v4  ;;  %v5441_v14 = vpack.c.bf16 %v121_v11, %v117_v10  ;;  %v125_v15 = vld [vmem:[#allocation11 + $0x80] sm:$0xff]  ;;  %v115_v24 = vld [vmem:[#allocation11 + $0x30] sm:$0xff] }
  0x61   :  { %v130_v13 = vld [vmem:[#allocation11 + $0xa8] sm:$0xff]  ;;  %3679 = vmatpush1.bf16.msra.mxu0 %v5435_v8  ;;  %v129_v16 = vld [vmem:[#allocation11 + $0xa0] sm:$0xff]  ;;  %v5448_v25 = vpack.c.bf16 %v115_v24, %v111_v23  ;;  %3709 = vmatprep.subr.bf16.mxu1 %v5446_v22  ;;  %v120_v27 = vld [vmem:[#allocation11 + $0x58] sm:$0xff] }
  0x62   :  { %3681 = vmatprep.subr.bf16.mxu0 %v5437_v9  ;;  %v5444_v17 = vpack.c.bf16 %v130_v13, %v126_v12  ;;  %v134_v18 = vld [vmem:[#allocation11 + $0xc8] sm:$0xff]  ;;  %v5451_v26 = vpack.c.bf16 %v129_v16, %v125_v15  ;;  %v124_v28 = vld [vmem:[#allocation11 + $0x78] sm:$0xff]  ;;  %v119_v29 = vld [vmem:[#allocation11 + $0x50] sm:$0xff] }
  0x63   :  { %v138_v21 = vld [vmem:[#allocation11 + $0xe8] sm:$0xff]  ;;  %v133_v31 = vld [vmem:[#allocation11 + $0xc0] sm:$0xff]  ;;  %3711 = vmatpush1.bf16.msra.mxu1 %v5448_v25  ;;  %v5458_v33 = vpack.c.bf16 %v124_v28, %v120_v27  ;;  %v123_v34 = vld [vmem:[#allocation11 + $0x70] sm:$0xff] }
  0x64   :  { %v5455_v30 = vpack.c.bf16 %v138_v21, %v134_v18  ;;  %v137_v32 = vld [vmem:[#allocation11 + $0xe0] sm:$0xff]  ;;  %v142_v35 = vld [vmem:[#allocation11 + $0x108] sm:$0xff]  ;;  %v5460_v37 = vpack.c.bf16 %v123_v34, %v119_v29  ;;  %v128_v38 = vld [vmem:[#allocation11 + $0x98] sm:$0xff] }
  0x65   :  { %3683 = vmatpush1.bf16.msra.mxu0 %v5441_v14  ;;  %v146_v36 = vld [vmem:[#allocation11 + $0x128] sm:$0xff]  ;;  %3713 = vmatprep.subr.bf16.mxu1 %v5458_v33  ;;  %v132_v39 = vld [vmem:[#allocation11 + $0xb8] sm:$0xff]  ;;  %v127_v40 = vld [vmem:[#allocation11 + $0x90] sm:$0xff]  ;;  %v5464_v42 = vpack.c.bf16 %v137_v32, %v133_v31 }
  0x66   :  { %3685 = vmatprep.subr.bf16.mxu0 %v5444_v17  ;;  %v131_v41 = vld [vmem:[#allocation11 + $0xb0] sm:$0xff]  ;;  %v141_v43 = vld [vmem:[#allocation11 + $0x100] sm:$0xff]  ;;  %v5466_v45 = vpack.c.bf16 %v132_v39, %v128_v38  ;;  %v5469_v46 = vpack.c.bf16 %v146_v36, %v142_v35  ;;  %v150_v47 = vld [vmem:[#allocation11 + $0x148] sm:$0xff] }
  0x67   :  { %v145_v44 = vld [vmem:[#allocation11 + $0x120] sm:$0xff]  ;;  %3715 = vmatpush1.bf16.msra.mxu1 %v5460_v37  ;;  %v5472_v48 = vpack.c.bf16 %v131_v41, %v127_v40  ;;  %v136_v49 = vld [vmem:[#allocation11 + $0xd8] sm:$0xff]  ;;  %v154_v51 = vld [vmem:[#allocation11 + $0x168] sm:$0xff] }
  0x68   :  { %v140_v50 = vld [vmem:[#allocation11 + $0xf8] sm:$0xff]  ;;  %3717 = vmatprep.subr.bf16.mxu1 %v5466_v45  ;;  %v135_v53 = vld [vmem:[#allocation11 + $0xd0] sm:$0xff]  ;;  %v5478_v55 = vpack.c.bf16 %v145_v44, %v141_v43  ;;  %v5481_v58 = vpack.c.bf16 %v154_v51, %v150_v47  ;;  %v149_v59 = vld [vmem:[#allocation11 + $0x140] sm:$0xff] }
  0x69   :  { %3687 = vmatpush1.bf16.msra.mxu0 %v5451_v26  ;;  %v5475_v52 = vpack.c.bf16 %v140_v50, %v136_v49  ;;  %v139_v54 = vld [vmem:[#allocation11 + $0xf0] sm:$0xff]  ;;  %v144_v56 = vld [vmem:[#allocation11 + $0x118] sm:$0xff]  ;;  %v153_v60 = vld [vmem:[#allocation11 + $0x160] sm:$0xff]  ;;  %v180_v50 = vlaneseq }
  0x6a   :  { %3689 = vmatprep.subr.bf16.mxu0 %v5455_v30  ;;  %v148_v57 = vld [vmem:[#allocation11 + $0x138] sm:$0xff]  ;;  %v158_v61 = vld [vmem:[#allocation11 + $0x188] sm:$0xff]  ;;  %v5484_v62 = vpack.c.bf16 %v139_v54, %v135_v53  ;;  %v143_v2 = vld [vmem:[#allocation11 + $0x110] sm:$0xff]  ;;  %v5490_v7 = vpack.c.bf16 %v153_v60, %v149_v59 }
  0x6b   :  { %3719 = vmatpush1.bf16.msra.mxu1 %v5472_v48  ;;  %v162_v63 = vld [vmem:[#allocation11 + $0x1a8] sm:$0xff]  ;;  %v5487_v1 = vpack.c.bf16 %v148_v57, %v144_v56  ;;  %v147_v3 = vld [vmem:[#allocation11 + $0x130] sm:$0xff]  ;;  %v152_v5 = vld [vmem:[#allocation11 + $0x158] sm:$0xff]  ;;  %v5565_v51 = vshrl.u32 %v180_v50, 7 }
  0x6c   :  { %3721 = vmatprep.subr.bf16.mxu1 %v5475_v52  ;;  %v156_v6 = vld [vmem:[#allocation11 + $0x178] sm:$0xff]  ;;  %v5493_v10 = vpack.c.bf16 %v162_v63, %v158_v61  ;;  %v157_v11 = vld [vmem:[#allocation11 + $0x180] sm:$0xff]  ;;  %v166_v13 = vld [vmem:[#allocation11 + $0x1c8] sm:$0xff]  ;;  %v5496_v15 = vpack.c.bf16 %v147_v3, %v143_v2 }
  0x6d   :  { %3691 = vmatpush1.bf16.msra.mxu0 %v5464_v42  ;;  %v161_v12 = vld [vmem:[#allocation11 + $0x1a0] sm:$0xff]  ;;  %v170_v16 = vld [vmem:[#allocation11 + $0x1e8] sm:$0xff]  ;;  %v5499_v18 = vpack.c.bf16 %v156_v6, %v152_v5  ;;  %v151_v19 = vld [vmem:[#allocation11 + $0x150] sm:$0xff]  ;;  %v182_v53 = vsub.s32 0, %v5565_v51  ;;  %v6391_v56 = vsub.s32 1, %v5565_v51  ;;  %v6390_v63 = vsub.s32 3, %v5565_v51 }
  0x6e   :  { %3693 = vmatprep.subr.bf16.mxu0 %v5469_v46  ;;  %v155_v20 = vld [vmem:[#allocation11 + $0x170] sm:$0xff]  ;;  %v160_v21 = vld [vmem:[#allocation11 + $0x198] sm:$0xff]  ;;  %v5502_v24 = vpack.c.bf16 %v161_v12, %v157_v11  ;;  %v5505_v27 = vpack.c.bf16 %v170_v16, %v166_v13  ;;  %v165_v28 = vld [vmem:[#allocation11 + $0x1c0] sm:$0xff]  ;;  %v6389_v11 = vsub.s32 2, %v5565_v51 }
  0x6f   :  { %3723 = vmatpush1.bf16.msra.mxu1 %v5484_v62  ;;  %v164_v23 = vld [vmem:[#allocation11 + $0x1b8] sm:$0xff]  ;;  %v169_v29 = vld [vmem:[#allocation11 + $0x1e0] sm:$0xff]  ;;  %v5508_v31 = vpack.c.bf16 %v155_v20, %v151_v19  ;;  %v159_v34 = vld [vmem:[#allocation11 + $0x190] sm:$0xff] }
  0x70   :  { %3725 = vmatprep.subr.bf16.mxu1 %v5487_v1  ;;  %v5511_v32 = vpack.c.bf16 %v164_v23, %v160_v21  ;;  %v163_v35 = vld [vmem:[#allocation11 + $0x1b0] sm:$0xff]  ;;  %v168_v36 = vld [vmem:[#allocation11 + $0x1d8] sm:$0xff]  ;;  %v5514_v39 = vpack.c.bf16 %v169_v29, %v165_v28  ;;  %v100_v47 = vld [vmem:[#allocation14] sm:$0xff] }
  0x71   :  { %3695 = vmatpush1.bf16.msra.mxu0 %v5478_v55  ;;  %v172_v38 = vld [vmem:[#allocation11 + $0x1f8] sm:$0xff]  ;;  %v5518_v40 = vpack.c.bf16 %v163_v35, %v159_v34  ;;  %v167_v43 = vld [vmem:[#allocation11 + $0x1d0] sm:$0xff]  ;;  %v108_v54 = vld [vmem:[#allocation12] sm:$0xf] }
  0x72   :  { %3697 = vmatprep.subr.bf16.mxu0 %v5481_v58  ;;  %v5521_v41 = vpack.c.bf16 %v172_v38, %v168_v36  ;;  %v171_v44 = vld [vmem:[#allocation11 + $0x1f0] sm:$0xff]  ;;  %v5571_v57 = vrot.slane %v108_v54, %v182_v53  ;;  %v175_v59 = vld [vmem:[#allocation6] sm:$0xff]  ;;  %v5575_v60 = vrot.slane %v108_v54, %v6391_v56  ;;  %v176_v61 = vld [vmem:[#allocation6 + $0x8] sm:$0xff]  ;;  %v5582_v5 = vrot.slane %v108_v54, %v6390_v63 }
  0x73   :  { %3727 = vmatpush1.bf16.msra.mxu1 %v5496_v15  ;;  %v5525_v49 = vpack.c.bf16 %v171_v44, %v167_v43  ;;  %v178_v12 = vld [vmem:[#allocation6 + $0x18] sm:$0xff]  ;;  %v5588_v28 = vrot.slane %v108_v54, %v6389_v11  ;;  %v177_v29 = vld [vmem:[#allocation6 + $0x10] sm:$0xff] }
  0x74   :  { %3729 = vmatprep.subr.bf16.mxu1 %v5499_v18  ;;  %v200_v2 = vadd.f32 %v5571_v57, %v175_v59  ;;  %v201_v3 = vadd.f32 %v5575_v60, %v176_v61  ;;  %v203_v21 = vadd.f32 %v5582_v5, %v178_v12 }
  0x75   :  { %3699 = vmatpush1.bf16.msra.mxu0 %v5490_v7  ;;  %v202_v38 = vadd.f32 %v5588_v28, %v177_v29 }
  0x76   :  { %3701 = vmatprep.subr.bf16.mxu0 %v5493_v10 }
  0x77   :  { %3731 = vmatpush1.bf16.msra.mxu1 %v5508_v31 }
  0x78   :  { %3733 = vmatprep.subr.bf16.mxu1 %v5511_v32 }
  0x79   :  { %3703 = vmatpush1.bf16.msra.mxu0 %v5502_v24 }
  0x7a   :  { %3705 = vmatprep.subr.bf16.mxu0 %v5505_v27 }
  0x7b   :  { %3735 = vmatpush1.bf16.msra.mxu1 %v5518_v40 }
  0x7c   :  { %3737 = vmatprep.subr.bf16.mxu1 %v5521_v41 }
  0x7d   :  { %3707 = vmatpush1.bf16.msra.mxu0 %v5514_v39 }
  0x7e   :  { %3741 = vmatprep.subr.bf16.mxu0 %v5433_v4 }
  0x7f   :  { %3739 = vmatpush1.bf16.msra.mxu1 %v5525_v49 }
  0x80   :  { %269 = vmatmul.mubr.f32.vlgmr.msra.gmra.mrb[0].mxu0 %v100_v47  ;;  %3773 = vmatprep.subr.bf16.mxu1 %v5446_v22 }
  0x81   :  { %3743 = vmatpush1.bf16.msra.mxu0 %v5435_v8  ;;  %452 = vmatprep.mubr.f32.mxu0 %v5296_v0 }
  0x82   :  { %3745 = vmatprep.subr.bf16.mxu0 %v5437_v9  ;;  %340 = vmatmul.mubr.f32.vlgmr.msra.gmra.mrb[0].mxu1 %v100_v47 }
  0x83   :  { %3775 = vmatpush1.bf16.msra.mxu1 %v5448_v25  ;;  %523 = vmatprep.mubr.f32.mxu1 %v5296_v0 }
  0x84   :  { %3777 = vmatprep.subr.bf16.mxu1 %v5458_v33 }
  0x85   :  { %3747 = vmatpush1.bf16.msra.mxu0 %v5441_v14 }
  0x86   :  { %3749 = vmatprep.subr.bf16.mxu0 %v5444_v17 }
  0x87   :  { %3779 = vmatpush1.bf16.msra.mxu1 %v5460_v37 }
  0x88   :  { %3781 = vmatprep.subr.bf16.mxu1 %v5466_v45 }
  0x89   :  { %3751 = vmatpush1.bf16.msra.mxu0 %v5451_v26 }
  0x8a   :  { %3753 = vmatprep.subr.bf16.mxu0 %v5455_v30 }
  0x8b   :  { %3783 = vmatpush1.bf16.msra.mxu1 %v5472_v48 }
  0x8c   :  { %3785 = vmatprep.subr.bf16.mxu1 %v5475_v52 }
  0x8d   :  { %3755 = vmatpush1.bf16.msra.mxu0 %v5464_v42 }
  0x8e   :  { %3757 = vmatprep.subr.bf16.mxu0 %v5469_v46 }
  0x8f   :  { %3787 = vmatpush1.bf16.msra.mxu1 %v5484_v62 }
  0x90   :  { %3789 = vmatprep.subr.bf16.mxu1 %v5487_v1 }
  0x91   :  { %3759 = vmatpush1.bf16.msra.mxu0 %v5478_v55 }
  0x92   :  { %3761 = vmatprep.subr.bf16.mxu0 %v5481_v58 }
  0x93   :  { %3791 = vmatpush1.bf16.msra.mxu1 %v5496_v15 }
  0x94   :  { %3793 = vmatprep.subr.bf16.mxu1 %v5499_v18 }
  0x95   :  { %3763 = vmatpush1.bf16.msra.mxu0 %v5490_v7 }
  0x96   :  { %3765 = vmatprep.subr.bf16.mxu0 %v5493_v10 }
  0x97   :  { %3795 = vmatpush1.bf16.msra.mxu1 %v5508_v31 }
  0x98   :  { %3797 = vmatprep.subr.bf16.mxu1 %v5511_v32 }
  0x99   :  { %3767 = vmatpush1.bf16.msra.mxu0 %v5502_v24 }
  0x9a   :  { %3769 = vmatprep.subr.bf16.mxu0 %v5505_v27 }
  0x9b   :  { %3799 = vmatpush1.bf16.msra.mxu1 %v5518_v40 }
  0x9c   :  { %3801 = vmatprep.subr.bf16.mxu1 %v5521_v41 }
  0x9d   :  { %3771 = vmatpush1.bf16.msra.mxu0 %v5514_v39 }
  0x9e   :  { %3805 = vmatprep.subr.bf16.mxu0 %v5433_v4 }
  0x9f   :  { %3803 = vmatpush1.bf16.msra.mxu1 %v5525_v49 }
  0xa0   :  { %3837 = vmatprep.subr.bf16.mxu1 %v5446_v22 }
 0x153   :  { %v270_v6 = vpop.f32.mrb[0].mxu0 }
 0x154   :  { %v346_v13 = vadd.f32 %v270_v6, %v200_v2  ;;  %v272_v16 = vpop.f32.mrb[1].mxu0 }
 0x155   :  { %v347_v19 = vadd.f32 %v272_v16, %v201_v3  ;;  %v341_v34 = vpop.f32.mrb[0].mxu1  ;;  %v104_v3 = vld [vmem:[%s6385_s5] sm:$0xff] }
 0x156   :  { %v3628_v20 = vmul.f32 -1.442695, %v346_v13  ;;  %v343_v35 = vpop.f32.mrb[1].mxu1  ;;  %v348_v44 = vadd.f32 %v341_v34, %v202_v38  ;;  %v380_v34 = vld [vmem:[#allocation6 + $0x20] sm:$0xff] }
 0x157   :  { %v3629_v23 = vmul.f32 -1.442695, %v347_v19  ;;  %v349_v36 = vadd.f32 %v343_v35, %v203_v21  ;;  %v381_v35 = vld [vmem:[#allocation6 + $0x28] sm:$0xff] }
 0x158   :  { %4843 = vpow2.f32 %v3628_v20  ;;  %v385_v38 = vadd.f32 %v381_v35, %v5575_v60 }
 0x159   :  { %4845 = vpow2.f32 %v3629_v23  ;;  %v3630_v43 = vmul.f32 -1.442695, %v349_v36  ;;  %v384_v36 = vadd.f32 %v380_v34, %v5571_v57 }
 0x15b   :  { %4847 = vpow2.f32 %v3630_v43 }
 0x15c   :  { %4849 = vtanh.f32 %v348_v44 }
 0x162   :  { %v4844_v47 = vpop.eup %4843 }
 0x163   :  { %v4846_v50 = vpop.eup %4845  ;;  %v353_v59 = vadd.f32 1.0, %v4844_v47 }
 0x164   :  { %v359_v61 = vadd.f32 1.0, %v4846_v50 }
 0x165   :  { %4851 = vrcp.f32 %v353_v59  ;;  %v4848_v54 = vpop.eup %4847  ;;  %v383_v59 = vld [vmem:[#allocation6 + $0x38] sm:$0xff] }
 0x166   :  { %4853 = vrcp.f32 %v359_v61  ;;  %v4850_v2 = vpop.eup %4849  ;;  %v366_v12 = vadd.f32 1.0, %v4848_v54 }
 0x168   :  { %4855 = vrcp.f32 %v366_v12  ;;  %v382_v12 = vld [vmem:[#allocation6 + $0x30] sm:$0xff] }
 0x16f   :  { %v4852_v6 = vpop.eup %4851 }
 0x170   :  { %v4854_v13 = vpop.eup %4853  ;;  %v370_v16 = vmul.f32 %v4852_v6, %v4850_v2  ;;  %v387_v6 = vadd.f32 %v383_v59, %v5582_v5 }
 0x171   :  { %v369_v19 = vmul.f32 %v4854_v13, %v104_v3 }
 0x172   :  { %v4856_v21 = vpop.eup %4855 }
 0x173   :  { %v5594_v20 = vadd.f32 %v370_v16, %v369_v19  ;;  %v386_v16 = vadd.f32 %v382_v12, %v5588_v28  ;;  %v566_v12 = vld [vmem:[#allocation6 + $0x48] sm:$0xff] }
 0x175   :  { %4857 = vtanh.f32 %v5594_v20 }
 0x17f   :  { %v4858_v23 = vpop.eup %4857 }
 0x180   :  { %v5597_v29 = vmul.f32 %v4858_v23, %v4856_v21 }
 0x182   :  { %453 = vmatmul.mubr.f32.vlgmr.msra.gmra.mrb[2].mxu0 %v5597_v29  ;;  %524 = vmatmul.mubr.f32.vlgmr.msra.gmra.mrb[2].mxu1 %v5597_v29 }
 0x183   :  { %3807 = vmatpush1.bf16.msra.mxu0 %v5435_v8  ;;  %3839 = vmatpush1.bf16.msra.mxu1 %v5448_v25 }
 0x184   :  { %3809 = vmatprep.subr.bf16.mxu0 %v5437_v9  ;;  %3841 = vmatprep.subr.bf16.mxu1 %v5458_v33 }
 0x185   :  { %637 = vmatprep.mubr.f32.mxu0 %v5296_v0  ;;  %708 = vmatprep.mubr.f32.mxu1 %v5296_v0 }
 0x187   :  { %3811 = vmatpush1.bf16.msra.mxu0 %v5441_v14  ;;  %3843 = vmatpush1.bf16.msra.mxu1 %v5460_v37 }
 0x188   :  { %3813 = vmatprep.subr.bf16.mxu0 %v5444_v17  ;;  %3845 = vmatprep.subr.bf16.mxu1 %v5466_v45 }
 0x18b   :  { %3815 = vmatpush1.bf16.msra.mxu0 %v5451_v26  ;;  %3847 = vmatpush1.bf16.msra.mxu1 %v5472_v48 }
 0x18c   :  { %3817 = vmatprep.subr.bf16.mxu0 %v5455_v30  ;;  %3849 = vmatprep.subr.bf16.mxu1 %v5475_v52 }
 0x18f   :  { %3819 = vmatpush1.bf16.msra.mxu0 %v5464_v42  ;;  %3851 = vmatpush1.bf16.msra.mxu1 %v5484_v62 }
 0x190   :  { %3821 = vmatprep.subr.bf16.mxu0 %v5469_v46  ;;  %3853 = vmatprep.subr.bf16.mxu1 %v5487_v1 }
 0x193   :  { %3823 = vmatpush1.bf16.msra.mxu0 %v5478_v55  ;;  %3855 = vmatpush1.bf16.msra.mxu1 %v5496_v15 }
 0x194   :  { %3825 = vmatprep.subr.bf16.mxu0 %v5481_v58  ;;  %3857 = vmatprep.subr.bf16.mxu1 %v5499_v18 }
 0x197   :  { %3827 = vmatpush1.bf16.msra.mxu0 %v5490_v7  ;;  %3859 = vmatpush1.bf16.msra.mxu1 %v5508_v31 }
 0x198   :  { %3829 = vmatprep.subr.bf16.mxu0 %v5493_v10  ;;  %3861 = vmatprep.subr.bf16.mxu1 %v5511_v32 }
 0x19b   :  { %3831 = vmatpush1.bf16.msra.mxu0 %v5502_v24  ;;  %3863 = vmatpush1.bf16.msra.mxu1 %v5518_v40 }
 0x19c   :  { %3833 = vmatprep.subr.bf16.mxu0 %v5505_v27  ;;  %3865 = vmatprep.subr.bf16.mxu1 %v5521_v41 }
 0x19f   :  { %3835 = vmatpush1.bf16.msra.mxu0 %v5514_v39  ;;  %3867 = vmatpush1.bf16.msra.mxu1 %v5525_v49 }
 0x1a0   :  { %3869 = vmatprep.subr.bf16.mxu0 %v5433_v4  ;;  %3901 = vmatprep.subr.bf16.mxu1 %v5446_v22 }
 0x255   :  { %v454_v43 = vpop.f32.mrb[2].mxu0  ;;  %v525_v44 = vpop.f32.mrb[2].mxu1 }
 0x256   :  { %v530_v47 = vadd.f32 %v454_v43, %v384_v36  ;;  %v456_v50 = vpop.f32.mrb[3].mxu0  ;;  %v527_v61 = vpop.f32.mrb[3].mxu1  ;;  %v532_v21 = vadd.f32 %v525_v44, %v386_v16  ;;  %v570_v16 = vadd.f32 %v566_v12, %v5575_v60 }
 0x257   :  { %v531_v54 = vadd.f32 %v456_v50, %v385_v38  ;;  %v533_v13 = vadd.f32 %v527_v61, %v387_v6 }
 0x258   :  { %v3631_v2 = vmul.f32 -1.442695, %v530_v47 }
 0x259   :  { %v3632_v3 = vmul.f32 -1.442695, %v531_v54  ;;  %v3633_v19 = vmul.f32 -1.442695, %v533_v13 }
 0x25a   :  { %4859 = vpow2.f32 %v3631_v2 }
 0x25b   :  { %4861 = vpow2.f32 %v3632_v3 }
 0x25c   :  { %4863 = vpow2.f32 %v3633_v19 }
 0x25d   :  { %4865 = vtanh.f32 %v532_v21 }
 0x264   :  { %v4860_v23 = vpop.eup %4859 }
 0x265   :  { %v4862_v34 = vpop.eup %4861  ;;  %v537_v35 = vadd.f32 1.0, %v4860_v23 }
 0x266   :  { %v543_v36 = vadd.f32 1.0, %v4862_v34  ;;  %v4864_v38 = vpop.eup %4863 }
 0x267   :  { %4867 = vrcp.f32 %v537_v35  ;;  %v4866_v43 = vpop.eup %4865  ;;  %v550_v54 = vadd.f32 1.0, %v4864_v38  ;;  %v568_v35 = vld [vmem:[#allocation6 + $0x58] sm:$0xff] }
 0x268   :  { %4869 = vrcp.f32 %v543_v36 }
 0x269   :  { %4871 = vrcp.f32 %v550_v54 }
 0x271   :  { %v4868_v47 = vpop.eup %4867 }
 0x272   :  { %v4870_v50 = vpop.eup %4869  ;;  %v554_v59 = vmul.f32 %v4868_v47, %v4866_v43 }
 0x273   :  { %v553_v61 = vmul.f32 %v4870_v50, %v5594_v20  ;;  %v4872_v44 = vpop.eup %4871  ;;  %v565_v20 = vld [vmem:[#allocation6 + $0x40] sm:$0xff]  ;;  %v572_v50 = vadd.f32 %v568_v35, %v5582_v5 }
 0x274   :  { %v569_v13 = vadd.f32 %v565_v20, %v5571_v57 }
 0x275   :  { %v5640_v2 = vadd.f32 %v554_v59, %v553_v61  ;;  %v567_v59 = vld [vmem:[#allocation6 + $0x50] sm:$0xff] }
 0x276   :  { %v571_v61 = vadd.f32 %v567_v59, %v5588_v28 }
 0x277   :  { %4873 = vtanh.f32 %v5640_v2 }
 0x281   :  { %v4874_v3 = vpop.eup %4873 }
 0x282   :  { %v5643_v6 = vmul.f32 %v4874_v3, %v4872_v44 }
 0x284   :  { %638 = vmatmul.mubr.f32.vlgmr.msra.gmra.mrb[4].mxu0 %v5643_v6  ;;  %709 = vmatmul.mubr.f32.vlgmr.msra.gmra.mrb[4].mxu1 %v5643_v6 }
 0x285   :  { %3871 = vmatpush1.bf16.msra.mxu0 %v5435_v8  ;;  %3903 = vmatpush1.bf16.msra.mxu1 %v5448_v25 }
 0x286   :  { %3873 = vmatprep.subr.bf16.mxu0 %v5437_v9  ;;  %3905 = vmatprep.subr.bf16.mxu1 %v5458_v33 }
 0x287   :  { %822 = vmatprep.mubr.f32.mxu0 %v5296_v0  ;;  %893 = vmatprep.mubr.f32.mxu1 %v5296_v0 }
 0x289   :  { %3875 = vmatpush1.bf16.msra.mxu0 %v5441_v14  ;;  %3907 = vmatpush1.bf16.msra.mxu1 %v5460_v37 }
 0x28a   :  { %3877 = vmatprep.subr.bf16.mxu0 %v5444_v17  ;;  %3909 = vmatprep.subr.bf16.mxu1 %v5466_v45 }
 0x28d   :  { %3879 = vmatpush1.bf16.msra.mxu0 %v5451_v26  ;;  %3911 = vmatpush1.bf16.msra.mxu1 %v5472_v48 }
 0x28e   :  { %3881 = vmatprep.subr.bf16.mxu0 %v5455_v30  ;;  %3913 = vmatprep.subr.bf16.mxu1 %v5475_v52 }
 0x291   :  { %3883 = vmatpush1.bf16.msra.mxu0 %v5464_v42  ;;  %3915 = vmatpush1.bf16.msra.mxu1 %v5484_v62 }
 0x292   :  { %3885 = vmatprep.subr.bf16.mxu0 %v5469_v46  ;;  %3917 = vmatprep.subr.bf16.mxu1 %v5487_v1 }
 0x295   :  { %3887 = vmatpush1.bf16.msra.mxu0 %v5478_v55  ;;  %3919 = vmatpush1.bf16.msra.mxu1 %v5496_v15 }
 0x296   :  { %3889 = vmatprep.subr.bf16.mxu0 %v5481_v58  ;;  %3921 = vmatprep.subr.bf16.mxu1 %v5499_v18 }
 0x299   :  { %3891 = vmatpush1.bf16.msra.mxu0 %v5490_v7  ;;  %3923 = vmatpush1.bf16.msra.mxu1 %v5508_v31 }
 0x29a   :  { %3893 = vmatprep.subr.bf16.mxu0 %v5493_v10  ;;  %3925 = vmatprep.subr.bf16.mxu1 %v5511_v32 }
 0x29d   :  { %3895 = vmatpush1.bf16.msra.mxu0 %v5502_v24  ;;  %3927 = vmatpush1.bf16.msra.mxu1 %v5518_v40 }
 0x29e   :  { %3897 = vmatprep.subr.bf16.mxu0 %v5505_v27  ;;  %3929 = vmatprep.subr.bf16.mxu1 %v5521_v41 }
 0x2a1   :  { %3899 = vmatpush1.bf16.msra.mxu0 %v5514_v39  ;;  %3931 = vmatpush1.bf16.msra.mxu1 %v5525_v49 }
 0x2a2   :  { %3933 = vmatprep.subr.bf16.mxu0 %v5433_v4  ;;  %3965 = vmatprep.subr.bf16.mxu1 %v5446_v22 }
 0x357   :  { %v639_v19 = vpop.f32.mrb[4].mxu0  ;;  %v710_v21 = vpop.f32.mrb[4].mxu1 }
 0x358   :  { %v715_v23 = vadd.f32 %v639_v19, %v569_v13  ;;  %v641_v34 = vpop.f32.mrb[5].mxu0  ;;  %v712_v36 = vpop.f32.mrb[5].mxu1  ;;  %v717_v3 = vadd.f32 %v710_v21, %v571_v61 }
 0x359   :  { %v716_v38 = vadd.f32 %v641_v34, %v570_v16  ;;  %v718_v54 = vadd.f32 %v712_v36, %v572_v50 }
 0x35a   :  { %v3634_v43 = vmul.f32 -1.442695, %v715_v23 }
 0x35b   :  { %v3635_v47 = vmul.f32 -1.442695, %v716_v38  ;;  %v3636_v44 = vmul.f32 -1.442695, %v718_v54 }
 0x35c   :  { %4875 = vpow2.f32 %v3634_v43 }
 0x35d   :  { %4877 = vpow2.f32 %v3635_v47 }
 0x35e   :  { %4879 = vpow2.f32 %v3636_v44 }
 0x35f   :  { %4881 = vtanh.f32 %v717_v3 }
 0x366   :  { %v4876_v20 = vpop.eup %4875 }
 0x367   :  { %v4878_v12 = vpop.eup %4877  ;;  %v722_v11 = vadd.f32 1.0, %v4876_v20 }
 0x368   :  { %v728_v13 = vadd.f32 1.0, %v4878_v12  ;;  %v4880_v16 = vpop.eup %4879  ;;  %v753_v12 = vld [vmem:[#allocation6 + $0x78] sm:$0xff] }
 0x369   :  { %4883 = vrcp.f32 %v722_v11  ;;  %v4882_v19 = vpop.eup %4881  ;;  %v735_v38 = vadd.f32 1.0, %v4880_v16  ;;  %v750_v11 = vld [vmem:[#allocation6 + $0x60] sm:$0xff] }
 0x36a   :  { %4885 = vrcp.f32 %v728_v13  ;;  %v754_v59 = vadd.f32 %v750_v11, %v5571_v57 }
 0x36b   :  { %4887 = vrcp.f32 %v735_v38 }
 0x373   :  { %v4884_v23 = vpop.eup %4883 }
 0x374   :  { %v4886_v34 = vpop.eup %4885  ;;  %v739_v35 = vmul.f32 %v4884_v23, %v4882_v19 }
 0x375   :  { %v738_v36 = vmul.f32 %v4886_v34, %v5640_v2  ;;  %v4888_v21 = vpop.eup %4887  ;;  %v751_v2 = vld [vmem:[#allocation6 + $0x68] sm:$0xff]  ;;  %v757_v34 = vadd.f32 %v753_v12, %v5582_v5 }
 0x376   :  { %v755_v54 = vadd.f32 %v751_v2, %v5575_v60 }
 0x377   :  { %v5686_v43 = vadd.f32 %v739_v35, %v738_v36  ;;  %v752_v35 = vld [vmem:[#allocation6 + $0x70] sm:$0xff] }
 0x378   :  { %v756_v36 = vadd.f32 %v752_v35, %v5588_v28 }
 0x379   :  { %4889 = vtanh.f32 %v5686_v43 }
 0x383   :  { %v4890_v47 = vpop.eup %4889 }
 0x384   :  { %v5689_v50 = vmul.f32 %v4890_v47, %v4888_v21 }
 0x386   :  { %823 = vmatmul.mubr.f32.vlgmr.msra.gmra.mrb[6].mxu0 %v5689_v50  ;;  %894 = vmatmul.mubr.f32.vlgmr.msra.gmra.mrb[6].mxu1 %v5689_v50 }
 0x387   :  { %3935 = vmatpush1.bf16.msra.mxu0 %v5435_v8  ;;  %3967 = vmatpush1.bf16.msra.mxu1 %v5448_v25 }
 0x388   :  { %3937 = vmatprep.subr.bf16.mxu0 %v5437_v9  ;;  %3969 = vmatprep.subr.bf16.mxu1 %v5458_v33 }
 0x389   :  { %1007 = vmatprep.mubr.f32.mxu0 %v5296_v0  ;;  %1078 = vmatprep.mubr.f32.mxu1 %v5296_v0 }
 0x38b   :  { %3939 = vmatpush1.bf16.msra.mxu0 %v5441_v14  ;;  %3971 = vmatpush1.bf16.msra.mxu1 %v5460_v37 }
 0x38c   :  { %3941 = vmatprep.subr.bf16.mxu0 %v5444_v17  ;;  %3973 = vmatprep.subr.bf16.mxu1 %v5466_v45 }
 0x38f   :  { %3943 = vmatpush1.bf16.msra.mxu0 %v5451_v26  ;;  %3975 = vmatpush1.bf16.msra.mxu1 %v5472_v48 }
 0x390   :  { %3945 = vmatprep.subr.bf16.mxu0 %v5455_v30  ;;  %3977 = vmatprep.subr.bf16.mxu1 %v5475_v52 }
 0x393   :  { %3947 = vmatpush1.bf16.msra.mxu0 %v5464_v42  ;;  %3979 = vmatpush1.bf16.msra.mxu1 %v5484_v62 }
 0x394   :  { %3949 = vmatprep.subr.bf16.mxu0 %v5469_v46  ;;  %3981 = vmatprep.subr.bf16.mxu1 %v5487_v1 }
 0x397   :  { %3951 = vmatpush1.bf16.msra.mxu0 %v5478_v55  ;;  %3983 = vmatpush1.bf16.msra.mxu1 %v5496_v15 }
 0x398   :  { %3953 = vmatprep.subr.bf16.mxu0 %v5481_v58  ;;  %3985 = vmatprep.subr.bf16.mxu1 %v5499_v18 }
 0x39b   :  { %3955 = vmatpush1.bf16.msra.mxu0 %v5490_v7  ;;  %3987 = vmatpush1.bf16.msra.mxu1 %v5508_v31 }
 0x39c   :  { %3957 = vmatprep.subr.bf16.mxu0 %v5493_v10  ;;  %3989 = vmatprep.subr.bf16.mxu1 %v5511_v32 }
 0x39f   :  { %3959 = vmatpush1.bf16.msra.mxu0 %v5502_v24  ;;  %3991 = vmatpush1.bf16.msra.mxu1 %v5518_v40 }
 0x3a0   :  { %3961 = vmatprep.subr.bf16.mxu0 %v5505_v27  ;;  %3993 = vmatprep.subr.bf16.mxu1 %v5521_v41 }
 0x3a3   :  { %3963 = vmatpush1.bf16.msra.mxu0 %v5514_v39  ;;  %3995 = vmatpush1.bf16.msra.mxu1 %v5525_v49 }
 0x3a4   :  { %3997 = vmatprep.subr.bf16.mxu0 %v5433_v4  ;;  %4029 = vmatprep.subr.bf16.mxu1 %v5446_v22 }
 0x459   :  { %v824_v61 = vpop.f32.mrb[6].mxu0  ;;  %v895_v44 = vpop.f32.mrb[6].mxu1 }
 0x45a   :  { %v900_v3 = vadd.f32 %v824_v61, %v754_v59  ;;  %v826_v20 = vpop.f32.mrb[7].mxu0  ;;  %v897_v13 = vpop.f32.mrb[7].mxu1  ;;  %v902_v47 = vadd.f32 %v895_v44, %v756_v36 }
 0x45b   :  { %v901_v16 = vadd.f32 %v826_v20, %v755_v54  ;;  %v903_v38 = vadd.f32 %v897_v13, %v757_v34 }
 0x45c   :  { %v3637_v19 = vmul.f32 -1.442695, %v900_v3 }
 0x45d   :  { %v3638_v23 = vmul.f32 -1.442695, %v901_v16  ;;  %v3639_v21 = vmul.f32 -1.442695, %v903_v38 }
 0x45e   :  { %4891 = vpow2.f32 %v3637_v19 }
 0x45f   :  { %4893 = vpow2.f32 %v3638_v23 }
 0x460   :  { %4895 = vpow2.f32 %v3639_v21 }
 0x461   :  { %4897 = vtanh.f32 %v902_v47 }
 0x468   :  { %v4892_v11 = vpop.eup %4891 }
 0x469   :  { %v4894_v2 = vpop.eup %4893  ;;  %v907_v63 = vadd.f32 1.0, %v4892_v11 }
 0x46a   :  { %v913_v59 = vadd.f32 1.0, %v4894_v2  ;;  %v4896_v54 = vpop.eup %4895  ;;  %v938_v2 = vld [vmem:[#allocation6 + $0x98] sm:$0xff] }
 0x46b   :  { %4899 = vrcp.f32 %v907_v63  ;;  %v4898_v61 = vpop.eup %4897  ;;  %v920_v16 = vadd.f32 1.0, %v4896_v54  ;;  %v935_v63 = vld [vmem:[#allocation6 + $0x80] sm:$0xff] }
 0x46c   :  { %4901 = vrcp.f32 %v913_v59  ;;  %v939_v35 = vadd.f32 %v935_v63, %v5571_v57 }
 0x46d   :  { %4903 = vrcp.f32 %v920_v16 }
 0x475   :  { %v4900_v3 = vpop.eup %4899 }
 0x476   :  { %v4902_v20 = vpop.eup %4901  ;;  %v924_v12 = vmul.f32 %v4900_v3, %v4898_v61 }
 0x477   :  { %v923_v13 = vmul.f32 %v4902_v20, %v5686_v43  ;;  %v4904_v44 = vpop.eup %4903  ;;  %v936_v43 = vld [vmem:[#allocation6 + $0x88] sm:$0xff]  ;;  %v942_v20 = vadd.f32 %v938_v2, %v5582_v5 }
 0x478   :  { %v940_v38 = vadd.f32 %v936_v43, %v5575_v60 }
 0x479   :  { %v5732_v19 = vadd.f32 %v924_v12, %v923_v13  ;;  %v937_v12 = vld [vmem:[#allocation6 + $0x90] sm:$0xff] }
 0x47a   :  { %v941_v13 = vadd.f32 %v937_v12, %v5588_v28 }
 0x47b   :  { %4905 = vtanh.f32 %v5732_v19 }
 0x485   :  { %v4906_v23 = vpop.eup %4905 }
 0x486   :  { %v5735_v34 = vmul.f32 %v4906_v23, %v4904_v44 }
 0x488   :  { %1008 = vmatmul.mubr.f32.vlgmr.msra.gmra.mrb[8].mxu0 %v5735_v34  ;;  %1079 = vmatmul.mubr.f32.vlgmr.msra.gmra.mrb[8].mxu1 %v5735_v34 }
 0x489   :  { %3999 = vmatpush1.bf16.msra.mxu0 %v5435_v8  ;;  %4031 = vmatpush1.bf16.msra.mxu1 %v5448_v25 }
 0x48a   :  { %4001 = vmatprep.subr.bf16.mxu0 %v5437_v9  ;;  %4033 = vmatprep.subr.bf16.mxu1 %v5458_v33 }
 0x48b   :  { %1192 = vmatprep.mubr.f32.mxu0 %v5296_v0  ;;  %1263 = vmatprep.mubr.f32.mxu1 %v5296_v0 }
 0x48d   :  { %4003 = vmatpush1.bf16.msra.mxu0 %v5441_v14  ;;  %4035 = vmatpush1.bf16.msra.mxu1 %v5460_v37 }
 0x48e   :  { %4005 = vmatprep.subr.bf16.mxu0 %v5444_v17  ;;  %4037 = vmatprep.subr.bf16.mxu1 %v5466_v45 }
 0x491   :  { %4007 = vmatpush1.bf16.msra.mxu0 %v5451_v26  ;;  %4039 = vmatpush1.bf16.msra.mxu1 %v5472_v48 }
 0x492   :  { %4009 = vmatprep.subr.bf16.mxu0 %v5455_v30  ;;  %4041 = vmatprep.subr.bf16.mxu1 %v5475_v52 }
 0x495   :  { %4011 = vmatpush1.bf16.msra.mxu0 %v5464_v42  ;;  %4043 = vmatpush1.bf16.msra.mxu1 %v5484_v62 }
 0x496   :  { %4013 = vmatprep.subr.bf16.mxu0 %v5469_v46  ;;  %4045 = vmatprep.subr.bf16.mxu1 %v5487_v1 }
 0x499   :  { %4015 = vmatpush1.bf16.msra.mxu0 %v5478_v55  ;;  %4047 = vmatpush1.bf16.msra.mxu1 %v5496_v15 }
 0x49a   :  { %4017 = vmatprep.subr.bf16.mxu0 %v5481_v58  ;;  %4049 = vmatprep.subr.bf16.mxu1 %v5499_v18 }
 0x49d   :  { %4019 = vmatpush1.bf16.msra.mxu0 %v5490_v7  ;;  %4051 = vmatpush1.bf16.msra.mxu1 %v5508_v31 }
 0x49e   :  { %4021 = vmatprep.subr.bf16.mxu0 %v5493_v10  ;;  %4053 = vmatprep.subr.bf16.mxu1 %v5511_v32 }
 0x4a1   :  { %4023 = vmatpush1.bf16.msra.mxu0 %v5502_v24  ;;  %4055 = vmatpush1.bf16.msra.mxu1 %v5518_v40 }
 0x4a2   :  { %4025 = vmatprep.subr.bf16.mxu0 %v5505_v27  ;;  %4057 = vmatprep.subr.bf16.mxu1 %v5521_v41 }
 0x4a5   :  { %4027 = vmatpush1.bf16.msra.mxu0 %v5514_v39  ;;  %4059 = vmatpush1.bf16.msra.mxu1 %v5525_v49 }
 0x4a6   :  { %4061 = vmatprep.subr.bf16.mxu0 %v5433_v4  ;;  %4093 = vmatprep.subr.bf16.mxu1 %v5446_v22 }
 0x55b   :  { %v1009_v36 = vpop.f32.mrb[8].mxu0  ;;  %v1080_v21 = vpop.f32.mrb[8].mxu1 }
 0x55c   :  { %v1085_v47 = vadd.f32 %v1009_v36, %v939_v35  ;;  %v1011_v11 = vpop.f32.mrb[9].mxu0  ;;  %v1082_v59 = vpop.f32.mrb[9].mxu1  ;;  %v1087_v23 = vadd.f32 %v1080_v21, %v941_v13 }
 0x55d   :  { %v1086_v54 = vadd.f32 %v1011_v11, %v940_v38  ;;  %v1088_v16 = vadd.f32 %v1082_v59, %v942_v20 }
 0x55e   :  { %v3640_v61 = vmul.f32 -1.442695, %v1085_v47 }
 0x55f   :  { %v3641_v3 = vmul.f32 -1.442695, %v1086_v54  ;;  %v3642_v44 = vmul.f32 -1.442695, %v1088_v16 }
 0x560   :  { %4907 = vpow2.f32 %v3640_v61 }
 0x561   :  { %4909 = vpow2.f32 %v3641_v3 }
 0x562   :  { %4911 = vpow2.f32 %v3642_v44 }
 0x563   :  { %4913 = vtanh.f32 %v1087_v23 }
 0x56a   :  { %v4908_v63 = vpop.eup %4907 }
 0x56b   :  { %v4910_v43 = vpop.eup %4909  ;;  %v1092_v56 = vadd.f32 1.0, %v4908_v63 }
 0x56c   :  { %v1098_v35 = vadd.f32 1.0, %v4910_v43  ;;  %v4912_v38 = vpop.eup %4911  ;;  %v1123_v43 = vld [vmem:[#allocation6 + $0xb8] sm:$0xff] }
 0x56d   :  { %4915 = vrcp.f32 %v1092_v56  ;;  %v4914_v36 = vpop.eup %4913  ;;  %v1105_v54 = vadd.f32 1.0, %v4912_v38  ;;  %v1120_v56 = vld [vmem:[#allocation6 + $0xa0] sm:$0xff] }
 0x56e   :  { %4917 = vrcp.f32 %v1098_v35  ;;  %v1124_v12 = vadd.f32 %v1120_v56, %v5571_v57 }
 0x56f   :  { %4919 = vrcp.f32 %v1105_v54 }
 0x577   :  { %v4916_v47 = vpop.eup %4915 }
 0x578   :  { %v4918_v11 = vpop.eup %4917  ;;  %v1109_v2 = vmul.f32 %v4916_v47, %v4914_v36 }
 0x579   :  { %v1108_v59 = vmul.f32 %v4918_v11, %v5732_v19  ;;  %v4920_v21 = vpop.eup %4919  ;;  %v1121_v19 = vld [vmem:[#allocation6 + $0xa8] sm:$0xff]  ;;  %v1127_v11 = vadd.f32 %v1123_v43, %v5582_v5 }
 0x57a   :  { %v1125_v16 = vadd.f32 %v1121_v19, %v5575_v60 }
 0x57b   :  { %v5778_v61 = vadd.f32 %v1109_v2, %v1108_v59 }
 0x57d   :  { %4921 = vtanh.f32 %v5778_v61 }
 0x587   :  { %v4922_v3 = vpop.eup %4921 }
 0x588   :  { %v5781_v20 = vmul.f32 %v4922_v3, %v4920_v21 }
 0x58a   :  { %1193 = vmatmul.mubr.f32.vlgmr.msra.gmra.mrb[10].mxu0 %v5781_v20  ;;  %1264 = vmatmul.mubr.f32.vlgmr.msra.gmra.mrb[10].mxu1 %v5781_v20 }
 0x58b   :  { %4063 = vmatpush1.bf16.msra.mxu0 %v5435_v8  ;;  %4095 = vmatpush1.bf16.msra.mxu1 %v5448_v25 }
 0x58c   :  { %4065 = vmatprep.subr.bf16.mxu0 %v5437_v9  ;;  %4097 = vmatprep.subr.bf16.mxu1 %v5458_v33 }
 0x58d   :  { %1377 = vmatprep.mubr.f32.mxu0 %v5296_v0  ;;  %1448 = vmatprep.mubr.f32.mxu1 %v5296_v0 }
 0x58f   :  { %4067 = vmatpush1.bf16.msra.mxu0 %v5441_v14  ;;  %4099 = vmatpush1.bf16.msra.mxu1 %v5460_v37 }
 0x590   :  { %4069 = vmatprep.subr.bf16.mxu0 %v5444_v17  ;;  %4101 = vmatprep.subr.bf16.mxu1 %v5466_v45 }
 0x593   :  { %4071 = vmatpush1.bf16.msra.mxu0 %v5451_v26  ;;  %4103 = vmatpush1.bf16.msra.mxu1 %v5472_v48 }
 0x594   :  { %4073 = vmatprep.subr.bf16.mxu0 %v5455_v30  ;;  %4105 = vmatprep.subr.bf16.mxu1 %v5475_v52 }
 0x597   :  { %4075 = vmatpush1.bf16.msra.mxu0 %v5464_v42  ;;  %4107 = vmatpush1.bf16.msra.mxu1 %v5484_v62 }
 0x598   :  { %4077 = vmatprep.subr.bf16.mxu0 %v5469_v46  ;;  %4109 = vmatprep.subr.bf16.mxu1 %v5487_v1 }
 0x59b   :  { %4079 = vmatpush1.bf16.msra.mxu0 %v5478_v55  ;;  %4111 = vmatpush1.bf16.msra.mxu1 %v5496_v15 }
 0x59c   :  { %4081 = vmatprep.subr.bf16.mxu0 %v5481_v58  ;;  %4113 = vmatprep.subr.bf16.mxu1 %v5499_v18 }
 0x59f   :  { %4083 = vmatpush1.bf16.msra.mxu0 %v5490_v7  ;;  %4115 = vmatpush1.bf16.msra.mxu1 %v5508_v31 }
 0x5a0   :  { %4085 = vmatprep.subr.bf16.mxu0 %v5493_v10  ;;  %4117 = vmatprep.subr.bf16.mxu1 %v5511_v32 }
 0x5a3   :  { %4087 = vmatpush1.bf16.msra.mxu0 %v5502_v24  ;;  %4119 = vmatpush1.bf16.msra.mxu1 %v5518_v40 }
 0x5a4   :  { %4089 = vmatprep.subr.bf16.mxu0 %v5505_v27  ;;  %4121 = vmatprep.subr.bf16.mxu1 %v5521_v41 }
 0x5a7   :  { %4091 = vmatpush1.bf16.msra.mxu0 %v5514_v39  ;;  %4123 = vmatpush1.bf16.msra.mxu1 %v5525_v49 }
 0x5a8   :  { %4125 = vmatprep.subr.bf16.mxu0 %v5433_v4  ;;  %4157 = vmatprep.subr.bf16.mxu1 %v5446_v22  ;;  %v1122_v4 = vld [vmem:[#allocation6 + $0xb0] sm:$0xff] }
 0x5a9   :  { %v1126_v2 = vadd.f32 %v1122_v4, %v5588_v28 }
 0x65d   :  { %v1194_v13 = vpop.f32.mrb[10].mxu0  ;;  %v1265_v44 = vpop.f32.mrb[10].mxu1 }
 0x65e   :  { %v1270_v23 = vadd.f32 %v1194_v13, %v1124_v12  ;;  %v1196_v63 = vpop.f32.mrb[11].mxu0  ;;  %v1267_v35 = vpop.f32.mrb[11].mxu1  ;;  %v1272_v59 = vadd.f32 %v1265_v44, %v1126_v2 }
 0x65f   :  { %v1271_v38 = vadd.f32 %v1196_v63, %v1125_v16  ;;  %v1273_v22 = vadd.f32 %v1267_v35, %v1127_v11 }
 0x660   :  { %v3643_v36 = vmul.f32 -1.442695, %v1270_v23 }
 0x661   :  { %v3644_v47 = vmul.f32 -1.442695, %v1271_v38  ;;  %v3645_v54 = vmul.f32 -1.442695, %v1273_v22 }
 0x662   :  { %4923 = vpow2.f32 %v3643_v36 }
 0x663   :  { %4925 = vpow2.f32 %v3644_v47 }
 0x664   :  { %4927 = vpow2.f32 %v3645_v54 }
 0x665   :  { %4929 = vtanh.f32 %v1272_v59 }
 0x66c   :  { %v4924_v21 = vpop.eup %4923 }
 0x66d   :  { %v4926_v3 = vpop.eup %4925  ;;  %v1277_v56 = vadd.f32 1.0, %v4924_v21  ;;  %v1680_v21 = vld [vmem:[#allocation9] sm:$0xff] }
 0x66e   :  { %v1283_v19 = vadd.f32 1.0, %v4926_v3  ;;  %v4928_v12 = vpop.eup %4927  ;;  %v1684_v3 = vld [vmem:[#allocation9 + $0x20] sm:$0xff] }
 0x66f   :  { %4931 = vrcp.f32 %v1277_v56  ;;  %v4930_v16 = vpop.eup %4929  ;;  %v1290_v43 = vadd.f32 1.0, %v4928_v12  ;;  %v1682_v56 = vld [vmem:[#allocation9 + $0x10] sm:$0xff]  ;;  %v1689_v12 = vld [vmem:[#allocation9 + $0x48] sm:$0xff] }
 0x670   :  { %4933 = vrcp.f32 %v1283_v19  ;;  %v1686_v19 = vld [vmem:[#allocation9 + $0x30] sm:$0xff] }
 0x671   :  { %4935 = vrcp.f32 %v1290_v43 }
 0x679   :  { %v4932_v13 = vpop.eup %4931 }
 0x67a   :  { %v4934_v23 = vpop.eup %4933  ;;  %v1294_v63 = vmul.f32 %v4932_v13, %v4930_v16  ;;  %v1693_v16 = vld [vmem:[#allocation9 + $0x68] sm:$0xff]  ;;  %v1691_v13 = vld [vmem:[#allocation9 + $0x58] sm:$0xff] }
 0x67b   :  { %v1293_v35 = vmul.f32 %v4934_v23, %v5778_v61  ;;  %v4936_v44 = vpop.eup %4935  ;;  %v1695_v23 = vld [vmem:[#allocation9 + $0x78] sm:$0xff] }
 0x67d   :  { %v5824_v38 = vadd.f32 %v1294_v63, %v1293_v35  ;;  %v4190_v35 = vpack.c.bf16 %v1684_v3, %v1680_v21  ;;  %v1716_v21 = vld [vmem:[#allocation9 + $0x120] sm:$0xff] }
 0x67f   :  { %4937 = vtanh.f32 %v5824_v38 }
 0x689   :  { %v4938_v36 = vpop.eup %4937 }
 0x68a   :  { %v5827_v47 = vmul.f32 %v4938_v36, %v4936_v44  ;;  %v4222_v44 = vpack.c.bf16 %v1686_v19, %v1682_v56  ;;  %v1688_v36 = vld [vmem:[#allocation9 + $0x40] sm:$0xff]  ;;  %v1714_v19 = vld [vmem:[#allocation9 + $0x110] sm:$0xff] }
 0x68c   :  { %1378 = vmatmul.mubr.f32.vlgmr.msra.gmra.mrb[12].mxu0 %v5827_v47  ;;  %1449 = vmatmul.mubr.f32.vlgmr.msra.gmra.mrb[12].mxu1 %v5827_v47 }
 0x68d   :  { %4127 = vmatpush1.bf16.msra.mxu0 %v5435_v8  ;;  %4159 = vmatpush1.bf16.msra.mxu1 %v5448_v25  ;;  %v1681_v8 = vld [vmem:[#allocation9 + $0x8] sm:$0xff]  ;;  %v1687_v25 = vld [vmem:[#allocation9 + $0x38] sm:$0xff] }
 0x68e   :  { %4129 = vmatprep.subr.bf16.mxu0 %v5437_v9  ;;  %4161 = vmatprep.subr.bf16.mxu1 %v5458_v33  ;;  %v1685_v9 = vld [vmem:[#allocation9 + $0x28] sm:$0xff] }
 0x68f   :  { %1562 = vmatprep.mubr.f32.mxu0 %v5296_v0  ;;  %1633 = vmatprep.mubr.f32.mxu1 %v5296_v0  ;;  %v1306_v33 = vld [vmem:[#allocation6 + $0xc8] sm:$0xff] }
 0x691   :  { %4131 = vmatpush1.bf16.msra.mxu0 %v5441_v14  ;;  %4163 = vmatpush1.bf16.msra.mxu1 %v5460_v37  ;;  %v1683_v14 = vld [vmem:[#allocation9 + $0x18] sm:$0xff] }
 0x692   :  { %4133 = vmatprep.subr.bf16.mxu0 %v5444_v17  ;;  %4165 = vmatprep.subr.bf16.mxu1 %v5466_v45  ;;  %v4188_v17 = vpack.c.bf16 %v1685_v9, %v1681_v8  ;;  %v1692_v8 = vld [vmem:[#allocation9 + $0x60] sm:$0xff]  ;;  %v4192_v9 = vpack.c.bf16 %v1693_v16, %v1689_v12  ;;  %v1718_v12 = vld [vmem:[#allocation9 + $0x130] sm:$0xff]  ;;  %v1721_v16 = vld [vmem:[#allocation9 + $0x148] sm:$0xff] }
 0x695   :  { %4135 = vmatpush1.bf16.msra.mxu0 %v5451_v26  ;;  %4167 = vmatpush1.bf16.msra.mxu1 %v5472_v48  ;;  %v4220_v26 = vpack.c.bf16 %v1687_v25, %v1683_v14  ;;  %v4224_v14 = vpack.c.bf16 %v1695_v23, %v1691_v13  ;;  %v1694_v25 = vld [vmem:[#allocation9 + $0x70] sm:$0xff]  ;;  %v1725_v13 = vld [vmem:[#allocation9 + $0x168] sm:$0xff]  ;;  %v1723_v23 = vld [vmem:[#allocation9 + $0x158] sm:$0xff] }
 0x696   :  { %4137 = vmatprep.subr.bf16.mxu0 %v5455_v30  ;;  %4169 = vmatprep.subr.bf16.mxu1 %v5475_v52  ;;  %v1305_v30 = vld [vmem:[#allocation6 + $0xc0] sm:$0xff] }
 0x697   :  { %v1309_v37 = vadd.f32 %v1305_v30, %v5571_v57  ;;  %v1701_v30 = vld [vmem:[#allocation9 + $0xa8] sm:$0xff] }
 0x699   :  { %4139 = vmatpush1.bf16.msra.mxu0 %v5464_v42  ;;  %4171 = vmatpush1.bf16.msra.mxu1 %v5484_v62  ;;  %v1310_v42 = vadd.f32 %v1306_v33, %v5575_v60  ;;  %v1699_v33 = vld [vmem:[#allocation9 + $0x98] sm:$0xff] }
 0x69a   :  { %4141 = vmatprep.subr.bf16.mxu0 %v5469_v46  ;;  %4173 = vmatprep.subr.bf16.mxu1 %v5487_v1 }
 0x69d   :  { %4143 = vmatpush1.bf16.msra.mxu0 %v5478_v55  ;;  %4175 = vmatpush1.bf16.msra.mxu1 %v5496_v15  ;;  %v1308_v55 = vld [vmem:[#allocation6 + $0xd8] sm:$0xff]  ;;  %v1307_v15 = vld [vmem:[#allocation6 + $0xd0] sm:$0xff] }
 0x69e   :  { %4145 = vmatprep.subr.bf16.mxu0 %v5481_v58  ;;  %4177 = vmatprep.subr.bf16.mxu1 %v5499_v18 }
 0x6a1   :  { %4147 = vmatpush1.bf16.msra.mxu0 %v5490_v7  ;;  %4179 = vmatpush1.bf16.msra.mxu1 %v5508_v31 }
 0x6a2   :  { %4149 = vmatprep.subr.bf16.mxu0 %v5493_v10  ;;  %4181 = vmatprep.subr.bf16.mxu1 %v5511_v32  ;;  %v1312_v10 = vadd.f32 %v1308_v55, %v5582_v5 }
 0x6a5   :  { %4151 = vmatpush1.bf16.msra.mxu0 %v5502_v24  ;;  %4183 = vmatpush1.bf16.msra.mxu1 %v5518_v40  ;;  %v1311_v24 = vadd.f32 %v1307_v15, %v5588_v28  ;;  %v1711_v15 = vld [vmem:[#allocation9 + $0xf8] sm:$0xff] }
 0x6a6   :  { %4153 = vmatprep.subr.bf16.mxu0 %v5505_v27  ;;  %4185 = vmatprep.subr.bf16.mxu1 %v5521_v41 }
 0x6a9   :  { %4155 = vmatpush1.bf16.msra.mxu0 %v5514_v39  ;;  %4187 = vmatpush1.bf16.msra.mxu1 %v5525_v49 }
 0x6aa   :  { %4189 = vmatprep.subr.bf16.mxu0 %v4188_v17  ;;  %4221 = vmatprep.subr.bf16.mxu1 %v4220_v26  ;;  %v1690_v17 = vld [vmem:[#allocation9 + $0x50] sm:$0xff]  ;;  %v1697_v26 = vld [vmem:[#allocation9 + $0x88] sm:$0xff] }
 0x75f   :  { %v1379_v45 = vpop.f32.mrb[12].mxu0  ;;  %v1450_v46 = vpop.f32.mrb[12].mxu1 }
 0x760   :  { %v1455_v48 = vadd.f32 %v1379_v45, %v1309_v37  ;;  %v1381_v52 = vpop.f32.mrb[13].mxu0  ;;  %v1452_v58 = vpop.f32.mrb[13].mxu1  ;;  %v1457_v31 = vadd.f32 %v1450_v46, %v1311_v24  ;;  %v1703_v37 = vld [vmem:[#allocation9 + $0xb8] sm:$0xff]  ;;  %v4226_v45 = vpack.c.bf16 %v1694_v25, %v1690_v17  ;;  %v1696_v46 = vld [vmem:[#allocation9 + $0x80] sm:$0xff]  ;;  %v1726_v17 = vld [vmem:[#allocation9 + $0x170] sm:$0xff] }
 0x761   :  { %v1456_v62 = vadd.f32 %v1381_v52, %v1310_v42  ;;  %v1458_v18 = vadd.f32 %v1452_v58, %v1312_v10  ;;  %v4194_v42 = vpack.c.bf16 %v1692_v8, %v1688_v36  ;;  %v4196_v52 = vpack.c.bf16 %v1701_v30, %v1697_v26  ;;  %v1698_v58 = vld [vmem:[#allocation9 + $0x90] sm:$0xff]  ;;  %v1707_v10 = vld [vmem:[#allocation9 + $0xd8] sm:$0xff]  ;;  %v1724_v36 = vld [vmem:[#allocation9 + $0x160] sm:$0xff] }
 0x762   :  { %v3646_v1 = vmul.f32 -1.442695, %v1455_v48  ;;  %v1700_v48 = vld [vmem:[#allocation9 + $0xa0] sm:$0xff]  ;;  %v4228_v55 = vpack.c.bf16 %v1703_v37, %v1699_v33  ;;  %v4208_v8 = vpack.c.bf16 %v1725_v13, %v1721_v16  ;;  %v1729_v25 = vld [vmem:[#allocation9 + $0x188] sm:$0xff]  ;;  %v1731_v30 = vld [vmem:[#allocation9 + $0x198] sm:$0xff] }
 0x763   :  { %v3647_v7 = vmul.f32 -1.442695, %v1456_v62  ;;  %v3648_v27 = vmul.f32 -1.442695, %v1458_v18  ;;  %v1702_v62 = vld [vmem:[#allocation9 + $0xb0] sm:$0xff]  ;;  %v4198_v18 = vpack.c.bf16 %v1700_v48, %v1696_v46  ;;  %v1733_v26 = vld [vmem:[#allocation9 + $0x1a8] sm:$0xff] }
 0x764   :  { %4939 = vpow2.f32 %v3646_v1  ;;  %v1705_v1 = vld [vmem:[#allocation9 + $0xc8] sm:$0xff]  ;;  %v4230_v24 = vpack.c.bf16 %v1702_v62, %v1698_v58  ;;  %v1735_v33 = vld [vmem:[#allocation9 + $0x1b8] sm:$0xff]  ;;  %v1732_v46 = vld [vmem:[#allocation9 + $0x1a0] sm:$0xff]  ;;  %v4212_v48 = vpack.c.bf16 %v1733_v26, %v1729_v25 }
 0x765   :  { %4941 = vpow2.f32 %v3647_v7  ;;  %v1709_v7 = vld [vmem:[#allocation9 + $0xe8] sm:$0xff]  ;;  %v1734_v58 = vld [vmem:[#allocation9 + $0x1b0] sm:$0xff]  ;;  %v2020_v16 = vld [vmem:[#allocation11 + $0x278] sm:$0xff] }
 0x766   :  { %4943 = vpow2.f32 %v3648_v27  ;;  %v1704_v27 = vld [vmem:[#allocation9 + $0xc0] sm:$0xff]  ;;  %v1737_v62 = vld [vmem:[#allocation9 + $0x1c8] sm:$0xff]  ;;  %v2028_v25 = vld [vmem:[#allocation11 + $0x2b8] sm:$0xff] }
 0x767   :  { %4945 = vtanh.f32 %v1457_v31  ;;  %v1708_v31 = vld [vmem:[#allocation9 + $0xe0] sm:$0xff] }
 0x76e   :  { %v4940_v32 = vpop.eup %4939 }
 0x76f   :  { %v4942_v39 = vpop.eup %4941  ;;  %v1462_v40 = vadd.f32 1.0, %v4940_v32  ;;  %v4200_v32 = vpack.c.bf16 %v1709_v7, %v1705_v1  ;;  %v1741_v1 = vld [vmem:[#allocation9 + $0x1e8] sm:$0xff]  ;;  %v1739_v7 = vld [vmem:[#allocation9 + $0x1d8] sm:$0xff] }
 0x770   :  { %v1468_v41 = vadd.f32 1.0, %v4942_v39  ;;  %v4944_v49 = vpop.eup %4943  ;;  %v4232_v39 = vpack.c.bf16 %v1711_v15, %v1707_v10  ;;  %v1743_v10 = vld [vmem:[#allocation9 + $0x1f8] sm:$0xff] }
 0x771   :  { %4947 = vrcp.f32 %v1462_v40  ;;  %v4946_v61 = vpop.eup %4945  ;;  %v1475_v2 = vadd.f32 1.0, %v4944_v49  ;;  %v1706_v40 = vld [vmem:[#allocation9 + $0xd0] sm:$0xff]  ;;  %v1713_v49 = vld [vmem:[#allocation9 + $0x108] sm:$0xff] }
 0x772   :  { %4949 = vrcp.f32 %v1468_v41  ;;  %v1710_v41 = vld [vmem:[#allocation9 + $0xf0] sm:$0xff] }
 0x773   :  { %4951 = vrcp.f32 %v1475_v2  ;;  %v4234_v2 = vpack.c.bf16 %v1710_v41, %v1706_v40  ;;  %v1742_v40 = vld [vmem:[#allocation9 + $0x1f0] sm:$0xff] }
 0x77b   :  { %v4948_v11 = vpop.eup %4947 }
 0x77c   :  { %v4950_v4 = vpop.eup %4949  ;;  %v1479_v22 = vmul.f32 %v4948_v11, %v4946_v61  ;;  %v1717_v61 = vld [vmem:[#allocation9 + $0x128] sm:$0xff]  ;;  %v1715_v11 = vld [vmem:[#allocation9 + $0x118] sm:$0xff] }
 0x77d   :  { %v1478_v54 = vmul.f32 %v4950_v4, %v5824_v38  ;;  %v4952_v63 = vpop.eup %4951  ;;  %v1719_v4 = vld [vmem:[#allocation9 + $0x138] sm:$0xff]  ;;  %v4204_v3 = vpack.c.bf16 %v1717_v61, %v1713_v49  ;;  %v2009_v61 = vld [vmem:[#allocation11 + $0x220] sm:$0xff] }
 0x77e   :  { %v4236_v56 = vpack.c.bf16 %v1719_v4, %v1715_v11 }
 0x77f   :  { %v5868_v59 = vadd.f32 %v1479_v22, %v1478_v54  ;;  %v4202_v22 = vpack.c.bf16 %v1708_v31, %v1704_v27  ;;  %v1712_v54 = vld [vmem:[#allocation9 + $0x100] sm:$0xff]  ;;  %v4216_v27 = vpack.c.bf16 %v1741_v1, %v1737_v62  ;;  %v4248_v31 = vpack.c.bf16 %v1743_v10, %v1739_v7  ;;  %v2036_v62 = vld [vmem:[#allocation11 + $0x2f8] sm:$0xff]  ;;  %v2031_v10 = vld [vmem:[#allocation11 + $0x2d0] sm:$0xff] }
 0x781   :  { %4953 = vtanh.f32 %v5868_v59 }
 0x78b   :  { %v4954_v43 = vpop.eup %4953 }
 0x78c   :  { %v5871_v38 = vmul.f32 %v4954_v43, %v4952_v63  ;;  %v1727_v63 = vld [vmem:[#allocation9 + $0x178] sm:$0xff]  ;;  %v4206_v43 = vpack.c.bf16 %v1716_v21, %v1712_v54  ;;  %v2014_v54 = vld [vmem:[#allocation11 + $0x248] sm:$0xff] }
 0x78d   :  { %v2018_v21 = vld [vmem:[#allocation11 + $0x268] sm:$0xff] }
 0x78e   :  { %1563 = vmatmul.mubr.f32.vlgmr.msra.gmra.mrb[14].mxu0 %v5871_v38  ;;  %1634 = vmatmul.mubr.f32.vlgmr.msra.gmra.mrb[14].mxu1 %v5871_v38 }
 0x78f   :  { %4191 = vmatpush1.bf16.msra.mxu0 %v4190_v35  ;;  %4223 = vmatpush1.bf16.msra.mxu1 %v4222_v44  ;;  %v4238_v35 = vpack.c.bf16 %v1718_v12, %v1714_v19  ;;  %v1720_v44 = vld [vmem:[#allocation9 + $0x140] sm:$0xff] }
 0x790   :  { %4193 = vmatprep.subr.bf16.mxu0 %v4192_v9  ;;  %4225 = vmatprep.subr.bf16.mxu1 %v4224_v14  ;;  %v4240_v9 = vpack.c.bf16 %v1727_v63, %v1723_v23  ;;  %v1722_v14 = vld [vmem:[#allocation9 + $0x150] sm:$0xff]  ;;  %v4210_v37 = vpack.c.bf16 %v1724_v36, %v1720_v44  ;;  %v2013_v19 = vld [vmem:[#allocation11 + $0x240] sm:$0xff]  ;;  %v2022_v44 = vld [vmem:[#allocation11 + $0x288] sm:$0xff] }
 0x791   :  { %1808 = vmatprep.mubr.f32.mxu0 %v5296_v0  ;;  %1921 = vmatprep.mubr.f32.mxu1 %v5296_v0  ;;  %v2017_v12 = vld [vmem:[#allocation11 + $0x260] sm:$0xff]  ;;  %v2015_v63 = vld [vmem:[#allocation11 + $0x250] sm:$0xff]  ;;  %v2026_v36 = vld [vmem:[#allocation11 + $0x2a8] sm:$0xff] }
 0x792   :  { %v5919_v13 = vpack.c.bf16 %v2017_v12, %v2013_v19  ;;  %v2047_v19 = vld [vmem:[#allocation11 + $0x350] sm:$0xff] }
 0x793   :  { %4195 = vmatpush1.bf16.msra.mxu0 %v4194_v42  ;;  %4227 = vmatpush1.bf16.msra.mxu1 %v4226_v45  ;;  %v4242_v42 = vpack.c.bf16 %v1726_v17, %v1722_v14  ;;  %v1728_v45 = vld [vmem:[#allocation9 + $0x180] sm:$0xff]  ;;  %v2051_v12 = vld [vmem:[#allocation11 + $0x370] sm:$0xff] }
 0x794   :  { %4197 = vmatprep.subr.bf16.mxu0 %v4196_v52  ;;  %4229 = vmatprep.subr.bf16.mxu1 %v4228_v55  ;;  %v4244_v52 = vpack.c.bf16 %v1735_v33, %v1731_v30  ;;  %v1730_v55 = vld [vmem:[#allocation9 + $0x190] sm:$0xff]  ;;  %v4214_v15 = vpack.c.bf16 %v1732_v46, %v1728_v45  ;;  %v2021_v14 = vld [vmem:[#allocation11 + $0x280] sm:$0xff]  ;;  %v2030_v45 = vld [vmem:[#allocation11 + $0x2c8] sm:$0xff] }
 0x795   :  { %v2025_v17 = vld [vmem:[#allocation11 + $0x2a0] sm:$0xff]  ;;  %v2023_v33 = vld [vmem:[#allocation11 + $0x290] sm:$0xff]  ;;  %v2034_v46 = vld [vmem:[#allocation11 + $0x2e8] sm:$0xff] }
 0x796   :  { %v5931_v26 = vpack.c.bf16 %v2025_v17, %v2021_v14  ;;  %v2057_v17 = vld [vmem:[#allocation11 + $0x3a0] sm:$0xff] }
 0x797   :  { %4199 = vmatpush1.bf16.msra.mxu0 %v4198_v18  ;;  %4231 = vmatpush1.bf16.msra.mxu1 %v4230_v24  ;;  %v4246_v18 = vpack.c.bf16 %v1734_v58, %v1730_v55  ;;  %v1736_v24 = vld [vmem:[#allocation9 + $0x1c0] sm:$0xff] }
 0x798   :  { %4201 = vmatprep.subr.bf16.mxu0 %v4200_v32  ;;  %4233 = vmatprep.subr.bf16.mxu1 %v4232_v39  ;;  %v1740_v32 = vld [vmem:[#allocation9 + $0x1e0] sm:$0xff]  ;;  %v1738_v39 = vld [vmem:[#allocation9 + $0x1d0] sm:$0xff] }
 0x799   :  { %v4218_v41 = vpack.c.bf16 %v1740_v32, %v1736_v24  ;;  %v4250_v49 = vpack.c.bf16 %v1742_v40, %v1738_v39  ;;  %v2029_v55 = vld [vmem:[#allocation11 + $0x2c0] sm:$0xff] }
 0x79a   :  { %v2033_v58 = vld [vmem:[#allocation11 + $0x2e0] sm:$0xff] }
 0x79b   :  { %4203 = vmatpush1.bf16.msra.mxu0 %v4202_v22  ;;  %4235 = vmatpush1.bf16.msra.mxu1 %v4234_v2  ;;  %v2007_v22 = vld [vmem:[#allocation11 + $0x210] sm:$0xff]  ;;  %v5943_v1 = vpack.c.bf16 %v2033_v58, %v2029_v55  ;;  %v2041_v32 = vld [vmem:[#allocation11 + $0x320] sm:$0xff]  ;;  %v2066_v55 = vld [vmem:[#allocation11 + $0x3e8] sm:$0xff] }
 0x79c   :  { %4205 = vmatprep.subr.bf16.mxu0 %v4204_v3  ;;  %4237 = vmatprep.subr.bf16.mxu1 %v4236_v56  ;;  %v2011_v2 = vld [vmem:[#allocation11 + $0x230] sm:$0xff]  ;;  %v2016_v3 = vld [vmem:[#allocation11 + $0x258] sm:$0xff]  ;;  %v5917_v56 = vpack.c.bf16 %v2018_v21, %v2014_v54  ;;  %v2049_v54 = vld [vmem:[#allocation11 + $0x360] sm:$0xff] }
 0x79d   :  { %v5921_v23 = vpack.c.bf16 %v2020_v16, %v2016_v3  ;;  %v2048_v21 = vld [vmem:[#allocation11 + $0x358] sm:$0xff] }
 0x79e   :  { %v2052_v3 = vld [vmem:[#allocation11 + $0x378] sm:$0xff] }
 0x79f   :  { %4207 = vmatpush1.bf16.msra.mxu0 %v4206_v43  ;;  %4239 = vmatpush1.bf16.msra.mxu1 %v4238_v35  ;;  %v2019_v43 = vld [vmem:[#allocation11 + $0x270] sm:$0xff] }
 0x7a0   :  { %4209 = vmatprep.subr.bf16.mxu0 %v4208_v8  ;;  %4241 = vmatprep.subr.bf16.mxu1 %v4240_v9  ;;  %v5924_v35 = vpack.c.bf16 %v2019_v43, %v2015_v63  ;;  %v2024_v8 = vld [vmem:[#allocation11 + $0x298] sm:$0xff]  ;;  %v5929_v9 = vpack.c.bf16 %v2026_v36, %v2022_v44  ;;  %v5968_v63 = vpack.c.bf16 %v2052_v3, %v2048_v21  ;;  %v2054_v43 = vld [vmem:[#allocation11 + $0x388] sm:$0xff]  ;;  %v2053_v36 = vld [vmem:[#allocation11 + $0x380] sm:$0xff] }
 0x7a1   :  { %v5933_v30 = vpack.c.bf16 %v2028_v25, %v2024_v8  ;;  %v2058_v44 = vld [vmem:[#allocation11 + $0x3a8] sm:$0xff]  ;;  %v5972_v8 = vpack.c.bf16 %v2051_v12, %v2047_v19  ;;  %v2056_v25 = vld [vmem:[#allocation11 + $0x398] sm:$0xff]  ;;  %v5980_v58 = vpack.c.bf16 %v2057_v17, %v2053_v36 }
 0x7a2   :  { %v5974_v14 = vpack.c.bf16 %v2058_v44, %v2054_v43  ;;  %v1493_v43 = vld [vmem:[#allocation6 + $0xf8] sm:$0xff] }
 0x7a3   :  { %4211 = vmatpush1.bf16.msra.mxu0 %v4210_v37  ;;  %4243 = vmatpush1.bf16.msra.mxu1 %v4242_v42  ;;  %v2027_v37 = vld [vmem:[#allocation11 + $0x2b0] sm:$0xff] }
 0x7a4   :  { %4213 = vmatprep.subr.bf16.mxu0 %v4212_v48  ;;  %4245 = vmatprep.subr.bf16.mxu1 %v4244_v52  ;;  %v5936_v42 = vpack.c.bf16 %v2027_v37, %v2023_v33  ;;  %v2032_v48 = vld [vmem:[#allocation11 + $0x2d8] sm:$0xff]  ;;  %v5941_v52 = vpack.c.bf16 %v2034_v46, %v2030_v45  ;;  %v2055_v45 = vld [vmem:[#allocation11 + $0x390] sm:$0xff] }
 0x7a5   :  { %v5945_v7 = vpack.c.bf16 %v2036_v62, %v2032_v48  ;;  %v2060_v33 = vld [vmem:[#allocation11 + $0x3b8] sm:$0xff]  ;;  %v2059_v46 = vld [vmem:[#allocation11 + $0x3b0] sm:$0xff]  ;;  %v2062_v48 = vld [vmem:[#allocation11 + $0x3c8] sm:$0xff] }
 0x7a6   :  { %v5977_v37 = vpack.c.bf16 %v2060_v33, %v2056_v25  ;;  %v5984_v62 = vpack.c.bf16 %v2059_v46, %v2055_v45  ;;  %v1497_v33 = vadd.f32 %v1493_v43, %v5582_v5  ;;  %v1492_v45 = vld [vmem:[#allocation6 + $0xf0] sm:$0xff]  ;;  %v6392_v43 = vsub.s32 1, %v5565_v51 }
 0x7a7   :  { %4215 = vmatpush1.bf16.msra.mxu0 %v4214_v15  ;;  %4247 = vmatpush1.bf16.msra.mxu1 %v4246_v18  ;;  %v2035_v15 = vld [vmem:[#allocation11 + $0x2f0] sm:$0xff]  ;;  %v2038_v18 = vld [vmem:[#allocation11 + $0x308] sm:$0xff] }
 0x7a8   :  { %4217 = vmatprep.subr.bf16.mxu0 %v4216_v27  ;;  %4249 = vmatprep.subr.bf16.mxu1 %v4248_v31  ;;  %v5948_v24 = vpack.c.bf16 %v2035_v15, %v2031_v10  ;;  %v2042_v27 = vld [vmem:[#allocation11 + $0x328] sm:$0xff]  ;;  %v2037_v31 = vld [vmem:[#allocation11 + $0x300] sm:$0xff]  ;;  %v5986_v10 = vpack.c.bf16 %v2066_v55, %v2062_v48  ;;  %v2064_v15 = vld [vmem:[#allocation11 + $0x3d8] sm:$0xff]  ;;  %v1496_v48 = vadd.f32 %v1492_v45, %v5588_v28 }
 0x7a9   :  { %v5952_v39 = vpack.c.bf16 %v2042_v27, %v2038_v18  ;;  %v5954_v40 = vpack.c.bf16 %v2041_v32, %v2037_v31  ;;  %v2068_v18 = vld [vmem:[#allocation11 + $0x3f8] sm:$0xff]  ;;  %v2061_v27 = vld [vmem:[#allocation11 + $0x3c0] sm:$0xff] }
 0x7aa   :  { %v2065_v31 = vld [vmem:[#allocation11 + $0x3e0] sm:$0xff]  ;;  %v5992_v32 = vpack.c.bf16 %v2068_v18, %v2064_v15 }
 0x7ab   :  { %4219 = vmatpush1.bf16.msra.mxu0 %v4218_v41  ;;  %4251 = vmatpush1.bf16.msra.mxu1 %v4250_v49  ;;  %v2040_v41 = vld [vmem:[#allocation11 + $0x318] sm:$0xff] }
 0x7ac   :  { %v2044_v49 = vld [vmem:[#allocation11 + $0x338] sm:$0xff] }
 0x7ae   :  { %1809 = vmatmul.mubr.f32.vlgmr.msra.gmra.mrb[16].mxu0 %v5597_v29  ;;  %1922 = vmatmul.mubr.f32.vlgmr.msra.gmra.mrb[16].mxu1 %v5597_v29  ;;  %v2006_v29 = vld [vmem:[#allocation11 + $0x208] sm:$0xff] }
 0x7af   :  { %1814 = vmatprep.mubr.f32.mxu0 %v5296_v0  ;;  %1927 = vmatprep.mubr.f32.mxu1 %v5296_v0 }
 0x7b2   :  { %1815 = vmatmul.mubr.f32.gmra.mrb[18].mxu0 %v5643_v6  ;;  %1928 = vmatmul.mubr.f32.gmra.mrb[18].mxu1 %v5643_v6  ;;  %v2010_v6 = vld [vmem:[#allocation11 + $0x228] sm:$0xff] }
 0x7b3   :  { %1820 = vmatprep.mubr.f32.mxu0 %v5296_v0  ;;  %1933 = vmatprep.mubr.f32.mxu1 %v5296_v0 }
 0x7b6   :  { %1821 = vmatmul.mubr.f32.gmra.mrb[20].mxu0 %v5689_v50  ;;  %1934 = vmatmul.mubr.f32.gmra.mrb[20].mxu1 %v5689_v50  ;;  %v2008_v50 = vld [vmem:[#allocation11 + $0x218] sm:$0xff] }
 0x7b7   :  { %1826 = vmatprep.mubr.f32.mxu0 %v5296_v0  ;;  %1939 = vmatprep.mubr.f32.mxu1 %v5296_v0 }
 0x7ba   :  { %1827 = vmatmul.mubr.f32.gmra.mrb[22].mxu0 %v5735_v34  ;;  %1940 = vmatmul.mubr.f32.gmra.mrb[22].mxu1 %v5735_v34  ;;  %v5905_v34 = vpack.c.bf16 %v2010_v6, %v2006_v29  ;;  %v2039_v29 = vld [vmem:[#allocation11 + $0x310] sm:$0xff]  ;;  %v5957_v6 = vpack.c.bf16 %v2044_v49, %v2040_v41  ;;  %v5994_v49 = vpack.c.bf16 %v2065_v31, %v2061_v27 }
 0x7bb   :  { %1832 = vmatprep.mubr.f32.mxu0 %v5296_v0  ;;  %1945 = vmatprep.mubr.f32.mxu1 %v5296_v0  ;;  %v2063_v41 = vld [vmem:[#allocation11 + $0x3d0] sm:$0xff] }
 0x7bc   :  { %4253 = vmatprep.subr.bf16.mxu0 %v5905_v34 }
 0x7be   :  { %1833 = vmatmul.mubr.f32.gmra.mrb[24].mxu0 %v5781_v20  ;;  %1946 = vmatmul.mubr.f32.gmra.mrb[24].mxu1 %v5781_v20  ;;  %v2005_v20 = vld [vmem:[#allocation11 + $0x200] sm:$0xff] }
 0x7bf   :  { %1838 = vmatprep.mubr.f32.mxu0 %v5296_v0  ;;  %1951 = vmatprep.mubr.f32.mxu1 %v5296_v0  ;;  %v5907_v11 = vpack.c.bf16 %v2009_v61, %v2005_v20  ;;  %v2046_v20 = vld [vmem:[#allocation11 + $0x348] sm:$0xff] }
 0x7c0   :  { %v2050_v61 = vld [vmem:[#allocation11 + $0x368] sm:$0xff] }
 0x7c1   :  { %4255 = vmatpush1.bf16.msra.mxu0 %v5907_v11 }
 0x7c2   :  { %1839 = vmatmul.mubr.f32.gmra.mrb[26].mxu0 %v5827_v47  ;;  %1952 = vmatmul.mubr.f32.gmra.mrb[26].mxu1 %v5827_v47  ;;  %v2012_v47 = vld [vmem:[#allocation11 + $0x238] sm:$0xff] }
 0x7c3   :  { %1844 = vmatprep.mubr.f32.mxu0 %v5296_v0  ;;  %1957 = vmatprep.mubr.f32.mxu1 %v5296_v0  ;;  %v5909_v4 = vpack.c.bf16 %v2012_v47, %v2008_v50  ;;  %v2043_v50 = vld [vmem:[#allocation11 + $0x330] sm:$0xff] }
 0x7c4   :  { %4257 = vmatprep.subr.bf16.mxu0 %v5917_v56  ;;  %v5960_v47 = vpack.c.bf16 %v2043_v50, %v2039_v29  ;;  %v2067_v29 = vld [vmem:[#allocation11 + $0x3f0] sm:$0xff] }
 0x7c5   :  { %4285 = vmatprep.subr.bf16.mxu1 %v5909_v4  ;;  %4259 = vmatpush1.bf16.msra.mxu0 %v5919_v13  ;;  %v5997_v50 = vpack.c.bf16 %v2067_v29, %v2063_v41 }
 0x7c6   :  { %1845 = vmatmul.mubr.f32.gmra.mrb[28].mxu0 %v5871_v38  ;;  %1958 = vmatmul.mubr.f32.gmra.mrb[28].mxu1 %v5871_v38  ;;  %v5912_v38 = vpack.c.bf16 %v2011_v2, %v2007_v22  ;;  %v5962_v22 = vpack.c.bf16 %v2050_v61, %v2046_v20  ;;  %v2045_v2 = vld [vmem:[#allocation11 + $0x340] sm:$0xff]  ;;  %v1491_v61 = vld [vmem:[#allocation6 + $0xe8] sm:$0xff] }
 0x7c7   :  { %1850 = vmatprep.mubr.f32.mxu0 %v5296_v0  ;;  %1963 = vmatprep.mubr.f32.mxu1 %v5296_v0  ;;  %v5966_v16 = vpack.c.bf16 %v2049_v54, %v2045_v2  ;;  %v1490_v20 = vld [vmem:[#allocation6 + $0xe0] sm:$0xff]  ;;  %v1495_v54 = vadd.f32 %v1491_v61, %v5575_v60 }
 0x7c8   :  { %4287 = vmatpush1.bf16.msra.mxu1 %v5912_v38  ;;  %4261 = vmatprep.subr.bf16.mxu0 %v5929_v9  ;;  %v1494_v2 = vadd.f32 %v1490_v20, %v5571_v57 }
 0x7c9   :  { %4289 = vmatprep.subr.bf16.mxu1 %v5921_v23  ;;  %4263 = vmatpush1.bf16.msra.mxu0 %v5931_v26 }
 0x7ca   :  { %4265 = vmatprep.subr.bf16.mxu0 %v5941_v52 }
 0x7cc   :  { %4291 = vmatpush1.bf16.msra.mxu1 %v5924_v35 }
 0x7cd   :  { %4293 = vmatprep.subr.bf16.mxu1 %v5933_v30  ;;  %4267 = vmatpush1.bf16.msra.mxu0 %v5943_v1 }
 0x7ce   :  { %4269 = vmatprep.subr.bf16.mxu0 %v5952_v39 }
 0x7d0   :  { %4295 = vmatpush1.bf16.msra.mxu1 %v5936_v42 }
 0x7d1   :  { %4297 = vmatprep.subr.bf16.mxu1 %v5945_v7  ;;  %4271 = vmatpush1.bf16.msra.mxu0 %v5954_v40 }
 0x7d2   :  { %4273 = vmatprep.subr.bf16.mxu0 %v5962_v22 }
 0x7d4   :  { %4299 = vmatpush1.bf16.msra.mxu1 %v5948_v24 }
 0x7d5   :  { %4301 = vmatprep.subr.bf16.mxu1 %v5957_v6  ;;  %4275 = vmatpush1.bf16.msra.mxu0 %v5966_v16 }
 0x7d6   :  { %4277 = vmatprep.subr.bf16.mxu0 %v5974_v14 }
 0x7d8   :  { %4303 = vmatpush1.bf16.msra.mxu1 %v5960_v47 }
 0x7d9   :  { %4305 = vmatprep.subr.bf16.mxu1 %v5968_v63  ;;  %4279 = vmatpush1.bf16.msra.mxu0 %v5980_v58 }
 0x7da   :  { %4281 = vmatprep.subr.bf16.mxu0 %v5986_v10 }
 0x7dc   :  { %4307 = vmatpush1.bf16.msra.mxu1 %v5972_v8 }
 0x7dd   :  { %4309 = vmatprep.subr.bf16.mxu1 %v5977_v37  ;;  %4283 = vmatpush1.bf16.msra.mxu0 %v5994_v49 }
 0x7de   :  { %4317 = vmatprep.subr.bf16.mxu0 %v5905_v34 }
 0x7e0   :  { %4311 = vmatpush1.bf16.msra.mxu1 %v5984_v62 }
 0x7e1   :  { %4313 = vmatprep.subr.bf16.mxu1 %v5992_v32 }
 0x7e4   :  { %4315 = vmatpush1.bf16.msra.mxu1 %v5997_v50 }
 0x7e5   :  { %4349 = vmatprep.subr.bf16.mxu1 %v5909_v4 }
 0x861   :  { %v1564_v21 = vpop.f32.mrb[14].mxu0  ;;  %v1635_v3 = vpop.f32.mrb[14].mxu1 }
 0x862   :  { %v1640_v19 = vadd.f32 %v1564_v21, %v1494_v2  ;;  %v1566_v12 = vpop.f32.mrb[15].mxu0  ;;  %v1637_v44 = vpop.f32.mrb[15].mxu1  ;;  %v1642_v55 = vadd.f32 %v1635_v3, %v1496_v48 }
 0x863   :  { %v1641_v36 = vadd.f32 %v1566_v12, %v1495_v54  ;;  %v1643_v46 = vadd.f32 %v1637_v44, %v1497_v33 }
 0x864   :  { %v3649_v17 = vmul.f32 -1.442695, %v1640_v19  ;;  %v101_v19 = vld [vmem:[#allocation14 + $0x8] sm:$0xff] }
 0x865   :  { %v3650_v25 = vmul.f32 -1.442695, %v1641_v36  ;;  %v3651_v57 = vmul.f32 -1.442695, %v1643_v46 }
 0x866   :  { %4955 = vpow2.f32 %v3649_v17 }
 0x867   :  { %4957 = vpow2.f32 %v3650_v25 }
 0x868   :  { %4959 = vpow2.f32 %v3651_v57 }
 0x869   :  { %4961 = vtanh.f32 %v1642_v55  ;;  %v6393_v55 = vsub.s32 3, %v5565_v51 }
 0x870   :  { %v4956_v60 = vpop.eup %4955 }
 0x871   :  { %v4958_v15 = vpop.eup %4957  ;;  %v1647_v18 = vadd.f32 1.0, %v4956_v60 }
 0x872   :  { %v1653_v27 = vadd.f32 1.0, %v4958_v15  ;;  %v4960_v31 = vpop.eup %4959  ;;  %v6394_v15 = vsub.s32 2, %v5565_v51 }
 0x873   :  { %4963 = vrcp.f32 %v1647_v18  ;;  %v4962_v41 = vpop.eup %4961  ;;  %v1660_v61 = vadd.f32 1.0, %v4960_v31 }
 0x874   :  { %4965 = vrcp.f32 %v1653_v27 }
 0x875   :  { %4967 = vrcp.f32 %v1660_v61 }
 0x87d   :  { %v4964_v29 = vpop.eup %4963 }
 0x87e   :  { %v4966_v5 = vpop.eup %4965  ;;  %v1664_v20 = vmul.f32 %v4964_v29, %v4962_v41 }
 0x87f   :  { %v1663_v2 = vmul.f32 %v4966_v5, %v5868_v59  ;;  %v4968_v28 = vpop.eup %4967  ;;  %v2003_v59 = vld [vmem:[#allocation12 + $0x4] sm:$0xf] }
 0x880   :  { %v6046_v12 = vrot.slane %v2003_v59, %v182_v53  ;;  %v6050_v44 = vrot.slane %v2003_v59, %v6392_v43  ;;  %v6056_v60 = vrot.slane %v2003_v59, %v6393_v55  ;;  %v6061_v18 = vrot.slane %v2003_v59, %v6394_v15 }
 0x881   :  { %v1665_v54 = vadd.f32 %v1664_v20, %v1663_v2 }
 0x883   :  { %4969 = vtanh.f32 %v1665_v54  ;;  %3576 = vst [vmem:[#allocation18] sm:$0xff] %v1665_v54  ;;  %v105_v54 = vld [vmem:[%s6385_s5 + $0x8] sm:$0xff]  ;;  %s5297_s5 = smov [#allocation16]  }
 0x884   :  { %s3595_s26 = sshll.u32 %s5297_s5, 4  ;;  %s3596_s26 = int_to_ptr.vmem [resolvable:$true] %s3595_s26 }
 0x885   :  { %s5209_s9 = scalar_lea.vmem %s3596_s26, 256  ;;  %p5214_p13 = scmp.lt.s32.totalorder %s3596_s26, %s3596_s26 }
 0x886   :  { %p5210_p12 = scmp.ne.s32.totalorder %s3596_s26, %s5209_s9  ;;  %p5215_p0 = scmp.lt.s32.totalorder %s5209_s9, %s5209_s9 }
 0x888   :  { %p5216_p1 = por %p5215_p0, %p5214_p13 }
 0x88a   :  { %p5217_p2 = pnand %p5216_p1, %p5210_p12 }
 0x88d   :  { %v4970_v21 = vpop.eup %4969 }
 0x88e   :  { %v1667_v3 = vmul.f32 %v4970_v21, %v4968_v28 }
 0x890   :  { %1851 = vmatmul.mubr.f32.gmra.mrb[30].mxu0 %v1667_v3  ;;  %3572 = vst [vmem:[#allocation16] sm:$0xff] %v1667_v3  ;;  %1964 = vmatmul.mubr.f32.gmra.mrb[30].mxu1 %v1667_v3 }
 0x891   :  { %2166 = vmatprep.mubr.f32.mxu0 %v5296_v0  ;;  %2237 = vmatprep.mubr.f32.mxu1 %v5296_v0 }
 0x894   :  { %2167 = vmatmul.mubr.f32.vlgmr.msra.gmra.mrb[16].mxu0 %v101_v19  ;;  %2238 = vmatmul.mubr.f32.vlgmr.msra.gmra.mrb[16].mxu1 %v101_v19 }
 0x895   :  { %4319 = vmatpush1.bf16.msra.mxu0 %v5907_v11  ;;  %4351 = vmatpush1.bf16.msra.mxu1 %v5912_v38 }
 0x896   :  { %4321 = vmatprep.subr.bf16.mxu0 %v5917_v56  ;;  %4353 = vmatprep.subr.bf16.mxu1 %v5921_v23 }
 0x897   :  { %2350 = vmatprep.mubr.f32.mxu0 %v5296_v0  ;;  %2421 = vmatprep.mubr.f32.mxu1 %v5296_v0 }
 0x899   :  { %4323 = vmatpush1.bf16.msra.mxu0 %v5919_v13  ;;  %4355 = vmatpush1.bf16.msra.mxu1 %v5924_v35 }
 0x89a   :  { %4325 = vmatprep.subr.bf16.mxu0 %v5929_v9  ;;  %4357 = vmatprep.subr.bf16.mxu1 %v5933_v30 }
 0x89d   :  { %4327 = vmatpush1.bf16.msra.mxu0 %v5931_v26  ;;  %4359 = vmatpush1.bf16.msra.mxu1 %v5936_v42 }
 0x89e   :  { %4329 = vmatprep.subr.bf16.mxu0 %v5941_v52  ;;  %4361 = vmatprep.subr.bf16.mxu1 %v5945_v7 }
 0x8a1   :  { %4331 = vmatpush1.bf16.msra.mxu0 %v5943_v1  ;;  %4363 = vmatpush1.bf16.msra.mxu1 %v5948_v24 }
 0x8a2   :  { %4333 = vmatprep.subr.bf16.mxu0 %v5952_v39  ;;  %4365 = vmatprep.subr.bf16.mxu1 %v5957_v6 }
 0x8a5   :  { %4335 = vmatpush1.bf16.msra.mxu0 %v5954_v40  ;;  %4367 = vmatpush1.bf16.msra.mxu1 %v5960_v47 }
 0x8a6   :  { %4337 = vmatprep.subr.bf16.mxu0 %v5962_v22  ;;  %4369 = vmatprep.subr.bf16.mxu1 %v5968_v63 }
 0x8a9   :  { %4339 = vmatpush1.bf16.msra.mxu0 %v5966_v16  ;;  %4371 = vmatpush1.bf16.msra.mxu1 %v5972_v8 }
 0x8aa   :  { %4341 = vmatprep.subr.bf16.mxu0 %v5974_v14  ;;  %4373 = vmatprep.subr.bf16.mxu1 %v5977_v37 }
 0x8ad   :  { %4343 = vmatpush1.bf16.msra.mxu0 %v5980_v58  ;;  %4375 = vmatpush1.bf16.msra.mxu1 %v5984_v62 }
 0x8ae   :  { %4345 = vmatprep.subr.bf16.mxu0 %v5986_v10  ;;  %4377 = vmatprep.subr.bf16.mxu1 %v5992_v32 }
 0x8b1   :  { %4347 = vmatpush1.bf16.msra.mxu0 %v5994_v49  ;;  %4379 = vmatpush1.bf16.msra.mxu1 %v5997_v50 }
 0x8b2   :  { %4381 = vmatprep.subr.bf16.mxu0 %v5905_v34  ;;  %4413 = vmatprep.subr.bf16.mxu1 %v5909_v4 }
 0x967   :  { %v2168_v36 = vpop.f32.mrb[16].mxu0  ;;  %v2239_v17 = vpop.f32.mrb[16].mxu1 }
 0x968   :  { %v4764_v25 = vadd.f32 %v2168_v36, %v6046_v12  ;;  %v2170_v33 = vpop.f32.mrb[17].mxu0  ;;  %v2241_v45 = vpop.f32.mrb[17].mxu1  ;;  %v4780_v31 = vadd.f32 %v2239_v17, %v6061_v18 }
 0x969   :  { %v4765_v46 = vadd.f32 %v2170_v33, %v6050_v44  ;;  %v4781_v53 = vadd.f32 %v2241_v45, %v6056_v60 }
 0x96a   :  { %v3652_v48 = vmul.f32 -1.442695, %v4764_v25 }
 0x96b   :  { %v3653_v57 = vmul.f32 -1.442695, %v4765_v46  ;;  %v3654_v27 = vmul.f32 -1.442695, %v4781_v53 }
 0x96c   :  { %4971 = vpow2.f32 %v3652_v48 }
 0x96d   :  { %4973 = vpow2.f32 %v3653_v57 }
 0x96e   :  { %4975 = vpow2.f32 %v3654_v27 }
 0x96f   :  { %4977 = vtanh.f32 %v4780_v31 }
 0x976   :  { %v4972_v41 = vpop.eup %4971 }
 0x977   :  { %v4974_v29 = vpop.eup %4973  ;;  %v2251_v5 = vadd.f32 1.0, %v4972_v41 }
 0x978   :  { %v2257_v20 = vadd.f32 1.0, %v4974_v29  ;;  %v4976_v61 = vpop.eup %4975 }
 0x979   :  { %4979 = vrcp.f32 %v2251_v5  ;;  %v4978_v2 = vpop.eup %4977  ;;  %v2264_v3 = vadd.f32 1.0, %v4976_v61 }
 0x97a   :  { %4981 = vrcp.f32 %v2257_v20 }
 0x97b   :  { %4983 = vrcp.f32 %v2264_v3 }
 0x983   :  { %v4980_v51 = vpop.eup %4979 }
 0x984   :  { %v4982_v28 = vpop.eup %4981  ;;  %v2268_v21 = vmul.f32 %v4980_v51, %v4978_v2 }
 0x985   :  { %v2267_v19 = vmul.f32 %v4982_v28, %v105_v54  ;;  %v4984_v43 = vpop.eup %4983 }
 0x987   :  { %v6067_v59 = vadd.f32 %v2268_v21, %v2267_v19 }
 0x989   :  { %4985 = vtanh.f32 %v6067_v59 }
 0x993   :  { %v4986_v36 = vpop.eup %4985 }
 0x994   :  { %v2271_v17 = vmul.f32 %v4986_v36, %v4984_v43 }
 0x996   :  { %2274 = vst [vmem:[#allocation15] sm:$0xff] %v2271_v17  ;;  %2351 = vmatmul.mubr.f32.vlgmr.msra.gmra.mrb[18].mxu0 %v2271_v17  ;;  %2422 = vmatmul.mubr.f32.vlgmr.msra.gmra.mrb[18].mxu1 %v2271_v17 }
 0x997   :  { %4383 = vmatpush1.bf16.msra.mxu0 %v5907_v11  ;;  %4415 = vmatpush1.bf16.msra.mxu1 %v5912_v38 }
 0x998   :  { %4385 = vmatprep.subr.bf16.mxu0 %v5917_v56  ;;  %4417 = vmatprep.subr.bf16.mxu1 %v5921_v23 }
 0x999   :  { %2535 = vmatprep.mubr.f32.mxu0 %v5296_v0  ;;  %2606 = vmatprep.mubr.f32.mxu1 %v5296_v0 }
 0x99b   :  { %4387 = vmatpush1.bf16.msra.mxu0 %v5919_v13  ;;  %4419 = vmatpush1.bf16.msra.mxu1 %v5924_v35 }
 0x99c   :  { %4389 = vmatprep.subr.bf16.mxu0 %v5929_v9  ;;  %4421 = vmatprep.subr.bf16.mxu1 %v5933_v30 }
 0x99f   :  { %4391 = vmatpush1.bf16.msra.mxu0 %v5931_v26  ;;  %4423 = vmatpush1.bf16.msra.mxu1 %v5936_v42 }
 0x9a0   :  { %4393 = vmatprep.subr.bf16.mxu0 %v5941_v52  ;;  %4425 = vmatprep.subr.bf16.mxu1 %v5945_v7 }
 0x9a3   :  { %4395 = vmatpush1.bf16.msra.mxu0 %v5943_v1  ;;  %4427 = vmatpush1.bf16.msra.mxu1 %v5948_v24 }
 0x9a4   :  { %4397 = vmatprep.subr.bf16.mxu0 %v5952_v39  ;;  %4429 = vmatprep.subr.bf16.mxu1 %v5957_v6 }
 0x9a7   :  { %4399 = vmatpush1.bf16.msra.mxu0 %v5954_v40  ;;  %4431 = vmatpush1.bf16.msra.mxu1 %v5960_v47 }
 0x9a8   :  { %4401 = vmatprep.subr.bf16.mxu0 %v5962_v22  ;;  %4433 = vmatprep.subr.bf16.mxu1 %v5968_v63 }
 0x9ab   :  { %4403 = vmatpush1.bf16.msra.mxu0 %v5966_v16  ;;  %4435 = vmatpush1.bf16.msra.mxu1 %v5972_v8 }
 0x9ac   :  { %4405 = vmatprep.subr.bf16.mxu0 %v5974_v14  ;;  %4437 = vmatprep.subr.bf16.mxu1 %v5977_v37 }
 0x9af   :  { %4407 = vmatpush1.bf16.msra.mxu0 %v5980_v58  ;;  %4439 = vmatpush1.bf16.msra.mxu1 %v5984_v62 }
 0x9b0   :  { %4409 = vmatprep.subr.bf16.mxu0 %v5986_v10  ;;  %4441 = vmatprep.subr.bf16.mxu1 %v5992_v32 }
 0x9b3   :  { %4411 = vmatpush1.bf16.msra.mxu0 %v5994_v49  ;;  %4443 = vmatpush1.bf16.msra.mxu1 %v5997_v50 }
 0x9b4   :  { %4445 = vmatprep.subr.bf16.mxu0 %v5905_v34  ;;  %4477 = vmatprep.subr.bf16.mxu1 %v5909_v4 }
 0xa69   :  { %v2352_v25 = vpop.f32.mrb[18].mxu0  ;;  %v2423_v33 = vpop.f32.mrb[18].mxu1 }
 0xa6a   :  { %v4766_v45 = vadd.f32 %v2352_v25, %v6046_v12  ;;  %v2354_v46 = vpop.f32.mrb[19].mxu0  ;;  %v2425_v48 = vpop.f32.mrb[19].mxu1  ;;  %v4782_v31 = vadd.f32 %v2423_v33, %v6061_v18 }
 0xa6b   :  { %v4767_v57 = vadd.f32 %v2354_v46, %v6050_v44  ;;  %v4783_v15 = vadd.f32 %v2425_v48, %v6056_v60 }
 0xa6c   :  { %v3655_v55 = vmul.f32 -1.442695, %v4766_v45 }
 0xa6d   :  { %v3656_v53 = vmul.f32 -1.442695, %v4767_v57  ;;  %v3657_v27 = vmul.f32 -1.442695, %v4783_v15 }
 0xa6e   :  { %4987 = vpow2.f32 %v3655_v55 }
 0xa6f   :  { %4989 = vpow2.f32 %v3656_v53 }
 0xa70   :  { %4991 = vpow2.f32 %v3657_v27 }
 0xa71   :  { %4993 = vtanh.f32 %v4782_v31 }
 0xa78   :  { %v4988_v41 = vpop.eup %4987 }
 0xa79   :  { %v4990_v29 = vpop.eup %4989  ;;  %v2435_v5 = vadd.f32 1.0, %v4988_v41 }
 0xa7a   :  { %v2441_v20 = vadd.f32 1.0, %v4990_v29  ;;  %v4992_v61 = vpop.eup %4991 }
 0xa7b   :  { %4995 = vrcp.f32 %v2435_v5  ;;  %v4994_v2 = vpop.eup %4993  ;;  %v2448_v21 = vadd.f32 1.0, %v4992_v61 }
 0xa7c   :  { %4997 = vrcp.f32 %v2441_v20 }
 0xa7d   :  { %4999 = vrcp.f32 %v2448_v21 }
 0xa85   :  { %v4996_v54 = vpop.eup %4995 }
 0xa86   :  { %v4998_v51 = vpop.eup %4997  ;;  %v2452_v28 = vmul.f32 %v4996_v54, %v4994_v2 }
 0xa87   :  { %v2451_v3 = vmul.f32 %v4998_v51, %v6067_v59  ;;  %v5000_v43 = vpop.eup %4999 }
 0xa89   :  { %v6109_v19 = vadd.f32 %v2452_v28, %v2451_v3 }
 0xa8b   :  { %5001 = vtanh.f32 %v6109_v19 }
 0xa95   :  { %v5002_v36 = vpop.eup %5001 }
 0xa96   :  { %v2455_v17 = vmul.f32 %v5002_v36, %v5000_v43 }
 0xa98   :  { %2459 = vst [vmem:[#allocation15 + $0x8] sm:$0xff] %v2455_v17  ;;  %2536 = vmatmul.mubr.f32.vlgmr.msra.gmra.mrb[20].mxu0 %v2455_v17  ;;  %2607 = vmatmul.mubr.f32.vlgmr.msra.gmra.mrb[20].mxu1 %v2455_v17 }
 0xa99   :  { %4447 = vmatpush1.bf16.msra.mxu0 %v5907_v11  ;;  %4479 = vmatpush1.bf16.msra.mxu1 %v5912_v38 }
 0xa9a   :  { %4449 = vmatprep.subr.bf16.mxu0 %v5917_v56  ;;  %4481 = vmatprep.subr.bf16.mxu1 %v5921_v23 }
 0xa9b   :  { %2720 = vmatprep.mubr.f32.mxu0 %v5296_v0  ;;  %2791 = vmatprep.mubr.f32.mxu1 %v5296_v0 }
 0xa9d   :  { %4451 = vmatpush1.bf16.msra.mxu0 %v5919_v13  ;;  %4483 = vmatpush1.bf16.msra.mxu1 %v5924_v35 }
 0xa9e   :  { %4453 = vmatprep.subr.bf16.mxu0 %v5929_v9  ;;  %4485 = vmatprep.subr.bf16.mxu1 %v5933_v30 }
 0xaa1   :  { %4455 = vmatpush1.bf16.msra.mxu0 %v5931_v26  ;;  %4487 = vmatpush1.bf16.msra.mxu1 %v5936_v42 }
 0xaa2   :  { %4457 = vmatprep.subr.bf16.mxu0 %v5941_v52  ;;  %4489 = vmatprep.subr.bf16.mxu1 %v5945_v7 }
 0xaa5   :  { %4459 = vmatpush1.bf16.msra.mxu0 %v5943_v1  ;;  %4491 = vmatpush1.bf16.msra.mxu1 %v5948_v24 }
 0xaa6   :  { %4461 = vmatprep.subr.bf16.mxu0 %v5952_v39  ;;  %4493 = vmatprep.subr.bf16.mxu1 %v5957_v6 }
 0xaa9   :  { %4463 = vmatpush1.bf16.msra.mxu0 %v5954_v40  ;;  %4495 = vmatpush1.bf16.msra.mxu1 %v5960_v47 }
 0xaaa   :  { %4465 = vmatprep.subr.bf16.mxu0 %v5962_v22  ;;  %4497 = vmatprep.subr.bf16.mxu1 %v5968_v63 }
 0xaad   :  { %4467 = vmatpush1.bf16.msra.mxu0 %v5966_v16  ;;  %4499 = vmatpush1.bf16.msra.mxu1 %v5972_v8 }
 0xaae   :  { %4469 = vmatprep.subr.bf16.mxu0 %v5974_v14  ;;  %4501 = vmatprep.subr.bf16.mxu1 %v5977_v37 }
 0xab1   :  { %4471 = vmatpush1.bf16.msra.mxu0 %v5980_v58  ;;  %4503 = vmatpush1.bf16.msra.mxu1 %v5984_v62 }
 0xab2   :  { %4473 = vmatprep.subr.bf16.mxu0 %v5986_v10  ;;  %4505 = vmatprep.subr.bf16.mxu1 %v5992_v32 }
 0xab5   :  { %4475 = vmatpush1.bf16.msra.mxu0 %v5994_v49  ;;  %4507 = vmatpush1.bf16.msra.mxu1 %v5997_v50 }
 0xab6   :  { %4509 = vmatprep.subr.bf16.mxu0 %v5905_v34  ;;  %4541 = vmatprep.subr.bf16.mxu1 %v5909_v4 }
 0xb6b   :  { %v2537_v59 = vpop.f32.mrb[20].mxu0  ;;  %v2608_v25 = vpop.f32.mrb[20].mxu1 }
 0xb6c   :  { %v4768_v33 = vadd.f32 %v2537_v59, %v6046_v12  ;;  %v2539_v45 = vpop.f32.mrb[21].mxu0  ;;  %v2610_v46 = vpop.f32.mrb[21].mxu1  ;;  %v4784_v27 = vadd.f32 %v2608_v25, %v6061_v18 }
 0xb6d   :  { %v4769_v48 = vadd.f32 %v2539_v45, %v6050_v44  ;;  %v4785_v53 = vadd.f32 %v2610_v46, %v6056_v60 }
 0xb6e   :  { %v3658_v57 = vmul.f32 -1.442695, %v4768_v33 }
 0xb6f   :  { %v3659_v55 = vmul.f32 -1.442695, %v4769_v48  ;;  %v3660_v15 = vmul.f32 -1.442695, %v4785_v53 }
 0xb70   :  { %5003 = vpow2.f32 %v3658_v57 }
 0xb71   :  { %5005 = vpow2.f32 %v3659_v55 }
 0xb72   :  { %5007 = vpow2.f32 %v3660_v15 }
 0xb73   :  { %5009 = vtanh.f32 %v4784_v27 }
 0xb7a   :  { %v5004_v31 = vpop.eup %5003 }
 0xb7b   :  { %v5006_v41 = vpop.eup %5005  ;;  %v2620_v29 = vadd.f32 1.0, %v5004_v31 }
 0xb7c   :  { %v2626_v5 = vadd.f32 1.0, %v5006_v41  ;;  %v5008_v20 = vpop.eup %5007 }
 0xb7d   :  { %5011 = vrcp.f32 %v2620_v29  ;;  %v5010_v61 = vpop.eup %5009  ;;  %v2633_v28 = vadd.f32 1.0, %v5008_v20 }
 0xb7e   :  { %5013 = vrcp.f32 %v2626_v5 }
 0xb7f   :  { %5015 = vrcp.f32 %v2633_v28 }
 0xb87   :  { %v5012_v2 = vpop.eup %5011 }
 0xb88   :  { %v5014_v54 = vpop.eup %5013  ;;  %v2637_v51 = vmul.f32 %v5012_v2, %v5010_v61 }
 0xb89   :  { %v2636_v21 = vmul.f32 %v5014_v54, %v6109_v19  ;;  %v5016_v43 = vpop.eup %5015 }
 0xb8b   :  { %v6151_v3 = vadd.f32 %v2637_v51, %v2636_v21 }
 0xb8d   :  { %5017 = vtanh.f32 %v6151_v3 }
 0xb97   :  { %v5018_v36 = vpop.eup %5017 }
 0xb98   :  { %v2640_v17 = vmul.f32 %v5018_v36, %v5016_v43 }
 0xb9a   :  { %2644 = vst [vmem:[#allocation15 + $0x10] sm:$0xff] %v2640_v17  ;;  %2721 = vmatmul.mubr.f32.vlgmr.msra.gmra.mrb[22].mxu0 %v2640_v17  ;;  %2792 = vmatmul.mubr.f32.vlgmr.msra.gmra.mrb[22].mxu1 %v2640_v17 }
 0xb9b   :  { %4511 = vmatpush1.bf16.msra.mxu0 %v5907_v11  ;;  %4543 = vmatpush1.bf16.msra.mxu1 %v5912_v38 }
 0xb9c   :  { %4513 = vmatprep.subr.bf16.mxu0 %v5917_v56  ;;  %4545 = vmatprep.subr.bf16.mxu1 %v5921_v23 }
 0xb9d   :  { %2905 = vmatprep.mubr.f32.mxu0 %v5296_v0  ;;  %2976 = vmatprep.mubr.f32.mxu1 %v5296_v0 }
 0xb9f   :  { %4515 = vmatpush1.bf16.msra.mxu0 %v5919_v13  ;;  %4547 = vmatpush1.bf16.msra.mxu1 %v5924_v35 }
 0xba0   :  { %4517 = vmatprep.subr.bf16.mxu0 %v5929_v9  ;;  %4549 = vmatprep.subr.bf16.mxu1 %v5933_v30 }
 0xba3   :  { %4519 = vmatpush1.bf16.msra.mxu0 %v5931_v26  ;;  %4551 = vmatpush1.bf16.msra.mxu1 %v5936_v42 }
 0xba4   :  { %4521 = vmatprep.subr.bf16.mxu0 %v5941_v52  ;;  %4553 = vmatprep.subr.bf16.mxu1 %v5945_v7 }
 0xba7   :  { %4523 = vmatpush1.bf16.msra.mxu0 %v5943_v1  ;;  %4555 = vmatpush1.bf16.msra.mxu1 %v5948_v24 }
 0xba8   :  { %4525 = vmatprep.subr.bf16.mxu0 %v5952_v39  ;;  %4557 = vmatprep.subr.bf16.mxu1 %v5957_v6 }
 0xbab   :  { %4527 = vmatpush1.bf16.msra.mxu0 %v5954_v40  ;;  %4559 = vmatpush1.bf16.msra.mxu1 %v5960_v47 }
 0xbac   :  { %4529 = vmatprep.subr.bf16.mxu0 %v5962_v22  ;;  %4561 = vmatprep.subr.bf16.mxu1 %v5968_v63 }
 0xbaf   :  { %4531 = vmatpush1.bf16.msra.mxu0 %v5966_v16  ;;  %4563 = vmatpush1.bf16.msra.mxu1 %v5972_v8 }
 0xbb0   :  { %4533 = vmatprep.subr.bf16.mxu0 %v5974_v14  ;;  %4565 = vmatprep.subr.bf16.mxu1 %v5977_v37 }
 0xbb3   :  { %4535 = vmatpush1.bf16.msra.mxu0 %v5980_v58  ;;  %4567 = vmatpush1.bf16.msra.mxu1 %v5984_v62 }
 0xbb4   :  { %4537 = vmatprep.subr.bf16.mxu0 %v5986_v10  ;;  %4569 = vmatprep.subr.bf16.mxu1 %v5992_v32 }
 0xbb7   :  { %4539 = vmatpush1.bf16.msra.mxu0 %v5994_v49  ;;  %4571 = vmatpush1.bf16.msra.mxu1 %v5997_v50 }
 0xbb8   :  { %4573 = vmatprep.subr.bf16.mxu0 %v5905_v34  ;;  %4605 = vmatprep.subr.bf16.mxu1 %v5909_v4 }
 0xc6d   :  { %v2722_v19 = vpop.f32.mrb[22].mxu0  ;;  %v2793_v59 = vpop.f32.mrb[22].mxu1 }
 0xc6e   :  { %v4770_v25 = vadd.f32 %v2722_v19, %v6046_v12  ;;  %v2724_v33 = vpop.f32.mrb[23].mxu0  ;;  %v2795_v45 = vpop.f32.mrb[23].mxu1  ;;  %v4786_v15 = vadd.f32 %v2793_v59, %v6061_v18 }
 0xc6f   :  { %v4771_v46 = vadd.f32 %v2724_v33, %v6050_v44  ;;  %v4787_v55 = vadd.f32 %v2795_v45, %v6056_v60 }
 0xc70   :  { %v3661_v48 = vmul.f32 -1.442695, %v4770_v25 }
 0xc71   :  { %v3662_v57 = vmul.f32 -1.442695, %v4771_v46  ;;  %v3663_v53 = vmul.f32 -1.442695, %v4787_v55 }
 0xc72   :  { %5019 = vpow2.f32 %v3661_v48 }
 0xc73   :  { %5021 = vpow2.f32 %v3662_v57 }
 0xc74   :  { %5023 = vpow2.f32 %v3663_v53 }
 0xc75   :  { %5025 = vtanh.f32 %v4786_v15 }
 0xc7c   :  { %v5020_v27 = vpop.eup %5019 }
 0xc7d   :  { %v5022_v31 = vpop.eup %5021  ;;  %v2805_v41 = vadd.f32 1.0, %v5020_v27 }
 0xc7e   :  { %v2811_v29 = vadd.f32 1.0, %v5022_v31  ;;  %v5024_v5 = vpop.eup %5023 }
 0xc7f   :  { %5027 = vrcp.f32 %v2805_v41  ;;  %v5026_v20 = vpop.eup %5025  ;;  %v2818_v51 = vadd.f32 1.0, %v5024_v5 }
 0xc80   :  { %5029 = vrcp.f32 %v2811_v29 }
 0xc81   :  { %5031 = vrcp.f32 %v2818_v51 }
 0xc89   :  { %v5028_v61 = vpop.eup %5027 }
 0xc8a   :  { %v5030_v2 = vpop.eup %5029  ;;  %v2822_v54 = vmul.f32 %v5028_v61, %v5026_v20 }
 0xc8b   :  { %v2821_v28 = vmul.f32 %v5030_v2, %v6151_v3  ;;  %v5032_v43 = vpop.eup %5031 }
 0xc8d   :  { %v6193_v21 = vadd.f32 %v2822_v54, %v2821_v28 }
 0xc8f   :  { %5033 = vtanh.f32 %v6193_v21 }
 0xc99   :  { %v5034_v36 = vpop.eup %5033 }
 0xc9a   :  { %v2825_v17 = vmul.f32 %v5034_v36, %v5032_v43 }
 0xc9c   :  { %2829 = vst [vmem:[#allocation15 + $0x18] sm:$0xff] %v2825_v17  ;;  %2906 = vmatmul.mubr.f32.vlgmr.msra.gmra.mrb[24].mxu0 %v2825_v17  ;;  %2977 = vmatmul.mubr.f32.vlgmr.msra.gmra.mrb[24].mxu1 %v2825_v17 }
 0xc9d   :  { %4575 = vmatpush1.bf16.msra.mxu0 %v5907_v11  ;;  %4607 = vmatpush1.bf16.msra.mxu1 %v5912_v38 }
 0xc9e   :  { %4577 = vmatprep.subr.bf16.mxu0 %v5917_v56  ;;  %4609 = vmatprep.subr.bf16.mxu1 %v5921_v23 }
 0xc9f   :  { %3090 = vmatprep.mubr.f32.mxu0 %v5296_v0  ;;  %3161 = vmatprep.mubr.f32.mxu1 %v5296_v0 }
 0xca1   :  { %4579 = vmatpush1.bf16.msra.mxu0 %v5919_v13  ;;  %4611 = vmatpush1.bf16.msra.mxu1 %v5924_v35 }
 0xca2   :  { %4581 = vmatprep.subr.bf16.mxu0 %v5929_v9  ;;  %4613 = vmatprep.subr.bf16.mxu1 %v5933_v30 }
 0xca5   :  { %4583 = vmatpush1.bf16.msra.mxu0 %v5931_v26  ;;  %4615 = vmatpush1.bf16.msra.mxu1 %v5936_v42 }
 0xca6   :  { %4585 = vmatprep.subr.bf16.mxu0 %v5941_v52  ;;  %4617 = vmatprep.subr.bf16.mxu1 %v5945_v7 }
 0xca9   :  { %4587 = vmatpush1.bf16.msra.mxu0 %v5943_v1  ;;  %4619 = vmatpush1.bf16.msra.mxu1 %v5948_v24 }
 0xcaa   :  { %4589 = vmatprep.subr.bf16.mxu0 %v5952_v39  ;;  %4621 = vmatprep.subr.bf16.mxu1 %v5957_v6 }
 0xcad   :  { %4591 = vmatpush1.bf16.msra.mxu0 %v5954_v40  ;;  %4623 = vmatpush1.bf16.msra.mxu1 %v5960_v47 }
 0xcae   :  { %4593 = vmatprep.subr.bf16.mxu0 %v5962_v22  ;;  %4625 = vmatprep.subr.bf16.mxu1 %v5968_v63 }
 0xcb1   :  { %4595 = vmatpush1.bf16.msra.mxu0 %v5966_v16  ;;  %4627 = vmatpush1.bf16.msra.mxu1 %v5972_v8 }
 0xcb2   :  { %4597 = vmatprep.subr.bf16.mxu0 %v5974_v14  ;;  %4629 = vmatprep.subr.bf16.mxu1 %v5977_v37 }
 0xcb5   :  { %4599 = vmatpush1.bf16.msra.mxu0 %v5980_v58  ;;  %4631 = vmatpush1.bf16.msra.mxu1 %v5984_v62 }
 0xcb6   :  { %4601 = vmatprep.subr.bf16.mxu0 %v5986_v10  ;;  %4633 = vmatprep.subr.bf16.mxu1 %v5992_v32 }
 0xcb9   :  { %4603 = vmatpush1.bf16.msra.mxu0 %v5994_v49  ;;  %4635 = vmatpush1.bf16.msra.mxu1 %v5997_v50 }
 0xcba   :  { %4637 = vmatprep.subr.bf16.mxu0 %v5905_v34  ;;  %4669 = vmatprep.subr.bf16.mxu1 %v5909_v4 }
 0xd6f   :  { %v2907_v3 = vpop.f32.mrb[24].mxu0  ;;  %v2978_v19 = vpop.f32.mrb[24].mxu1 }
 0xd70   :  { %v4772_v59 = vadd.f32 %v2907_v3, %v6046_v12  ;;  %v2909_v25 = vpop.f32.mrb[25].mxu0  ;;  %v2980_v33 = vpop.f32.mrb[25].mxu1  ;;  %v4788_v53 = vadd.f32 %v2978_v19, %v6061_v18 }
 0xd71   :  { %v4773_v45 = vadd.f32 %v2909_v25, %v6050_v44  ;;  %v4789_v57 = vadd.f32 %v2980_v33, %v6056_v60 }
 0xd72   :  { %v3664_v46 = vmul.f32 -1.442695, %v4772_v59 }
 0xd73   :  { %v3665_v48 = vmul.f32 -1.442695, %v4773_v45  ;;  %v3666_v55 = vmul.f32 -1.442695, %v4789_v57 }
 0xd74   :  { %5035 = vpow2.f32 %v3664_v46 }
 0xd75   :  { %5037 = vpow2.f32 %v3665_v48 }
 0xd76   :  { %5039 = vpow2.f32 %v3666_v55 }
 0xd77   :  { %5041 = vtanh.f32 %v4788_v53 }
 0xd7e   :  { %v5036_v15 = vpop.eup %5035 }
 0xd7f   :  { %v5038_v27 = vpop.eup %5037  ;;  %v2990_v31 = vadd.f32 1.0, %v5036_v15 }
 0xd80   :  { %v2996_v41 = vadd.f32 1.0, %v5038_v27  ;;  %v5040_v29 = vpop.eup %5039 }
 0xd81   :  { %5043 = vrcp.f32 %v2990_v31  ;;  %v5042_v5 = vpop.eup %5041  ;;  %v3003_v54 = vadd.f32 1.0, %v5040_v29 }
 0xd82   :  { %5045 = vrcp.f32 %v2996_v41 }
 0xd83   :  { %5047 = vrcp.f32 %v3003_v54 }
 0xd8b   :  { %v5044_v20 = vpop.eup %5043 }
 0xd8c   :  { %v5046_v61 = vpop.eup %5045  ;;  %v3007_v2 = vmul.f32 %v5044_v20, %v5042_v5 }
 0xd8d   :  { %v3006_v51 = vmul.f32 %v5046_v61, %v6193_v21  ;;  %v5048_v43 = vpop.eup %5047 }
 0xd8f   :  { %v6235_v28 = vadd.f32 %v3007_v2, %v3006_v51 }
 0xd91   :  { %5049 = vtanh.f32 %v6235_v28 }
 0xd9b   :  { %v5050_v36 = vpop.eup %5049 }
 0xd9c   :  { %v3010_v17 = vmul.f32 %v5050_v36, %v5048_v43 }
 0xd9e   :  { %3014 = vst [vmem:[#allocation15 + $0x20] sm:$0xff] %v3010_v17  ;;  %3091 = vmatmul.mubr.f32.vlgmr.msra.gmra.mrb[26].mxu0 %v3010_v17  ;;  %3162 = vmatmul.mubr.f32.vlgmr.msra.gmra.mrb[26].mxu1 %v3010_v17 }
 0xd9f   :  { %4639 = vmatpush1.bf16.msra.mxu0 %v5907_v11  ;;  %4671 = vmatpush1.bf16.msra.mxu1 %v5912_v38 }
 0xda0   :  { %4641 = vmatprep.subr.bf16.mxu0 %v5917_v56  ;;  %4673 = vmatprep.subr.bf16.mxu1 %v5921_v23 }
 0xda1   :  { %3275 = vmatprep.mubr.f32.mxu0 %v5296_v0  ;;  %3346 = vmatprep.mubr.f32.mxu1 %v5296_v0 }
 0xda3   :  { %4643 = vmatpush1.bf16.msra.mxu0 %v5919_v13  ;;  %4675 = vmatpush1.bf16.msra.mxu1 %v5924_v35 }
 0xda4   :  { %4645 = vmatprep.subr.bf16.mxu0 %v5929_v9  ;;  %4677 = vmatprep.subr.bf16.mxu1 %v5933_v30 }
 0xda7   :  { %4647 = vmatpush1.bf16.msra.mxu0 %v5931_v26  ;;  %4679 = vmatpush1.bf16.msra.mxu1 %v5936_v42 }
 0xda8   :  { %4649 = vmatprep.subr.bf16.mxu0 %v5941_v52  ;;  %4681 = vmatprep.subr.bf16.mxu1 %v5945_v7 }
 0xdab   :  { %4651 = vmatpush1.bf16.msra.mxu0 %v5943_v1  ;;  %4683 = vmatpush1.bf16.msra.mxu1 %v5948_v24 }
 0xdac   :  { %4653 = vmatprep.subr.bf16.mxu0 %v5952_v39  ;;  %4685 = vmatprep.subr.bf16.mxu1 %v5957_v6 }
 0xdaf   :  { %4655 = vmatpush1.bf16.msra.mxu0 %v5954_v40  ;;  %4687 = vmatpush1.bf16.msra.mxu1 %v5960_v47 }
 0xdb0   :  { %4657 = vmatprep.subr.bf16.mxu0 %v5962_v22  ;;  %4689 = vmatprep.subr.bf16.mxu1 %v5968_v63 }
 0xdb3   :  { %4659 = vmatpush1.bf16.msra.mxu0 %v5966_v16  ;;  %4691 = vmatpush1.bf16.msra.mxu1 %v5972_v8 }
 0xdb4   :  { %4661 = vmatprep.subr.bf16.mxu0 %v5974_v14  ;;  %4693 = vmatprep.subr.bf16.mxu1 %v5977_v37 }
 0xdb7   :  { %4663 = vmatpush1.bf16.msra.mxu0 %v5980_v58  ;;  %4695 = vmatpush1.bf16.msra.mxu1 %v5984_v62 }
 0xdb8   :  { %4665 = vmatprep.subr.bf16.mxu0 %v5986_v10  ;;  %4697 = vmatprep.subr.bf16.mxu1 %v5992_v32 }
 0xdbb   :  { %4667 = vmatpush1.bf16.msra.mxu0 %v5994_v49  ;;  %4699 = vmatpush1.bf16.msra.mxu1 %v5997_v50 }
 0xdbc   :  { %4701 = vmatprep.subr.bf16.mxu0 %v5905_v34  ;;  %4733 = vmatprep.subr.bf16.mxu1 %v5909_v4 }
 0xe71   :  { %v3092_v21 = vpop.f32.mrb[26].mxu0  ;;  %v3163_v3 = vpop.f32.mrb[26].mxu1 }
 0xe72   :  { %v4774_v19 = vadd.f32 %v3092_v21, %v6046_v12  ;;  %v3094_v59 = vpop.f32.mrb[27].mxu0  ;;  %v3165_v25 = vpop.f32.mrb[27].mxu1  ;;  %v4790_v55 = vadd.f32 %v3163_v3, %v6061_v18 }
 0xe73   :  { %v4775_v33 = vadd.f32 %v3094_v59, %v6050_v44  ;;  %v4791_v48 = vadd.f32 %v3165_v25, %v6056_v60 }
 0xe74   :  { %v3667_v45 = vmul.f32 -1.442695, %v4774_v19 }
 0xe75   :  { %v3668_v46 = vmul.f32 -1.442695, %v4775_v33  ;;  %v3669_v57 = vmul.f32 -1.442695, %v4791_v48 }
 0xe76   :  { %5051 = vpow2.f32 %v3667_v45 }
 0xe77   :  { %5053 = vpow2.f32 %v3668_v46 }
 0xe78   :  { %5055 = vpow2.f32 %v3669_v57 }
 0xe79   :  { %5057 = vtanh.f32 %v4790_v55 }
 0xe80   :  { %v5052_v34 = vpop.eup %5051 }
 0xe81   :  { %v5054_v53 = vpop.eup %5053  ;;  %v3175_v4 = vadd.f32 1.0, %v5052_v34 }
 0xe82   :  { %v3181_v15 = vadd.f32 1.0, %v5054_v53  ;;  %v5056_v27 = vpop.eup %5055 }
 0xe83   :  { %5059 = vrcp.f32 %v3175_v4  ;;  %v5058_v31 = vpop.eup %5057  ;;  %v3188_v20 = vadd.f32 1.0, %v5056_v27 }
 0xe84   :  { %5061 = vrcp.f32 %v3181_v15 }
 0xe85   :  { %5063 = vrcp.f32 %v3188_v20 }
 0xe8d   :  { %v5060_v41 = vpop.eup %5059 }
 0xe8e   :  { %v5062_v29 = vpop.eup %5061  ;;  %v3192_v5 = vmul.f32 %v5060_v41, %v5058_v31 }
 0xe8f   :  { %v3191_v61 = vmul.f32 %v5062_v29, %v6235_v28  ;;  %v5064_v54 = vpop.eup %5063 }
 0xe91   :  { %v6277_v2 = vadd.f32 %v3192_v5, %v3191_v61 }
 0xe93   :  { %5065 = vtanh.f32 %v6277_v2 }
 0xe9d   :  { %v5066_v51 = vpop.eup %5065 }
 0xe9e   :  { %v3195_v43 = vmul.f32 %v5066_v51, %v5064_v54 }
 0xea0   :  { %3199 = vst [vmem:[#allocation15 + $0x28] sm:$0xff] %v3195_v43  ;;  %3276 = vmatmul.mubr.f32.vlgmr.msra.gmra.mrb[28].mxu0 %v3195_v43  ;;  %3347 = vmatmul.mubr.f32.vlgmr.msra.gmra.mrb[28].mxu1 %v3195_v43 }
 0xea1   :  { %4703 = vmatpush1.bf16.msra.mxu0 %v5907_v11  ;;  %4735 = vmatpush1.bf16.msra.mxu1 %v5912_v38 }
 0xea2   :  { %4705 = vmatprep.subr.bf16.mxu0 %v5917_v56  ;;  %4737 = vmatprep.subr.bf16.mxu1 %v5921_v23 }
 0xea3   :  { %3460 = vmatprep.mubr.f32.mxu0 %v5296_v0  ;;  %3531 = vmatprep.mubr.f32.mxu1 %v5296_v0 }
 0xea5   :  { %4707 = vmatpush1.bf16.msra.mxu0 %v5919_v13  ;;  %4739 = vmatpush1.bf16.msra.mxu1 %v5924_v35 }
 0xea6   :  { %4709 = vmatprep.subr.bf16.mxu0 %v5929_v9  ;;  %4741 = vmatprep.subr.bf16.mxu1 %v5933_v30 }
 0xea9   :  { %4711 = vmatpush1.bf16.msra.mxu0 %v5931_v26  ;;  %4743 = vmatpush1.bf16.msra.mxu1 %v5936_v42 }
 0xeaa   :  { %4713 = vmatprep.subr.bf16.mxu0 %v5941_v52  ;;  %4745 = vmatprep.subr.bf16.mxu1 %v5945_v7 }
 0xead   :  { %4715 = vmatpush1.bf16.msra.mxu0 %v5943_v1  ;;  %4747 = vmatpush1.bf16.msra.mxu1 %v5948_v24 }
 0xeae   :  { %4717 = vmatprep.subr.bf16.mxu0 %v5952_v39  ;;  %4749 = vmatprep.subr.bf16.mxu1 %v5957_v6 }
 0xeb1   :  { %4719 = vmatpush1.bf16.msra.mxu0 %v5954_v40  ;;  %4751 = vmatpush1.bf16.msra.mxu1 %v5960_v47 }
 0xeb2   :  { %4721 = vmatprep.subr.bf16.mxu0 %v5962_v22  ;;  %4753 = vmatprep.subr.bf16.mxu1 %v5968_v63 }
 0xeb5   :  { %4723 = vmatpush1.bf16.msra.mxu0 %v5966_v16  ;;  %4755 = vmatpush1.bf16.msra.mxu1 %v5972_v8 }
 0xeb6   :  { %4725 = vmatprep.subr.bf16.mxu0 %v5974_v14  ;;  %4757 = vmatprep.subr.bf16.mxu1 %v5977_v37 }
 0xeb9   :  { %4727 = vmatpush1.bf16.msra.mxu0 %v5980_v58  ;;  %4759 = vmatpush1.bf16.msra.mxu1 %v5984_v62 }
 0xeba   :  { %4729 = vmatprep.subr.bf16.mxu0 %v5986_v10  ;;  %4761 = vmatprep.subr.bf16.mxu1 %v5992_v32 }
 0xebd   :  { %4731 = vmatpush1.bf16.msra.mxu0 %v5994_v49  ;;  %4763 = vmatpush1.bf16.msra.mxu1 %v5997_v50 }
 0xf73   :  { %v3277_v0 = vpop.f32.mrb[28].mxu0  ;;  %v3348_v11 = vpop.f32.mrb[28].mxu1 }
 0xf74   :  { %v4776_v38 = vadd.f32 %v3277_v0, %v6046_v12  ;;  %v3279_v56 = vpop.f32.mrb[29].mxu0  ;;  %v3350_v13 = vpop.f32.mrb[29].mxu1  ;;  %v4792_v42 = vadd.f32 %v3348_v11, %v6061_v18 }
 0xf75   :  { %v4777_v23 = vadd.f32 %v3279_v56, %v6050_v44  ;;  %v4793_v26 = vadd.f32 %v3350_v13, %v6056_v60 }
 0xf76   :  { %v3670_v35 = vmul.f32 -1.442695, %v4776_v38 }
 0xf77   :  { %v3671_v9 = vmul.f32 -1.442695, %v4777_v23  ;;  %v3672_v30 = vmul.f32 -1.442695, %v4793_v26 }
 0xf78   :  { %5067 = vpow2.f32 %v3670_v35 }
 0xf79   :  { %5069 = vpow2.f32 %v3671_v9 }
 0xf7a   :  { %5071 = vpow2.f32 %v3672_v30 }
 0xf7b   :  { %5073 = vtanh.f32 %v4792_v42 }
 0xf82   :  { %v5068_v52 = vpop.eup %5067 }
 0xf83   :  { %v5070_v1 = vpop.eup %5069  ;;  %v3360_v7 = vadd.f32 1.0, %v5068_v52 }
 0xf84   :  { %v3366_v24 = vadd.f32 1.0, %v5070_v1  ;;  %v5072_v39 = vpop.eup %5071 }
 0xf85   :  { %5075 = vrcp.f32 %v3360_v7  ;;  %v5074_v40 = vpop.eup %5073  ;;  %v3373_v16 = vadd.f32 1.0, %v5072_v39 }
 0xf86   :  { %5077 = vrcp.f32 %v3366_v24 }
 0xf87   :  { %5079 = vrcp.f32 %v3373_v16 }
 0xf8f   :  { %v5076_v6 = vpop.eup %5075 }
 0xf90   :  { %v5078_v47 = vpop.eup %5077  ;;  %v3377_v22 = vmul.f32 %v5076_v6, %v5074_v40 }
 0xf91   :  { %v3376_v63 = vmul.f32 %v5078_v47, %v6277_v2  ;;  %v5080_v14 = vpop.eup %5079 }
 0xf93   :  { %v3378_v8 = vadd.f32 %v3377_v22, %v3376_v63 }
 0xf95   :  { %5081 = vtanh.f32 %v3378_v8 }
 0xf9f   :  { %v5082_v37 = vpop.eup %5081 }
 0xfa0   :  { %v3380_v58 = vmul.f32 %v5082_v37, %v5080_v14 }
 0xfa2   :  { %3384 = vst [vmem:[#allocation15 + $0x30] sm:$0xff] %v3380_v58  ;;  %3461 = vmatmul.mubr.f32.vlgmr.msra.gmra.mrb[30].mxu0 %v3380_v58  ;;  %3532 = vmatmul.mubr.f32.vlgmr.msra.gmra.mrb[30].mxu1 %v3380_v58 }
0x1075   :  { %v3462_v62 = vpop.f32.mrb[30].mxu0  ;;  %v3533_v10 = vpop.f32.mrb[30].mxu1 }
0x1076   :  { %v4778_v32 = vadd.f32 %v3462_v62, %v6046_v12  ;;  %v3464_v49 = vpop.f32.mrb[31].mxu0  ;;  %v3535_v50 = vpop.f32.mrb[31].mxu1  ;;  %v4794_v19 = vadd.f32 %v3533_v10, %v6061_v18 }
0x1077   :  { %v4779_v28 = vadd.f32 %v3464_v49, %v6050_v44  ;;  %v4795_v21 = vadd.f32 %v3535_v50, %v6056_v60 }
0x1078   :  { %v3673_v36 = vmul.f32 -1.442695, %v4778_v32 }
0x1079   :  { %v3674_v17 = vmul.f32 -1.442695, %v4779_v28  ;;  %v3675_v3 = vmul.f32 -1.442695, %v4795_v21 }
0x107a   :  { %5083 = vpow2.f32 %v3673_v36 }
0x107b   :  { %5085 = vpow2.f32 %v3674_v17 }
0x107c   :  { %5087 = vpow2.f32 %v3675_v3 }
0x107d   :  { %5089 = vtanh.f32 %v4794_v19 }
0x1084   :  { %v5084_v59 = vpop.eup %5083 }
0x1085   :  { %v5086_v25 = vpop.eup %5085  ;;  %v3545_v33 = vadd.f32 1.0, %v5084_v59 }
0x1086   :  { %v3551_v45 = vadd.f32 1.0, %v5086_v25  ;;  %v5088_v12 = vpop.eup %5087 }
0x1087   :  { %5091 = vrcp.f32 %v3545_v33  ;;  %v5090_v46 = vpop.eup %5089  ;;  %v3558_v55 = vadd.f32 1.0, %v5088_v12 }
0x1088   :  { %5093 = vrcp.f32 %v3551_v45 }
0x1089   :  { %5095 = vrcp.f32 %v3558_v55 }
0x1091   :  { %v5092_v44 = vpop.eup %5091 }
0x1092   :  { %v5094_v48 = vpop.eup %5093  ;;  %v3562_v57 = vmul.f32 %v5092_v44, %v5090_v46 }
0x1093   :  { %v3561_v34 = vmul.f32 %v5094_v48, %v3378_v8  ;;  %v5096_v60 = vpop.eup %5095 }
0x1095   :  { %v3563_v53 = vadd.f32 %v3562_v57, %v3561_v34 }
0x1097   :  { %3577 = vst [vmem:[#allocation18 + $0x8] sm:$0xff] %v3563_v53  ;;  %5097 = vtanh.f32 %v3563_v53 }
0x10a1   :  { %v5098_v18 = vpop.eup %5097 }
0x10a2   :  { %v3565_v4 = vmul.f32 %v5098_v18, %v5096_v60 }
0x10a4   :  { %3569 = vst [vmem:[#allocation15 + $0x38] sm:$0xff] %v3565_v4  ;;  %3573 = vst [vmem:[#allocation16 + $0x8] sm:$0xff] %v3565_v4 }
0x10a5   :  { %5220 = shalt.err (!%p5217_p2)
}
0x10a6   :  { %s5221_s11 = scalar_lea.hbm %s6387_s7, 256 }
0x10a7   :  { %p5222_p3 = scmp.ne.s32.totalorder %s6387_s7, %s5221_s11  ;;  %p5225_p4 = scmp.lt.u32.totalorder %s5221_s11, %s6387_s7 }
0x10a9   :  { %p5227_p5 = pnand %p5225_p4, %p5222_p3 }
0x10ab   :  { %5230 = shalt.err (!%p5227_p5)
}
0x10ac   :  { %3601 = dma.vmem_to_hbm [thread:$0]  %s3596_s26, 256, %s6387_s7, [#allocation17], %s5294_s2, %s5294_s2, %s5295_s17  }
0x10ad   :  { %s5231_s21 = scalar_lea.vmem %s6321_s29, 1024  ;;  %p5236_p7 = scmp.lt.s32.totalorder %s6321_s29, %s6321_s29 }
0x10ae   :  { %p5232_p6 = scmp.ne.s32.totalorder %s6321_s29, %s5231_s21  ;;  %p5237_p8 = scmp.lt.s32.totalorder %s5231_s21, %s5231_s21 }
0x10b0   :  { %p5238_p9 = por %p5237_p8, %p5236_p7 }
0x10b2   :  { %p5239_p10 = pnand %p5238_p9, %p5232_p6 }
0x10b4   :  { %5242 = shalt.err (!%p5239_p10)
}
0x10b5   :  { %s5243_s3 = scalar_lea.hbm %s6386_s6, 1024 }
0x10b6   :  { %p5244_p11 = scmp.ne.s32.totalorder %s6386_s6, %s5243_s3  ;;  %p5247_p12 = scmp.lt.u32.totalorder %s5243_s3, %s6386_s6 }
0x10b8   :  { %p5249_p13 = pnand %p5247_p12, %p5244_p11 }
0x10ba   :  { %5252 = shalt.err (!%p5249_p13)
}
0x10bb   :  { %3589 = dma.vmem_to_hbm [thread:$0]  %s6321_s29, 1024, %s6386_s6, [#allocation8], %s5294_s2, %s5294_s2, %s5295_s17  }
0x10bc   :  { %s5253_s25 = scalar_lea.vmem %s6323_s28, 256  ;;  %p5258_p1 = scmp.lt.s32.totalorder %s6323_s28, %s6323_s28 }
0x10bd   :  { %p5254_p0 = scmp.ne.s32.totalorder %s6323_s28, %s5253_s25  ;;  %p5259_p2 = scmp.lt.s32.totalorder %s5253_s25, %s5253_s25 }
0x10bf   :  { %p5260_p3 = por %p5259_p2, %p5258_p1 }
0x10c1   :  { %p5261_p4 = pnand %p5260_p3, %p5254_p0 }
0x10c3   :  { %5264 = shalt.err (!%p5261_p4)
}
0x10c4   :  { %s5265_s27 = scalar_lea.hbm %s6388_s8, 256 }
0x10c5   :  { %p5266_p5 = scmp.ne.s32.totalorder %s6388_s8, %s5265_s27  ;;  %p5269_p6 = scmp.lt.u32.totalorder %s5265_s27, %s6388_s8 }
0x10c7   :  { %p5271_p7 = pnand %p5269_p6, %p5266_p5 }
0x10c9   :  { %5274 = shalt.err (!%p5271_p7)
}
0x10ca   :  { %3613 = dma.vmem_to_hbm [thread:$0]  %s6323_s28, 256, %s6388_s8, [#allocation17], %s5294_s2, %s5294_s2, %s5295_s17  }
0x10cb   :  { %5281 = dma.done.wait [#allocation8], 1024  }
0x10cc   :  { %5282 = vsyncadd [#allocation8], 4294966272 }
0x10cd   :  { %5283 = dma.done.wait [#allocation17], 512  }
0x10ce   :  { %5284 = vsyncadd [#allocation17], 4294966784 }
0x10cf   :  { %3623 = vsyncpa [#allocation7], 1 }
0x10d0   :  { %3624 = vsyncpa [#allocation10], 1 }
0x10d1   :  { %3625 = vsyncpa [#allocation13], 1 }
0x10d2   :  { %3626 = vsyncpa [#allocation8], 1 }
0x10d3   :  { %3627 = vsyncpa [#allocation17], 1 }

</bundles_post_ra>
